<compile_context>
chip_gen: v5e
topology: v5e:2x2
jax: 0.10.0
libtpu: 0.0.40
codegen_flags: <defaults>
</compile_context>

<pallas_src>
import functools

import numpy as np

import jax
import jax.numpy as jnp
from jax.experimental import pallas as pl
from jax.experimental.pallas import tpu as pltpu


# ---------------------------------------------------------------------------
# Fused Pallas kernel (grid over the 4 pool2 phases)
# ---------------------------------------------------------------------------

def _lenet_fused_kernel(p1_ref,            # (4, 75, B*196) bf16  conv1 phase patches
                        w1_ref, b1_ref,    # (6, 75) bf16, (6, 1) f32
                        m2_ref, b2_ref,    # (1, 1176, 400) bf16 block, (1, 400) f32
                        w3_ref, b3_ref,    # (400, 120), (1, 120) f32
                        w4_ref, b4_ref,    # (120, 84),  (1, 84)  f32
                        w5_ref, b5_ref,    # (84, 10),   (1, 10)  f32
                        out_ref,           # (B, 10) f32
                        lhs_ref,           # scratch (B, 1176) f32
                        acc_ref,           # scratch (B, 400)  f32
                        *, batch):
    k = pl.program_id(0)
    last = pl.num_programs(0) - 1

    # ---- phase 0 only: conv1 + bias + ReLU fused with pool1 ---------------
    @pl.when(k == 0)
    def _conv1():
        w1 = w1_ref[...]                                   # (6, 75) bf16
        c1 = None
        for ph in range(4):                                # pool1 phases
            t = jnp.dot(w1, p1_ref[ph],
                        preferred_element_type=jnp.float32)  # (6, B*196)
            c1 = t if c1 is None else jnp.maximum(c1, t)
        h1 = jnp.maximum(c1 + b1_ref[...], 0.0)            # (6, B*196) f32
        # Re-block into conv2's lhs layout: lhs[n, c*196 + p] = h1[c, n*196 + p]
        for n in range(batch):
            for c in range(6):
                lhs_ref[n:n + 1, c * 196:(c + 1) * 196] = \
                    h1[c:c + 1, n * 196:(n + 1) * 196]

    # ---- conv2: one (B,1176)@(1176,400) matmul per phase, phase-max -------
    lhs = lhs_ref[...].astype(jnp.bfloat16)                 # (B, 1176)
    v = jnp.dot(lhs, m2_ref[0], preferred_element_type=jnp.float32)  # (B, 400)

    @pl.when(k == 0)
    def _init_acc():
        acc_ref[...] = v

    @pl.when(k > 0)
    def _update_acc():
        acc_ref[...] = jnp.maximum(acc_ref[...], v)

    # ---- last phase: bias + ReLU + FC head + single output store ----------
    @pl.when(k == last)
    def _head():
        h2 = jnp.maximum(acc_ref[...] + b2_ref[...], 0.0)   # (B, 400)
        h3 = jnp.maximum(
            jnp.dot(h2, w3_ref[...], preferred_element_type=jnp.float32)
            + b3_ref[...], 0.0)                             # (B, 120)
        h4 = jnp.maximum(
            jnp.dot(h3, w4_ref[...], preferred_element_type=jnp.float32)
            + b4_ref[...], 0.0)                             # (B, 84)
        out_ref[...] = (
            jnp.dot(h4, w5_ref[...], preferred_element_type=jnp.float32)
            + b5_ref[...])                                  # (B, 10)


# ---------------------------------------------------------------------------
# Per-forward XLA glue: phase-split im2col of the input for conv1
# ---------------------------------------------------------------------------

def _conv1_phase_patches(x):
    """x: (N, 3, 32, 32) -> (4, 75, N*196) bf16.

    dim 0 = pool1 phase (dh*2 + dw); dim 1 = tap t = c*25 + kh*5 + kw
    (matches conv1_w.reshape(6, 75)); dim 2 = n*196 + (i*14 + j) where the
    conv1 output position is oh = 2*i + dh, ow = 2*j + dw (pooled coords).
    """
    n = x.shape[0]
    x = x.astype(jnp.float32)
    taps = []
    for kh in range(5):
        for kw in range(5):
            taps.append(x[:, :, kh:kh + 28, kw:kw + 28])        # (N,3,28,28)
    pf = jnp.stack(taps, axis=2).reshape(n, 75, 28, 28)
    phases = []
    for dh in range(2):
        for dw in range(2):
            phases.append(pf[:, :, dh::2, dw::2].reshape(n, 75, 196))
    p = jnp.stack(phases, axis=0)                               # (4, N, 75, 196)
    p = jnp.transpose(p, (0, 2, 1, 3)).reshape(4, 75, n * 196)
    return p.astype(jnp.bfloat16)


# ---------------------------------------------------------------------------
# Forward pass
# ---------------------------------------------------------------------------

def net_forward(x, params):
    n = x.shape[0]
    patches = _conv1_phase_patches(x)                           # (4, 75, n*196)

    grid_spec = pltpu.PrefetchScalarGridSpec(
        num_scalar_prefetch=0,
        grid=(4,),                                              # pool2 phases
        in_specs=[
            pl.BlockSpec((4, 75, n * 196), lambda k: (0, 0, 0)),  # patches
            pl.BlockSpec((6, 75), lambda k: (0, 0)),              # w1
            pl.BlockSpec((6, 1), lambda k: (0, 0)),               # b1
            pl.BlockSpec((1, 1176, 400), lambda k: (k, 0, 0)),    # m2 (per phase)
            pl.BlockSpec((1, 400), lambda k: (0, 0)),             # b2
            pl.BlockSpec((400, 120), lambda k: (0, 0)),           # fc1_w
            pl.BlockSpec((1, 120), lambda k: (0, 0)),             # fc1_b
            pl.BlockSpec((120, 84), lambda k: (0, 0)),            # fc2_w
            pl.BlockSpec((1, 84), lambda k: (0, 0)),              # fc2_b
            pl.BlockSpec((84, 10), lambda k: (0, 0)),             # fc3_w
            pl.BlockSpec((1, 10), lambda k: (0, 0)),              # fc3_b
        ],
        out_specs=pl.BlockSpec((n, 10), lambda k: (0, 0)),
        scratch_shapes=[pltpu.VMEM((n, 1176), jnp.float32),       # conv2 lhs
                        pltpu.VMEM((n, 400), jnp.float32)],       # phase-max acc
    )

    return pl.pallas_call(
        functools.partial(_lenet_fused_kernel, batch=n),
        out_shape=jax.ShapeDtypeStruct((n, 10), jnp.float32),
        grid_spec=grid_spec,
        compiler_params=pltpu.CompilerParams(
            dimension_semantics=("arbitrary",)),                  # phase axis = reduction
    )(patches,
      params["w1"], params["b1"],
      params["m2"], params["b2"],
      params["fc1_w"], params["fc1_b"],
      params["fc2_w"], params["fc2_b"],
      params["fc3_w"], params["fc3_b"])


# ---------------------------------------------------------------------------
# Parameters: PyTorch-style init + one-time preprocessing (hoisted)
# ---------------------------------------------------------------------------

def init_params(key):
    """Deterministic PyTorch-style (uniform +/- 1/sqrt(fan_in)) init,
    in the original torch layouts."""
    def u(k, shape, fan_in):
        bound = 1.0 / jnp.sqrt(float(fan_in))
        return jax.random.uniform(k, shape, jnp.float32, -bound, bound)

    keys = jax.random.split(key, 10)
    return {
        "conv1_w": u(keys[0], (6, 3, 5, 5), 3 * 5 * 5),
        "conv1_b": u(keys[1], (6,), 3 * 5 * 5),
        "conv2_w": u(keys[2], (16, 6, 5, 5), 6 * 5 * 5),
        "conv2_b": u(keys[3], (16,), 6 * 5 * 5),
        "fc1_w":   u(keys[4], (120, 400), 400),
        "fc1_b":   u(keys[5], (120,), 400),
        "fc2_w":   u(keys[6], (84, 120), 120),
        "fc2_b":   u(keys[7], (84,), 120),
        "fc3_w":   u(keys[8], (10, 84), 84),
        "fc3_b":   u(keys[9], (10,), 84),
    }


def _build_conv2_dense(w2_np):
    """conv2 weights (16, 6, 5, 5) -> (4, 1176, 400) dense per-phase matrices.

    For pooling phase (dh, dw):
      M[dh*2+dw][c*196 + i*14 + j, o*25 + i2*5 + j2] = w2[o, c, kh, kw]
    whenever i = 2*i2 + dh + kh and j = 2*j2 + dw + kw (0 otherwise), so
      lhs[n, :] @ M  ==  conv2 linear term at oh=2*i2+dh, ow=2*j2+dw,
    flattened in torch.flatten(x, 1) order.
    """
    m2 = np.zeros((4, 6, 196, 400), np.float32)
    w2r = np.transpose(w2_np.reshape(16, 6, 25), (1, 2, 0))     # (c, tap, o)
    kh = np.arange(5)
    kw = np.arange(5)
    for kidx, (dh, dw) in enumerate(((0, 0), (0, 1), (1, 0), (1, 1))):
        for i2 in range(5):
            for j2 in range(5):
                rows = ((2 * i2 + dh + kh)[:, None] * 14
                        + (2 * j2 + dw + kw)[None, :]).reshape(25)
                cols = np.arange(16) * 25 + i2 * 5 + j2
                m2[kidx][:, rows[:, None], cols[None, :]] = w2r
    return m2.reshape(4, 1176, 400)


def prepare_params(raw):
    """One-time weight preprocessing (transposes / dense conv2 matrices /
    bias reshapes / bf16 casts) so the per-step forward does no re-layout."""
    b2e = jnp.repeat(raw["conv2_b"].astype(jnp.float32), 25).reshape(1, 400)
    return {
        "w1": raw["conv1_w"].reshape(6, 75).astype(jnp.bfloat16),
        "b1": raw["conv1_b"].astype(jnp.float32).reshape(6, 1),
        "m2": jnp.asarray(_build_conv2_dense(
            np.asarray(raw["conv2_w"], np.float32)), dtype=jnp.bfloat16),
        "b2": b2e,
        "fc1_w": raw["fc1_w"].astype(jnp.float32).T,          # (400, 120)
        "fc1_b": raw["fc1_b"].astype(jnp.float32).reshape(1, 120),
        "fc2_w": raw["fc2_w"].astype(jnp.float32).T,          # (120, 84)
        "fc2_b": raw["fc2_b"].astype(jnp.float32).reshape(1, 84),
        "fc3_w": raw["fc3_w"].astype(jnp.float32).T,          # (84, 10)
        "fc3_b": raw["fc3_b"].astype(jnp.float32).reshape(1, 10),
    }


# ---------------------------------------------------------------------------
# Pure-JAX reference (correctness sanity check)
# ---------------------------------------------------------------------------

def reference_forward(x, raw):
    with jax.default_matmul_precision("float32"):
        dn = ("NCHW", "OIHW", "NCHW")
        y = jax.lax.conv_general_dilated(x, raw["conv1_w"], (1, 1), "VALID",
                                         dimension_numbers=dn)
        y = jax.nn.relu(y + raw["conv1_b"][None, :, None, None])
        y = jax.lax.reduce_window(y, -jnp.inf, jax.lax.max,
                                  (1, 1, 2, 2), (1, 1, 2, 2), "VALID")
        y = jax.lax.conv_general_dilated(y, raw["conv2_w"], (1, 1), "VALID",
                                         dimension_numbers=dn)
        y = jax.nn.relu(y + raw["conv2_b"][None, :, None, None])
        y = jax.lax.reduce_window(y, -jnp.inf, jax.lax.max,
                                  (1, 1, 2, 2), (1, 1, 2, 2), "VALID")
        y = y.reshape(y.shape[0], -1)
        y = jax.nn.relu(y @ raw["fc1_w"].T + raw["fc1_b"])
        y = jax.nn.relu(y @ raw["fc2_w"].T + raw["fc2_b"])
        y = y @ raw["fc3_w"].T + raw["fc3_b"]
    return y


# ---------------------------------------------------------------------------
# Main
# ---------------------------------------------------------------------------

if __name__ == "__main__":
    key = jax.random.PRNGKey(0)
    k_params, k_x = jax.random.split(key)

    raw = init_params(k_params)
    params = prepare_params(raw)          # hoisted weight preprocessing
    # CIFAR-sized input implied by fc1 = 16*5*5 -> 120
    x = jax.random.normal(k_x, (2, 3, 32, 32), jnp.float32)

    fwd = jax.jit(net_forward)
    out = jax.block_until_ready(fwd(x, params))

    assert out.shape == (2, 10), out.shape
    assert bool(jnp.all(jnp.isfinite(out)))

    ref = jax.block_until_ready(reference_forward(x, raw))
    max_err = float(jnp.max(jnp.abs(out - ref)))
    # conv path uses bf16 weights/activations (f32 accumulation); 1e-2 abs
    # tolerance leaves ~10x margin over the observed/expected error.
    assert max_err < 1e-2, f"mismatch vs reference: max_err={max_err}"

    print("KERNEL_OK")
</pallas_src>

<mosaic_0001>
module attributes {stable_mosaic.version = 11 : i64} {
  func.func @_lenet_fused_kernel(%arg0: i32, %arg1: memref<4x75x392xbf16, #tpu.memory_space<vmem>>, %arg2: memref<6x75xbf16, #tpu.memory_space<vmem>>, %arg3: memref<6x1xf32, #tpu.memory_space<vmem>>, %arg4: memref<1x1176x400xbf16, #tpu.memory_space<vmem>>, %arg5: memref<1x400xf32, #tpu.memory_space<vmem>>, %arg6: memref<400x120xf32, #tpu.memory_space<vmem>>, %arg7: memref<1x120xf32, #tpu.memory_space<vmem>>, %arg8: memref<120x84xf32, #tpu.memory_space<vmem>>, %arg9: memref<1x84xf32, #tpu.memory_space<vmem>>, %arg10: memref<84x10xf32, #tpu.memory_space<vmem>>, %arg11: memref<1x10xf32, #tpu.memory_space<vmem>>, %arg12: memref<2x10xf32, #tpu.memory_space<vmem>>, %arg13: memref<2x1176xf32, #tpu.memory_space<vmem>>, %arg14: memref<2x400xf32, #tpu.memory_space<vmem>>) attributes {dimension_semantics = [#tpu.dimension_semantics<arbitrary>], iteration_bounds = array<i64: 4>, scalar_prefetch = 0 : i64, scratch_operands = 2 : i64, tpu.core_type = #tpu.core_type<tc>, window_params = [{pipeline_mode = #tpu.pipeline_mode<synchronous>, transform_indices = @transform_0, window_bounds = array<i64: 4, 75, 392>}, {pipeline_mode = #tpu.pipeline_mode<synchronous>, transform_indices = @transform_1, window_bounds = array<i64: 6, 75>}, {pipeline_mode = #tpu.pipeline_mode<synchronous>, transform_indices = @transform_2, window_bounds = array<i64: 6, 1>}, {transform_indices = @transform_3, window_bounds = array<i64: 1, 1176, 400>}, {pipeline_mode = #tpu.pipeline_mode<synchronous>, transform_indices = @transform_4, window_bounds = array<i64: 1, 400>}, {pipeline_mode = #tpu.pipeline_mode<synchronous>, transform_indices = @transform_5, window_bounds = array<i64: 400, 120>}, {pipeline_mode = #tpu.pipeline_mode<synchronous>, transform_indices = @transform_6, window_bounds = array<i64: 1, 120>}, {pipeline_mode = #tpu.pipeline_mode<synchronous>, transform_indices = @transform_7, window_bounds = array<i64: 120, 84>}, {pipeline_mode = #tpu.pipeline_mode<synchronous>, transform_indices = @transform_8, window_bounds = array<i64: 1, 84>}, {pipeline_mode = #tpu.pipeline_mode<synchronous>, transform_indices = @transform_9, window_bounds = array<i64: 84, 10>}, {pipeline_mode = #tpu.pipeline_mode<synchronous>, transform_indices = @transform_10, window_bounds = array<i64: 1, 10>}, {pipeline_mode = #tpu.pipeline_mode<synchronous>, transform_indices = @transform_11, window_bounds = array<i64: 2, 10>}]} {
    %c0_i32 = arith.constant 0 : i32
    %0 = arith.cmpi eq, %arg0, %c0_i32 : i32
    %1 = arith.extui %0 : i1 to i32
    %c0_i32_0 = arith.constant 0 : i32
    %2 = arith.cmpi ne, %1, %c0_i32_0 : i32
    scf.if %2 {
      %c0_10 = arith.constant 0 : index
      %c0_11 = arith.constant 0 : index
      %17 = vector.load %arg2[%c0_10, %c0_11] : memref<6x75xbf16, #tpu.memory_space<vmem>>, vector<6x75xbf16>
      %c0_12 = arith.constant 0 : index
      %c0_13 = arith.constant 0 : index
      %c0_14 = arith.constant 0 : index
      %18 = vector.load %arg1[%c0_12, %c0_13, %c0_14] : memref<4x75x392xbf16, #tpu.memory_space<vmem>>, vector<1x75x392xbf16>
      %19 = vector.shape_cast %18 : vector<1x75x392xbf16> to vector<75x392xbf16>
      %cst_15 = arith.constant dense<0.000000e+00> : vector<6x392xf32>
      %20 = tpu.matmul %17, %19, %cst_15 {dimension_numbers = #tpu.dot_dimension_numbers<[1], [0], [0], [1], [0, 0, 1, 1], [], []>} : vector<6x75xbf16>, vector<75x392xbf16>, vector<6x392xf32> -> vector<6x392xf32>
      %c1 = arith.constant 1 : index
      %c0_16 = arith.constant 0 : index
      %c0_17 = arith.constant 0 : index
      %21 = vector.load %arg1[%c1, %c0_16, %c0_17] : memref<4x75x392xbf16, #tpu.memory_space<vmem>>, vector<1x75x392xbf16>
      %22 = vector.shape_cast %21 : vector<1x75x392xbf16> to vector<75x392xbf16>
      %cst_18 = arith.constant dense<0.000000e+00> : vector<6x392xf32>
      %23 = tpu.matmul %17, %22, %cst_18 {dimension_numbers = #tpu.dot_dimension_numbers<[1], [0], [0], [1], [0, 0, 1, 1], [], []>} : vector<6x75xbf16>, vector<75x392xbf16>, vector<6x392xf32> -> vector<6x392xf32>
      %24 = arith.maximumf %20, %23 : vector<6x392xf32>
      %c2 = arith.constant 2 : index
      %c0_19 = arith.constant 0 : index
      %c0_20 = arith.constant 0 : index
      %25 = vector.load %arg1[%c2, %c0_19, %c0_20] : memref<4x75x392xbf16, #tpu.memory_space<vmem>>, vector<1x75x392xbf16>
      %26 = vector.shape_cast %25 : vector<1x75x392xbf16> to vector<75x392xbf16>
      %cst_21 = arith.constant dense<0.000000e+00> : vector<6x392xf32>
      %27 = tpu.matmul %17, %26, %cst_21 {dimension_numbers = #tpu.dot_dimension_numbers<[1], [0], [0], [1], [0, 0, 1, 1], [], []>} : vector<6x75xbf16>, vector<75x392xbf16>, vector<6x392xf32> -> vector<6x392xf32>
      %28 = arith.maximumf %24, %27 : vector<6x392xf32>
      %c3 = arith.constant 3 : index
      %c0_22 = arith.constant 0 : index
      %c0_23 = arith.constant 0 : index
      %29 = vector.load %arg1[%c3, %c0_22, %c0_23] : memref<4x75x392xbf16, #tpu.memory_space<vmem>>, vector<1x75x392xbf16>
      %30 = vector.shape_cast %29 : vector<1x75x392xbf16> to vector<75x392xbf16>
      %cst_24 = arith.constant dense<0.000000e+00> : vector<6x392xf32>
      %31 = tpu.matmul %17, %30, %cst_24 {dimension_numbers = #tpu.dot_dimension_numbers<[1], [0], [0], [1], [0, 0, 1, 1], [], []>} : vector<6x75xbf16>, vector<75x392xbf16>, vector<6x392xf32> -> vector<6x392xf32>
      %32 = arith.maximumf %28, %31 : vector<6x392xf32>
      %c0_25 = arith.constant 0 : index
      %c0_26 = arith.constant 0 : index
      %33 = vector.load %arg3[%c0_25, %c0_26] : memref<6x1xf32, #tpu.memory_space<vmem>>, vector<6x1xf32>
      %34 = vector.broadcast %33 : vector<6x1xf32> to vector<6x392xf32>
      %35 = arith.addf %32, %34 : vector<6x392xf32>
      %cst_27 = arith.constant 0.000000e+00 : f32
      %36 = vector.broadcast %cst_27 : f32 to vector<6x392xf32>
      %37 = arith.maximumf %35, %36 : vector<6x392xf32>
      %38 = vector.extract_strided_slice %37 {offsets = [0, 0], sizes = [1, 196], strides = [1, 1]} : vector<6x392xf32> to vector<1x196xf32>
      %c0_28 = arith.constant 0 : index
      %c0_29 = arith.constant 0 : index
      %39 = vector.load %arg13[%c0_28, %c0_29] : memref<2x1176xf32, #tpu.memory_space<vmem>>, vector<1x196xf32>
      tpu.vector_store %arg13[%c0_28, %c0_29], %38 {strides = array<i32>} : memref<2x1176xf32, #tpu.memory_space<vmem>>, vector<1x196xf32>,
      %40 = vector.extract_strided_slice %37 {offsets = [1, 0], sizes = [1, 196], strides = [1, 1]} : vector<6x392xf32> to vector<1x196xf32>
      %c0_30 = arith.constant 0 : index
      %c196 = arith.constant 196 : index
      %41 = vector.load %arg13[%c0_30, %c196] : memref<2x1176xf32, #tpu.memory_space<vmem>>, vector<1x196xf32>
      tpu.vector_store %arg13[%c0_30, %c196], %40 {strides = array<i32>} : memref<2x1176xf32, #tpu.memory_space<vmem>>, vector<1x196xf32>,
      %42 = vector.extract_strided_slice %37 {offsets = [2, 0], sizes = [1, 196], strides = [1, 1]} : vector<6x392xf32> to vector<1x196xf32>
      %c0_31 = arith.constant 0 : index
      %c392 = arith.constant 392 : index
      %43 = vector.load %arg13[%c0_31, %c392] : memref<2x1176xf32, #tpu.memory_space<vmem>>, vector<1x196xf32>
      tpu.vector_store %arg13[%c0_31, %c392], %42 {strides = array<i32>} : memref<2x1176xf32, #tpu.memory_space<vmem>>, vector<1x196xf32>,
      %44 = vector.extract_strided_slice %37 {offsets = [3, 0], sizes = [1, 196], strides = [1, 1]} : vector<6x392xf32> to vector<1x196xf32>
      %c0_32 = arith.constant 0 : index
      %c588 = arith.constant 588 : index
      %45 = vector.load %arg13[%c0_32, %c588] : memref<2x1176xf32, #tpu.memory_space<vmem>>, vector<1x196xf32>
      tpu.vector_store %arg13[%c0_32, %c588], %44 {strides = array<i32>} : memref<2x1176xf32, #tpu.memory_space<vmem>>, vector<1x196xf32>,
      %46 = vector.extract_strided_slice %37 {offsets = [4, 0], sizes = [1, 196], strides = [1, 1]} : vector<6x392xf32> to vector<1x196xf32>
      %c0_33 = arith.constant 0 : index
      %c784 = arith.constant 784 : index
      %47 = vector.load %arg13[%c0_33, %c784] : memref<2x1176xf32, #tpu.memory_space<vmem>>, vector<1x196xf32>
      tpu.vector_store %arg13[%c0_33, %c784], %46 {strides = array<i32>} : memref<2x1176xf32, #tpu.memory_space<vmem>>, vector<1x196xf32>,
      %48 = vector.extract_strided_slice %37 {offsets = [5, 0], sizes = [1, 196], strides = [1, 1]} : vector<6x392xf32> to vector<1x196xf32>
      %c0_34 = arith.constant 0 : index
      %c980 = arith.constant 980 : index
      %49 = vector.load %arg13[%c0_34, %c980] : memref<2x1176xf32, #tpu.memory_space<vmem>>, vector<1x196xf32>
      tpu.vector_store %arg13[%c0_34, %c980], %48 {strides = array<i32>} : memref<2x1176xf32, #tpu.memory_space<vmem>>, vector<1x196xf32>,
      %50 = vector.extract_strided_slice %37 {offsets = [0, 196], sizes = [1, 196], strides = [1, 1]} : vector<6x392xf32> to vector<1x196xf32>
      %c1_35 = arith.constant 1 : index
      %c0_36 = arith.constant 0 : index
      %51 = vector.load %arg13[%c1_35, %c0_36] : memref<2x1176xf32, #tpu.memory_space<vmem>>, vector<1x196xf32>
      tpu.vector_store %arg13[%c1_35, %c0_36], %50 {strides = array<i32>} : memref<2x1176xf32, #tpu.memory_space<vmem>>, vector<1x196xf32>,
      %52 = vector.extract_strided_slice %37 {offsets = [1, 196], sizes = [1, 196], strides = [1, 1]} : vector<6x392xf32> to vector<1x196xf32>
      %c1_37 = arith.constant 1 : index
      %c196_38 = arith.constant 196 : index
      %53 = vector.load %arg13[%c1_37, %c196_38] : memref<2x1176xf32, #tpu.memory_space<vmem>>, vector<1x196xf32>
      tpu.vector_store %arg13[%c1_37, %c196_38], %52 {strides = array<i32>} : memref<2x1176xf32, #tpu.memory_space<vmem>>, vector<1x196xf32>,
      %54 = vector.extract_strided_slice %37 {offsets = [2, 196], sizes = [1, 196], strides = [1, 1]} : vector<6x392xf32> to vector<1x196xf32>
      %c1_39 = arith.constant 1 : index
      %c392_40 = arith.constant 392 : index
      %55 = vector.load %arg13[%c1_39, %c392_40] : memref<2x1176xf32, #tpu.memory_space<vmem>>, vector<1x196xf32>
      tpu.vector_store %arg13[%c1_39, %c392_40], %54 {strides = array<i32>} : memref<2x1176xf32, #tpu.memory_space<vmem>>, vector<1x196xf32>,
      %56 = vector.extract_strided_slice %37 {offsets = [3, 196], sizes = [1, 196], strides = [1, 1]} : vector<6x392xf32> to vector<1x196xf32>
      %c1_41 = arith.constant 1 : index
      %c588_42 = arith.constant 588 : index
      %57 = vector.load %arg13[%c1_41, %c588_42] : memref<2x1176xf32, #tpu.memory_space<vmem>>, vector<1x196xf32>
      tpu.vector_store %arg13[%c1_41, %c588_42], %56 {strides = array<i32>} : memref<2x1176xf32, #tpu.memory_space<vmem>>, vector<1x196xf32>,
      %58 = vector.extract_strided_slice %37 {offsets = [4, 196], sizes = [1, 196], strides = [1, 1]} : vector<6x392xf32> to vector<1x196xf32>
      %c1_43 = arith.constant 1 : index
      %c784_44 = arith.constant 784 : index
      %59 = vector.load %arg13[%c1_43, %c784_44] : memref<2x1176xf32, #tpu.memory_space<vmem>>, vector<1x196xf32>
      tpu.vector_store %arg13[%c1_43, %c784_44], %58 {strides = array<i32>} : memref<2x1176xf32, #tpu.memory_space<vmem>>, vector<1x196xf32>,
      %60 = vector.extract_strided_slice %37 {offsets = [5, 196], sizes = [1, 196], strides = [1, 1]} : vector<6x392xf32> to vector<1x196xf32>
      %c1_45 = arith.constant 1 : index
      %c980_46 = arith.constant 980 : index
      %61 = vector.load %arg13[%c1_45, %c980_46] : memref<2x1176xf32, #tpu.memory_space<vmem>>, vector<1x196xf32>
      tpu.vector_store %arg13[%c1_45, %c980_46], %60 {strides = array<i32>} : memref<2x1176xf32, #tpu.memory_space<vmem>>, vector<1x196xf32>,
    } else {
    }
    %c0 = arith.constant 0 : index
    %c0_1 = arith.constant 0 : index
    %3 = vector.load %arg13[%c0, %c0_1] : memref<2x1176xf32, #tpu.memory_space<vmem>>, vector<2x1176xf32>
    %4 = arith.truncf %3 : vector<2x1176xf32> to vector<2x1176xbf16>
    %c0_2 = arith.constant 0 : index
    %c0_3 = arith.constant 0 : index
    %c0_4 = arith.constant 0 : index
    %5 = vector.load %arg4[%c0_2, %c0_3, %c0_4] : memref<1x1176x400xbf16, #tpu.memory_space<vmem>>, vector<1x1176x400xbf16>
    %6 = vector.shape_cast %5 : vector<1x1176x400xbf16> to vector<1176x400xbf16>
    %cst = arith.constant dense<0.000000e+00> : vector<2x400xf32>
    %7 = tpu.matmul %4, %6, %cst {dimension_numbers = #tpu.dot_dimension_numbers<[1], [0], [0], [1], [0, 0, 1, 1], [], []>} : vector<2x1176xbf16>, vector<1176x400xbf16>, vector<2x400xf32> -> vector<2x400xf32>
    %c0_i32_5 = arith.constant 0 : i32
    %8 = arith.cmpi eq, %arg0, %c0_i32_5 : i32
    %9 = arith.extui %8 : i1 to i32
    %c0_i32_6 = arith.constant 0 : i32
    %10 = arith.cmpi ne, %9, %c0_i32_6 : i32
    scf.if %10 {
      %c0_10 = arith.constant 0 : index
      %c0_11 = arith.constant 0 : index
      %17 = vector.load %arg14[%c0_10, %c0_11] : memref<2x400xf32, #tpu.memory_space<vmem>>, vector<2x400xf32>
      tpu.vector_store %arg14[%c0_10, %c0_11], %7 {strides = array<i32>} : memref<2x400xf32, #tpu.memory_space<vmem>>, vector<2x400xf32>,
    } else {
    }
    %c0_i32_7 = arith.constant 0 : i32
    %11 = arith.cmpi sgt, %arg0, %c0_i32_7 : i32
    %12 = arith.extui %11 : i1 to i32
    %c0_i32_8 = arith.constant 0 : i32
    %13 = arith.cmpi ne, %12, %c0_i32_8 : i32
    scf.if %13 {
      %c0_10 = arith.constant 0 : index
      %c0_11 = arith.constant 0 : index
      %17 = vector.load %arg14[%c0_10, %c0_11] : memref<2x400xf32, #tpu.memory_space<vmem>>, vector<2x400xf32>
      %18 = arith.maximumf %17, %7 : vector<2x400xf32>
      %c0_12 = arith.constant 0 : index
      %c0_13 = arith.constant 0 : index
      %19 = vector.load %arg14[%c0_12, %c0_13] : memref<2x400xf32, #tpu.memory_space<vmem>>, vector<2x400xf32>
      tpu.vector_store %arg14[%c0_12, %c0_13], %18 {strides = array<i32>} : memref<2x400xf32, #tpu.memory_space<vmem>>, vector<2x400xf32>,
    } else {
    }
    %c3_i32 = arith.constant 3 : i32
    %14 = arith.cmpi eq, %arg0, %c3_i32 : i32
    %15 = arith.extui %14 : i1 to i32
    %c0_i32_9 = arith.constant 0 : i32
    %16 = arith.cmpi ne, %15, %c0_i32_9 : i32
    scf.if %16 {
      %c0_10 = arith.constant 0 : index
      %c0_11 = arith.constant 0 : index
      %17 = vector.load %arg14[%c0_10, %c0_11] : memref<2x400xf32, #tpu.memory_space<vmem>>, vector<2x400xf32>
      %c0_12 = arith.constant 0 : index
      %c0_13 = arith.constant 0 : index
      %18 = vector.load %arg5[%c0_12, %c0_13] : memref<1x400xf32, #tpu.memory_space<vmem>>, vector<1x400xf32>
      %19 = vector.broadcast %18 : vector<1x400xf32> to vector<2x400xf32>
      %20 = arith.addf %17, %19 : vector<2x400xf32>
      %cst_14 = arith.constant 0.000000e+00 : f32
      %21 = vector.broadcast %cst_14 : f32 to vector<2x400xf32>
      %22 = arith.maximumf %20, %21 : vector<2x400xf32>
      %c0_15 = arith.constant 0 : index
      %c0_16 = arith.constant 0 : index
      %23 = vector.load %arg6[%c0_15, %c0_16] : memref<400x120xf32, #tpu.memory_space<vmem>>, vector<400x120xf32>
      %cst_17 = arith.constant dense<0.000000e+00> : vector<2x120xf32>
      %24 = tpu.matmul %22, %23, %cst_17 {dimension_numbers = #tpu.dot_dimension_numbers<[1], [0], [0], [1], [0, 0, 1, 1], [], []>} : vector<2x400xf32>, vector<400x120xf32>, vector<2x120xf32> -> vector<2x120xf32>
      %c0_18 = arith.constant 0 : index
      %c0_19 = arith.constant 0 : index
      %25 = vector.load %arg7[%c0_18, %c0_19] : memref<1x120xf32, #tpu.memory_space<vmem>>, vector<1x120xf32>
      %26 = vector.broadcast %25 : vector<1x120xf32> to vector<2x120xf32>
      %27 = arith.addf %24, %26 : vector<2x120xf32>
      %cst_20 = arith.constant 0.000000e+00 : f32
      %28 = vector.broadcast %cst_20 : f32 to vector<2x120xf32>
      %29 = arith.maximumf %27, %28 : vector<2x120xf32>
      %c0_21 = arith.constant 0 : index
      %c0_22 = arith.constant 0 : index
      %30 = vector.load %arg8[%c0_21, %c0_22] : memref<120x84xf32, #tpu.memory_space<vmem>>, vector<120x84xf32>
      %cst_23 = arith.constant dense<0.000000e+00> : vector<2x84xf32>
      %31 = tpu.matmul %29, %30, %cst_23 {dimension_numbers = #tpu.dot_dimension_numbers<[1], [0], [0], [1], [0, 0, 1, 1], [], []>} : vector<2x120xf32>, vector<120x84xf32>, vector<2x84xf32> -> vector<2x84xf32>
      %c0_24 = arith.constant 0 : index
      %c0_25 = arith.constant 0 : index
      %32 = vector.load %arg9[%c0_24, %c0_25] : memref<1x84xf32, #tpu.memory_space<vmem>>, vector<1x84xf32>
      %33 = vector.broadcast %32 : vector<1x84xf32> to vector<2x84xf32>
      %34 = arith.addf %31, %33 : vector<2x84xf32>
      %cst_26 = arith.constant 0.000000e+00 : f32
      %35 = vector.broadcast %cst_26 : f32 to vector<2x84xf32>
      %36 = arith.maximumf %34, %35 : vector<2x84xf32>
      %c0_27 = arith.constant 0 : index
      %c0_28 = arith.constant 0 : index
      %37 = vector.load %arg10[%c0_27, %c0_28] : memref<84x10xf32, #tpu.memory_space<vmem>>, vector<84x10xf32>
      %cst_29 = arith.constant dense<0.000000e+00> : vector<2x10xf32>
      %38 = tpu.matmul %36, %37, %cst_29 {dimension_numbers = #tpu.dot_dimension_numbers<[1], [0], [0], [1], [0, 0, 1, 1], [], []>} : vector<2x84xf32>, vector<84x10xf32>, vector<2x10xf32> -> vector<2x10xf32>
      %c0_30 = arith.constant 0 : index
      %c0_31 = arith.constant 0 : index
      %39 = vector.load %arg11[%c0_30, %c0_31] : memref<1x10xf32, #tpu.memory_space<vmem>>, vector<1x10xf32>
      %40 = vector.broadcast %39 : vector<1x10xf32> to vector<2x10xf32>
      %41 = arith.addf %38, %40 : vector<2x10xf32>
      %c0_32 = arith.constant 0 : index
      %c0_33 = arith.constant 0 : index
      %42 = vector.load %arg12[%c0_32, %c0_33] : memref<2x10xf32, #tpu.memory_space<vmem>>, vector<2x10xf32>
      tpu.vector_store %arg12[%c0_32, %c0_33], %41 {strides = array<i32>} : memref<2x10xf32, #tpu.memory_space<vmem>>, vector<2x10xf32>,
    } else {
    }
    return
  }
  func.func @transform_0(%arg0: i32) -> (i32, i32, i32) {
    %c0_i32 = arith.constant 0 : i32
    %c0_i32_0 = arith.constant 0 : i32
    %c0_i32_1 = arith.constant 0 : i32
    %c0_i32_2 = arith.constant 0 : i32
    return %c0_i32, %c0_i32_0, %c0_i32_1 : i32, i32, i32
  }
  func.func @transform_1(%arg0: i32) -> (i32, i32) {
    %c0_i32 = arith.constant 0 : i32
    %c0_i32_0 = arith.constant 0 : i32
    %c0_i32_1 = arith.constant 0 : i32
    return %c0_i32, %c0_i32_0 : i32, i32
  }
  func.func @transform_2(%arg0: i32) -> (i32, i32) {
    %c0_i32 = arith.constant 0 : i32
    %c0_i32_0 = arith.constant 0 : i32
    %c0_i32_1 = arith.constant 0 : i32
    return %c0_i32, %c0_i32_0 : i32, i32
  }
  func.func @transform_3(%arg0: i32) -> (i32, i32, i32) {
    %c0_i32 = arith.constant 0 : i32
    %c0_i32_0 = arith.constant 0 : i32
    %c0_i32_1 = arith.constant 0 : i32
    return %arg0, %c0_i32, %c0_i32_0 : i32, i32, i32
  }
  func.func @transform_4(%arg0: i32) -> (i32, i32) {
    %c0_i32 = arith.constant 0 : i32
    %c0_i32_0 = arith.constant 0 : i32
    %c0_i32_1 = arith.constant 0 : i32
    return %c0_i32, %c0_i32_0 : i32, i32
  }
  func.func @transform_5(%arg0: i32) -> (i32, i32) {
    %c0_i32 = arith.constant 0 : i32
    %c0_i32_0 = arith.constant 0 : i32
    %c0_i32_1 = arith.constant 0 : i32
    return %c0_i32, %c0_i32_0 : i32, i32
  }
  func.func @transform_6(%arg0: i32) -> (i32, i32) {
    %c0_i32 = arith.constant 0 : i32
    %c0_i32_0 = arith.constant 0 : i32
    %c0_i32_1 = arith.constant 0 : i32
    return %c0_i32, %c0_i32_0 : i32, i32
  }
  func.func @transform_7(%arg0: i32) -> (i32, i32) {
    %c0_i32 = arith.constant 0 : i32
    %c0_i32_0 = arith.constant 0 : i32
    %c0_i32_1 = arith.constant 0 : i32
    return %c0_i32, %c0_i32_0 : i32, i32
  }
  func.func @transform_8(%arg0: i32) -> (i32, i32) {
    %c0_i32 = arith.constant 0 : i32
    %c0_i32_0 = arith.constant 0 : i32
    %c0_i32_1 = arith.constant 0 : i32
    return %c0_i32, %c0_i32_0 : i32, i32
  }
  func.func @transform_9(%arg0: i32) -> (i32, i32) {
    %c0_i32 = arith.constant 0 : i32
    %c0_i32_0 = arith.constant 0 : i32
    %c0_i32_1 = arith.constant 0 : i32
    return %c0_i32, %c0_i32_0 : i32, i32
  }
  func.func @transform_10(%arg0: i32) -> (i32, i32) {
    %c0_i32 = arith.constant 0 : i32
    %c0_i32_0 = arith.constant 0 : i32
    %c0_i32_1 = arith.constant 0 : i32
    return %c0_i32, %c0_i32_0 : i32, i32
  }
  func.func @transform_11(%arg0: i32) -> (i32, i32) {
    %c0_i32 = arith.constant 0 : i32
    %c0_i32_0 = arith.constant 0 : i32
    %c0_i32_1 = arith.constant 0 : i32
    return %c0_i32, %c0_i32_0 : i32, i32
  }
}

</mosaic_0001>

<bundles_post_ra>
// kernel: net_forward.1
= control target key start
LH: loop header
LB: loop body
LE: loop exit
PB: predicated region body
PF: predicated region fallthrough
CT: control target
= control target key end

     0   :  { %16 = vsyncpa [#allocation5], 0  ;;  %s6080_s17 = smov 0   ;;  %s7675_s0 = inlined_call_operand.vmem [shape: bf16[4,75,392], index: 0, kind: input, shape index: {}]   ;;  %s7676_s1 = inlined_call_operand.vmem [shape: bf16[6,75], index: 1, kind: input, shape index: {}]   ;;  %s7677_s2 = inlined_call_operand.vmem [shape: f32[6,1], index: 2, kind: input, shape index: {}]   ;;  %s7678_s3 = inlined_call_operand.vmem [shape: bf16[4,1176,400], index: 3, kind: input, shape index: {}]   ;;  %s7679_s4 = inlined_call_operand.vmem [shape: f32[1,400], index: 4, kind: input, shape index: {}]   ;;  %s7680_s5 = inlined_call_operand.vmem [shape: f32[400,120], index: 5, kind: input, shape index: {}]   ;;  %s7681_s6 = inlined_call_operand.vmem [shape: f32[1,120], index: 6, kind: input, shape index: {}]   ;;  %s7682_s7 = inlined_call_operand.vmem [shape: f32[120,84], index: 7, kind: input, shape index: {}]   ;;  %s7683_s8 = inlined_call_operand.vmem [shape: f32[1,84], index: 8, kind: input, shape index: {}]   ;;  %s7684_s9 = inlined_call_operand.vmem [shape: f32[84,10], index: 9, kind: input, shape index: {}]   ;;  %s7685_s10 = inlined_call_operand.vmem [shape: f32[1,10], index: 10, kind: input, shape index: {}]   ;;  %s7686_s11 = inlined_call_operand.hbm [shape: f32[2,10], index: 11, kind: output, shape index: {}]  }
   0x1 LB: > { %s6086_s18 = sadd.s32 4294967295, %s6009_s17   ;;  %p3989_p0 = scmp.ge.s32.totalorder %s6009_s17, 1  ;;  %s6009_s17 = sphi %s6080_s17, %s22_s17  }
   0x2   : > { %p333_p1 = scmp.lt.s32.totalorder %s6009_s17, 5 }
   0x4   : > { %p334_p2 = pnand %p3989_p0, %p333_p1 }
   0x5   : > { %p368_p3 = scmp.lt.s32.totalorder (!%p334_p2), %s6086_s18, 3  ;;  %p3991_p4 = scmp.ne.s32.totalorder (!%p334_p2), %s6086_s18, 0 }
   0x6   : > { %337 = sbr.rel (%p334_p2) target bundleno = 1374 (0x55e), region = 64 }
   0xb   : > { %s369_s19 = scalar_select %p368_p3, %s6086_s18, 3 }
   0xc   : > { %377 = sbr.rel (%p3991_p4) target bundleno = 448 (0x1c0), region = 68  ;;  %s6013_s28 = smov (!%p3991_p4), 68  }
   0xd   : > { %s5943_s20 = smul.u32 2352, %s369_s19  ;;  %s6014_s29 = smov (!%p3991_p4), 60  }
   0xe   : > { %s6015_s30 = smov (!%p3991_p4), 8   ;;  %s6016_s12 = smov (!%p3991_p4), 76  }
   0xf   : > { %s6095_s23 = scalar_lea.vmem %s7678_s3, %s5943_s20  ;;  %s6017_s13 = smov (!%p3991_p4), 16  }
  0x10   : > { %s6018_s14 = smov (!%p3991_p4), 84  }
  0x11   : > { %v4058_v0 = vld [vmem:[%s7675_s0 + $0x80] sm:$0xf]  ;;  %v5589_v1 = vld [vmem:[%s7675_s0 + $0x8c] sm:$0x30]  ;;  %vm499_vm0 = vcmask 1044480   ;;  %vm500_vm1 = vcmask 1045504  }
  0x12   : > { %v4059_v2 = vor.u32 %v5589_v1, %v4058_v0  ;;  %v5587_v3 = vld [vmem:[%s7675_s0 + $0x84] sm:$0xf]  ;;  %v4060_v4 = vld [vmem:[%s7675_s0 + $0x90] sm:$0x30]  ;;  %v6011_v5 = vmov 65535   ;;  %vm495_vm2 = vcmask 613376  }
  0x13   : > { %v501_v6 = vsel %vm499_vm0, 4294967295, %v6011_v5  ;;  %v4063_v7 = vor.u32 %v5587_v3, %v4060_v4  ;;  %v4066_v8 = vld [vmem:[%s7675_s0 + $0x88] sm:$0xf]  ;;  %v5590_v9 = vld [vmem:[%s7675_s0 + $0x94] sm:$0x30]  ;;  %vm1139_vm3 = vcmask 1040384  }
  0x14   : > { %v6118_v10 = vsel %vm500_vm1, %v501_v6, 0  ;;  %v4067_v11 = vor.u32 %v5590_v9, %v4066_v8  ;;  %v5588_v12 = vld [vmem:[%s7675_s0 + $0x8c] sm:$0xf]  ;;  %v4068_v13 = vld [vmem:[%s7675_s0 + $0x98] sm:$0x30]  ;;  %vm1227_vm5 = vcmask 1041408  }
  0x15   : > { %v504_v14 = vand.u32 %v4059_v2, %v6118_v10  ;;  %v507_v15 = vand.u32 %v4063_v7, %v6118_v10  ;;  %v4071_v16 = vor.u32 %v5588_v12, %v4068_v13  ;;  %v4042_v17 = vld [vmem:[%s7675_s0 + $0x60] sm:$0xf]  ;;  %v5585_v18 = vld [vmem:[%s7675_s0 + $0x6c] sm:$0xf0]  ;;  %v5583_v19 = vld [vmem:[%s7675_s0 + $0x64] sm:$0xf] }
  0x16   : > { %v510_v20 = vand.u32 %v4067_v11, %v6118_v10  ;;  %v4044_v21 = vld [vmem:[%s7675_s0 + $0x70] sm:$0xf0]  ;;  %v4050_v22 = vld [vmem:[%s7675_s0 + $0x68] sm:$0xf]  ;;  %v5586_v23 = vld [vmem:[%s7675_s0 + $0x74] sm:$0xf0]  ;;  %v4043_v25 = vor.u32 %v5585_v18, %v4042_v17 }
  0x17   : > { %518 = vmatpush.bf16.msra.mxu0 %v504_v14  ;;  %531 = vmatpush.bf16.msra.mxu1 %v507_v15  ;;  %v513_v24 = vand.u32 %v4071_v16, %v6118_v10  ;;  %v4047_v26 = vor.u32 %v5583_v19, %v4044_v21  ;;  %v5584_v27 = vld [vmem:[%s7675_s0 + $0x6c] sm:$0xf]  ;;  %v4052_v28 = vld [vmem:[%s7675_s0 + $0x78] sm:$0xf0]  ;;  %v4026_v29 = vld [vmem:[%s7675_s0 + $0x40] sm:$0xf]  ;;  %v4051_v30 = vor.u32 %v5586_v23, %v4050_v22 }
  0x18   : > { %544 = vmatpush.bf16.msra.mxu2 %v510_v20  ;;  %v5581_v31 = vld [vmem:[%s7675_s0 + $0x4c] sm:$0xf0]  ;;  %v5579_v32 = vld [vmem:[%s7675_s0 + $0x44] sm:$0xf]  ;;  %v4028_v33 = vld [vmem:[%s7675_s0 + $0x50] sm:$0xf0]  ;;  %v4055_v34 = vor.u32 %v5584_v27, %v4052_v28 }
  0x19   : > { %557 = vmatpush.bf16.msra.mxu3 %v513_v24  ;;  %v4034_v35 = vld [vmem:[%s7675_s0 + $0x48] sm:$0xf]  ;;  %v5582_v36 = vld [vmem:[%s7675_s0 + $0x54] sm:$0xf0]  ;;  %v5580_v37 = vld [vmem:[%s7675_s0 + $0x4c] sm:$0xf]  ;;  %v4027_v39 = vor.u32 %v5581_v31, %v4026_v29  ;;  %v4031_v40 = vor.u32 %v5579_v32, %v4028_v33 }
  0x1a   : > { %v4036_v38 = vld [vmem:[%s7675_s0 + $0x58] sm:$0xf0]  ;;  %v4010_v41 = vld [vmem:[%s7675_s0 + $0x20] sm:$0xf]  ;;  %v5577_v42 = vld [vmem:[%s7675_s0 + $0x2c] sm:$0xf0]  ;;  %v4035_v43 = vor.u32 %v5582_v36, %v4034_v35 }
  0x1b   : > { %519 = vmatpush.bf16.msra.mxu0 %v4043_v25  ;;  %532 = vmatpush.bf16.msra.mxu1 %v4047_v26  ;;  %v5575_v44 = vld [vmem:[%s7675_s0 + $0x24] sm:$0xf]  ;;  %v4012_v45 = vld [vmem:[%s7675_s0 + $0x30] sm:$0xf0]  ;;  %v4018_v46 = vld [vmem:[%s7675_s0 + $0x28] sm:$0xf]  ;;  %v4039_v47 = vor.u32 %v5580_v37, %v4036_v38  ;;  %v4011_v55 = vor.u32 %v5577_v42, %v4010_v41 }
  0x1c   : > { %545 = vmatpush.bf16.msra.mxu2 %v4051_v30  ;;  %v5578_v48 = vld [vmem:[%s7675_s0 + $0x34] sm:$0xf0]  ;;  %v5576_v49 = vld [vmem:[%s7675_s0 + $0x2c] sm:$0xf]  ;;  %v4020_v50 = vld [vmem:[%s7675_s0 + $0x38] sm:$0xf0]  ;;  %v4015_v56 = vor.u32 %v5575_v44, %v4012_v45 }
  0x1d   : > { %558 = vmatpush.bf16.msra.mxu3 %v4055_v34  ;;  %v3994_v51 = vld [vmem:[%s7675_s0] sm:$0xf]  ;;  %v5573_v52 = vld [vmem:[%s7675_s0 + $0xc] sm:$0xf0]  ;;  %v5571_v53 = vld [vmem:[%s7675_s0 + $0x4] sm:$0xf]  ;;  %v4019_v60 = vor.u32 %v5578_v48, %v4018_v46  ;;  %v4023_v0 = vor.u32 %v5576_v49, %v4020_v50 }
  0x1e   : > { %v3996_v54 = vld [vmem:[%s7675_s0 + $0x10] sm:$0xf0]  ;;  %v4002_v57 = vld [vmem:[%s7675_s0 + $0x8] sm:$0xf]  ;;  %v5574_v58 = vld [vmem:[%s7675_s0 + $0x14] sm:$0xf0]  ;;  %v3995_v11 = vor.u32 %v5573_v52, %v3994_v51 }
  0x1f   : > { %520 = vmatpush.bf16.msra.mxu0 %v4027_v39  ;;  %533 = vmatpush.bf16.msra.mxu1 %v4031_v40  ;;  %v4162_v59 = vld [vmem:[%s7675_s0 + $0x120] sm:$0xf]  ;;  %v5609_v61 = vld [vmem:[%s7675_s0 + $0x12c] sm:$0x30]  ;;  %v5607_v62 = vld [vmem:[%s7675_s0 + $0x124] sm:$0xf]  ;;  %v3999_v12 = vor.u32 %v5571_v53, %v3996_v54  ;;  %v4003_v14 = vor.u32 %v5574_v58, %v4002_v57 }
  0x20   : > { %546 = vmatpush.bf16.msra.mxu2 %v4035_v43  ;;  %v4164_v63 = vld [vmem:[%s7675_s0 + $0x130] sm:$0x30]  ;;  %v4163_v1 = vor.u32 %v5609_v61, %v4162_v59  ;;  %v4170_v3 = vld [vmem:[%s7675_s0 + $0x128] sm:$0xf]  ;;  %v5610_v4 = vld [vmem:[%s7675_s0 + $0x134] sm:$0x30] }
  0x21   : > { %559 = vmatpush.bf16.msra.mxu3 %v4039_v47  ;;  %v4167_v2 = vor.u32 %v5607_v62, %v4164_v63  ;;  %v5608_v5 = vld [vmem:[%s7675_s0 + $0x12c] sm:$0xf]  ;;  %v4004_v7 = vld [vmem:[%s7675_s0 + $0x18] sm:$0xf0]  ;;  %v4171_v8 = vor.u32 %v5610_v4, %v4170_v3  ;;  %v4146_v18 = vld [vmem:[%s7675_s0 + $0x100] sm:$0xf] }
  0x22   : > { %v5572_v6 = vld [vmem:[%s7675_s0 + $0xc] sm:$0xf]  ;;  %v4172_v9 = vld [vmem:[%s7675_s0 + $0x138] sm:$0x30]  ;;  %v685_v15 = vand.u32 %v4163_v1, %v6118_v10  ;;  %v5605_v19 = vld [vmem:[%s7675_s0 + $0x10c] sm:$0xf0] }
  0x23   : > { %521 = vmatpush.bf16.msra.mxu0 %v4011_v55  ;;  %534 = vmatpush.bf16.msra.mxu1 %v4015_v56  ;;  %v4175_v13 = vor.u32 %v5608_v5, %v4172_v9  ;;  %v4007_v16 = vor.u32 %v5572_v6, %v4004_v7  ;;  %v688_v17 = vand.u32 %v4167_v2, %v6118_v10  ;;  %v5603_v22 = vld [vmem:[%s7675_s0 + $0x104] sm:$0xf]  ;;  %v4148_v23 = vld [vmem:[%s7675_s0 + $0x110] sm:$0xf0]  ;;  %v4154_v24 = vld [vmem:[%s7675_s0 + $0x108] sm:$0xf] }
  0x24   : > { %547 = vmatpush.bf16.msra.mxu2 %v4019_v60  ;;  %v691_v20 = vand.u32 %v4171_v8, %v6118_v10  ;;  %v5606_v25 = vld [vmem:[%s7675_s0 + $0x114] sm:$0xf0]  ;;  %v5604_v26 = vld [vmem:[%s7675_s0 + $0x10c] sm:$0xf]  ;;  %v4156_v27 = vld [vmem:[%s7675_s0 + $0x118] sm:$0xf0]  ;;  %v4147_v29 = vor.u32 %v5605_v19, %v4146_v18  ;;  %v4151_v30 = vor.u32 %v5603_v22, %v4148_v23 }
  0x25   : > { %560 = vmatpush.bf16.msra.mxu3 %v4023_v0  ;;  %v694_v21 = vand.u32 %v4175_v13, %v6118_v10  ;;  %v6281_v28 = vld [vmem:[%s7676_s1] sm:$0x7]  ;;  %v5601_v32 = vld [vmem:[%s7675_s0 + $0xec] sm:$0xf0]  ;;  %v4155_v33 = vor.u32 %v5606_v25, %v4154_v24  ;;  %v4159_v34 = vor.u32 %v5604_v26, %v4156_v27  ;;  %v5599_v35 = vld [vmem:[%s7675_s0 + $0xe4] sm:$0xf] }
  0x26   : > { %v4130_v31 = vld [vmem:[%s7675_s0 + $0xe0] sm:$0xf]  ;;  %v4132_v36 = vld [vmem:[%s7675_s0 + $0xf0] sm:$0xf0]  ;;  %v4138_v37 = vld [vmem:[%s7675_s0 + $0xe8] sm:$0xf] }
  0x27   : > { %522 = vmatpush.bf16.msra.mxu0 %v3995_v11  ;;  %535 = vmatpush.bf16.msra.mxu1 %v3999_v12  ;;  %v5602_v38 = vld [vmem:[%s7675_s0 + $0xf4] sm:$0xf0]  ;;  %v5600_v39 = vld [vmem:[%s7675_s0 + $0xec] sm:$0xf]  ;;  %v4140_v40 = vld [vmem:[%s7675_s0 + $0xf8] sm:$0xf0]  ;;  %v4131_v41 = vor.u32 %v5601_v32, %v4130_v31  ;;  %v4135_v45 = vor.u32 %v5599_v35, %v4132_v36 }
  0x28   : > { %548 = vmatpush.bf16.msra.mxu2 %v4003_v14  ;;  %v4114_v42 = vld [vmem:[%s7675_s0 + $0xc0] sm:$0xf]  ;;  %v5597_v43 = vld [vmem:[%s7675_s0 + $0xcc] sm:$0xf0]  ;;  %v5595_v44 = vld [vmem:[%s7675_s0 + $0xc4] sm:$0xf]  ;;  %v4139_v49 = vor.u32 %v5602_v38, %v4138_v37  ;;  %v4143_v50 = vor.u32 %v5600_v39, %v4140_v40 }
  0x29   : > { %561 = vmatpush.bf16.msra.mxu3 %v4007_v16  ;;  %v4116_v46 = vld [vmem:[%s7675_s0 + $0xd0] sm:$0xf0]  ;;  %v4122_v47 = vld [vmem:[%s7675_s0 + $0xc8] sm:$0xf]  ;;  %v5598_v48 = vld [vmem:[%s7675_s0 + $0xd4] sm:$0xf0]  ;;  %v4115_v57 = vor.u32 %v5597_v43, %v4114_v42 }
  0x2a   : > { %4072 = vmatmul.msk.bf16.vlgmr.msra.gmra.mxu0 %vm495_vm2, %v6281_v28  ;;  %4073 = vmatmul.msk.bf16.vlgmr.msra.gmra.mxu1 %vm495_vm2, %v6281_v28  ;;  %v5596_v51 = vld [vmem:[%s7675_s0 + $0xcc] sm:$0xf]  ;;  %v4266_v52 = vld [vmem:[%s7675_s0 + $0x1c0] sm:$0xf]  ;;  %v5629_v53 = vld [vmem:[%s7675_s0 + $0x1cc] sm:$0x30]  ;;  %v4119_v61 = vor.u32 %v5595_v44, %v4116_v46  ;;  %v4123_v2 = vor.u32 %v5598_v48, %v4122_v47 }
  0x2b   : > { %699 = vmatpush.bf16.msrb.mxu0 %v685_v15  ;;  %712 = vmatpush.bf16.msrb.mxu1 %v688_v17  ;;  %v4124_v54 = vld [vmem:[%s7675_s0 + $0xd8] sm:$0xf0]  ;;  %v4098_v55 = vld [vmem:[%s7675_s0 + $0xa0] sm:$0xf]  ;;  %v5627_v56 = vld [vmem:[%s7675_s0 + $0x1c4] sm:$0xf]  ;;  %v4267_v63 = vor.u32 %v5629_v53, %v4266_v52 }
  0x2c   : > { %725 = vmatpush.bf16.msrb.mxu2 %v691_v20  ;;  %4075 = vmatmul.msk.bf16.vlgmr.msra.gmra.mxu3 %vm495_vm2, %v6281_v28  ;;  %v4268_v58 = vld [vmem:[%s7675_s0 + $0x1d0] sm:$0x30]  ;;  %v4274_v59 = vld [vmem:[%s7675_s0 + $0x1c8] sm:$0xf]  ;;  %v5630_v60 = vld [vmem:[%s7675_s0 + $0x1d4] sm:$0x30]  ;;  %v4127_v3 = vor.u32 %v5596_v51, %v4124_v54 }
  0x2d   : > { %738 = vmatpush.bf16.msrb.mxu3 %v694_v21  ;;  %4074 = vmatmul.msk.bf16.vlgmr.msra.gmra.mxu2 %vm495_vm2, %v6281_v28  ;;  %v5593_v62 = vld [vmem:[%s7675_s0 + $0xac] sm:$0xf0]  ;;  %v5628_v0 = vld [vmem:[%s7675_s0 + $0x1cc] sm:$0xf]  ;;  %v4276_v1 = vld [vmem:[%s7675_s0 + $0x1d8] sm:$0x30]  ;;  %v4271_v11 = vor.u32 %v5627_v56, %v4268_v58  ;;  %v4275_v12 = vor.u32 %v5630_v60, %v4274_v59  ;;  %v870_v16 = vand.u32 %v4267_v63, %v6118_v10 }
  0x2e   : > { %v5591_v4 = vld [vmem:[%s7675_s0 + $0xa4] sm:$0xf]  ;;  %v4100_v5 = vld [vmem:[%s7675_s0 + $0xb0] sm:$0xf0]  ;;  %v4106_v6 = vld [vmem:[%s7675_s0 + $0xa8] sm:$0xf]  ;;  %v4099_v13 = vor.u32 %v5593_v62, %v4098_v55  ;;  %v4279_v14 = vor.u32 %v5628_v0, %v4276_v1 }
  0x2f   : > { %700 = vmatpush.bf16.msrb.mxu0 %v4147_v29  ;;  %713 = vmatpush.bf16.msrb.mxu1 %v4151_v30  ;;  %v5594_v7 = vld [vmem:[%s7675_s0 + $0xb4] sm:$0xf0]  ;;  %v5592_v8 = vld [vmem:[%s7675_s0 + $0xac] sm:$0xf]  ;;  %v4108_v9 = vld [vmem:[%s7675_s0 + $0xb8] sm:$0xf0]  ;;  %v4103_v15 = vor.u32 %v5591_v4, %v4100_v5  ;;  %v873_v19 = vand.u32 %v4271_v11, %v6118_v10  ;;  %v876_v20 = vand.u32 %v4275_v12, %v6118_v10 }
  0x30   : > { %726 = vmatpush.bf16.msrb.mxu2 %v4155_v33  ;;  %v4107_v17 = vor.u32 %v5594_v7, %v4106_v6  ;;  %v4111_v18 = vor.u32 %v5592_v8, %v4108_v9  ;;  %v4250_v21 = vld [vmem:[%s7675_s0 + $0x1a0] sm:$0xf]  ;;  %v5625_v22 = vld [vmem:[%s7675_s0 + $0x1ac] sm:$0xf0]  ;;  %v5623_v23 = vld [vmem:[%s7675_s0 + $0x1a4] sm:$0xf]  ;;  %v879_v24 = vand.u32 %v4279_v14, %v6118_v10 }
  0x31   : > { %739 = vmatpush.bf16.msrb.mxu3 %v4159_v34  ;;  %v4252_v25 = vld [vmem:[%s7675_s0 + $0x1b0] sm:$0xf0]  ;;  %v4258_v26 = vld [vmem:[%s7675_s0 + $0x1a8] sm:$0xf]  ;;  %v5626_v27 = vld [vmem:[%s7675_s0 + $0x1b4] sm:$0xf0]  ;;  %v4251_v31 = vor.u32 %v5625_v22, %v4250_v21 }
  0x32   : > { %v5624_v29 = vld [vmem:[%s7675_s0 + $0x1ac] sm:$0xf]  ;;  %v4260_v30 = vld [vmem:[%s7675_s0 + $0x1b8] sm:$0xf0]  ;;  %v4255_v32 = vor.u32 %v5623_v23, %v4252_v25  ;;  %v4259_v33 = vor.u32 %v5626_v27, %v4258_v26  ;;  %v4234_v34 = vld [vmem:[%s7675_s0 + $0x180] sm:$0xf] }
  0x33   : > { %701 = vmatpush.bf16.msrb.mxu0 %v4131_v41  ;;  %714 = vmatpush.bf16.msrb.mxu1 %v4135_v45  ;;  %v5621_v35 = vld [vmem:[%s7675_s0 + $0x18c] sm:$0xf0]  ;;  %v5619_v36 = vld [vmem:[%s7675_s0 + $0x184] sm:$0xf]  ;;  %v4263_v37 = vor.u32 %v5624_v29, %v4260_v30  ;;  %v4236_v38 = vld [vmem:[%s7675_s0 + $0x190] sm:$0xf0] }
  0x34   : > { %727 = vmatpush.bf16.msrb.mxu2 %v4139_v49  ;;  %v4242_v39 = vld [vmem:[%s7675_s0 + $0x188] sm:$0xf]  ;;  %v5622_v40 = vld [vmem:[%s7675_s0 + $0x194] sm:$0xf0]  ;;  %v5620_v41 = vld [vmem:[%s7675_s0 + $0x18c] sm:$0xf]  ;;  %v4235_v43 = vor.u32 %v5621_v35, %v4234_v34  ;;  %v4239_v46 = vor.u32 %v5619_v36, %v4236_v38 }
  0x35   : > { %740 = vmatpush.bf16.msrb.mxu3 %v4143_v50  ;;  %v4244_v42 = vld [vmem:[%s7675_s0 + $0x198] sm:$0xf0]  ;;  %v4218_v44 = vld [vmem:[%s7675_s0 + $0x160] sm:$0xf]  ;;  %v5617_v45 = vld [vmem:[%s7675_s0 + $0x16c] sm:$0xf0]  ;;  %v4243_v47 = vor.u32 %v5622_v40, %v4242_v39 }
  0x36   : > { %v5615_v48 = vld [vmem:[%s7675_s0 + $0x164] sm:$0xf]  ;;  %v4220_v49 = vld [vmem:[%s7675_s0 + $0x170] sm:$0xf0]  ;;  %v4226_v50 = vld [vmem:[%s7675_s0 + $0x168] sm:$0xf]  ;;  %v4247_v51 = vor.u32 %v5620_v41, %v4244_v42  ;;  %v4219_v60 = vor.u32 %v5617_v45, %v4218_v44 }
  0x37   : > { %702 = vmatpush.bf16.msrb.mxu0 %v4115_v57  ;;  %715 = vmatpush.bf16.msrb.mxu1 %v4119_v61  ;;  %v5618_v52 = vld [vmem:[%s7675_s0 + $0x174] sm:$0xf0]  ;;  %v5616_v53 = vld [vmem:[%s7675_s0 + $0x16c] sm:$0xf]  ;;  %v4228_v54 = vld [vmem:[%s7675_s0 + $0x178] sm:$0xf0]  ;;  %v4223_v0 = vor.u32 %v5615_v48, %v4220_v49 }
  0x38   : > { %728 = vmatpush.bf16.msrb.mxu2 %v4123_v2  ;;  %v4202_v55 = vld [vmem:[%s7675_s0 + $0x140] sm:$0xf]  ;;  %v5613_v56 = vld [vmem:[%s7675_s0 + $0x14c] sm:$0xf0]  ;;  %v5647_v59 = vld [vmem:[%s7675_s0 + $0x264] sm:$0xf]  ;;  %v4227_v1 = vor.u32 %v5618_v52, %v4226_v50  ;;  %v4231_v5 = vor.u32 %v5616_v53, %v4228_v54 }
  0x39   : > { %741 = vmatpush.bf16.msrb.mxu3 %v4127_v3  ;;  %v4370_v57 = vld [vmem:[%s7675_s0 + $0x260] sm:$0xf]  ;;  %v5649_v58 = vld [vmem:[%s7675_s0 + $0x26c] sm:$0x30]  ;;  %v4372_v61 = vld [vmem:[%s7675_s0 + $0x270] sm:$0x30] }
  0x3a   : > { %v4378_v62 = vld [vmem:[%s7675_s0 + $0x268] sm:$0xf]  ;;  %v5650_v63 = vld [vmem:[%s7675_s0 + $0x274] sm:$0x30]  ;;  %v5611_v2 = vld [vmem:[%s7675_s0 + $0x144] sm:$0xf]  ;;  %v4371_v9 = vor.u32 %v5649_v58, %v4370_v57 }
  0x3b   : > { %703 = vmatpush.bf16.msrb.mxu0 %v4099_v13  ;;  %716 = vmatpush.bf16.msrb.mxu1 %v4103_v15  ;;  %v5648_v3 = vld [vmem:[%s7675_s0 + $0x26c] sm:$0xf]  ;;  %v4380_v4 = vld [vmem:[%s7675_s0 + $0x278] sm:$0x30]  ;;  %v4204_v6 = vld [vmem:[%s7675_s0 + $0x150] sm:$0xf0]  ;;  %v4375_v13 = vor.u32 %v5647_v59, %v4372_v61  ;;  %v4379_v14 = vor.u32 %v5650_v63, %v4378_v62  ;;  %v4203_v15 = vor.u32 %v5613_v56, %v4202_v55 }
  0x3c   : > { %729 = vmatpush.bf16.msrb.mxu2 %v4107_v17  ;;  %v4210_v7 = vld [vmem:[%s7675_s0 + $0x148] sm:$0xf]  ;;  %v5614_v8 = vld [vmem:[%s7675_s0 + $0x154] sm:$0xf0]  ;;  %v5612_v11 = vld [vmem:[%s7675_s0 + $0x14c] sm:$0xf]  ;;  %v4207_v17 = vor.u32 %v5611_v2, %v4204_v6 }
  0x3d   : > { %742 = vmatpush.bf16.msrb.mxu3 %v4111_v18  ;;  %v4212_v12 = vld [vmem:[%s7675_s0 + $0x158] sm:$0xf0]  ;;  %v4211_v18 = vor.u32 %v5614_v8, %v4210_v7  ;;  %v1122_v21 = vld [vmem:[%s7677_s2] sm:$0x3f]  ;;  %v1058_v22 = vand.u32 %v4375_v13, %v6118_v10  ;;  %v1061_v23 = vand.u32 %v4379_v14, %v6118_v10  ;;  %v5645_v25 = vld [vmem:[%s7675_s0 + $0x24c] sm:$0xf0] }
  0x3e   : > { %4176 = vmatmul.msk.bf16.vlgmr.msrb.gmra.mxu0 %vm495_vm2, %v6281_v28  ;;  %4177 = vmatmul.msk.bf16.vlgmr.msrb.gmra.mxu1 %vm495_vm2, %v6281_v28  ;;  %v5643_v26 = vld [vmem:[%s7675_s0 + $0x244] sm:$0xf]  ;;  %v6012_v27 = vmov 0   ;;  %v4356_v30 = vld [vmem:[%s7675_s0 + $0x250] sm:$0xf0]  ;;  %vm1154_vm8 = vcmask 556032  }
  0x3f   : > { %884 = vmatpush.bf16.msra.mxu0 %v870_v16  ;;  %897 = vmatpush.bf16.msra.mxu1 %v873_v19  ;;  %v4383_v16 = vor.u32 %v5648_v3, %v4380_v4  ;;  %v4215_v19 = vor.u32 %v5612_v11, %v4212_v12  ;;  %v4359_v35 = vor.u32 %v5643_v26, %v4356_v30  ;;  %v5641_v38 = vld [vmem:[%s7675_s0 + $0x22c] sm:$0xf0]  ;;  %v5639_v39 = vld [vmem:[%s7675_s0 + $0x224] sm:$0xf]  ;;  %v4340_v41 = vld [vmem:[%s7675_s0 + $0x230] sm:$0xf0] }
  0x40   : > { %910 = vmatpush.bf16.msra.mxu2 %v876_v20  ;;  %4179 = vmatmul.msk.bf16.vlgmr.msrb.gmra.mxu3 %vm495_vm2, %v6281_v28  ;;  %v1055_v20 = vand.u32 %v4371_v9, %v6118_v10  ;;  %v4346_v42 = vld [vmem:[%s7675_s0 + $0x228] sm:$0xf]  ;;  %v5640_v44 = vld [vmem:[%s7675_s0 + $0x22c] sm:$0xf]  ;;  %v4348_v45 = vld [vmem:[%s7675_s0 + $0x238] sm:$0xf0] }
  0x41   : > { %923 = vmatpush.bf16.msra.mxu3 %v879_v24  ;;  %4178 = vmatmul.msk.bf16.vlgmr.msrb.gmra.mxu2 %vm495_vm2, %v6281_v28  ;;  %v4354_v24 = vld [vmem:[%s7675_s0 + $0x240] sm:$0xf]  ;;  %v1064_v29 = vand.u32 %v4383_v16, %v6118_v10  ;;  %v4364_v10 = vld [vmem:[%s7675_s0 + $0x258] sm:$0xf0]  ;;  %v5637_v50 = vld [vmem:[%s7675_s0 + $0x20c] sm:$0xf0]  ;;  %v4351_v52 = vor.u32 %v5640_v44, %v4348_v45 }
  0x42   : > { %5967 = vset.pattern.permute.xlu0 %v6012_v27  ;;  %v4355_v34 = vor.u32 %v5645_v25, %v4354_v24  ;;  %v4322_v49 = vld [vmem:[%s7675_s0 + $0x200] sm:$0xf]  ;;  %v4324_v53 = vld [vmem:[%s7675_s0 + $0x210] sm:$0xf0]  ;;  %v4330_v54 = vld [vmem:[%s7675_s0 + $0x208] sm:$0xf] }
  0x43   : > { %885 = vmatpush.bf16.msra.mxu0 %v4251_v31  ;;  %898 = vmatpush.bf16.msra.mxu1 %v4255_v32  ;;  %v4362_v31 = vld [vmem:[%s7675_s0 + $0x248] sm:$0xf]  ;;  %v5646_v32 = vld [vmem:[%s7675_s0 + $0x254] sm:$0xf0]  ;;  %v5636_v56 = vld [vmem:[%s7675_s0 + $0x20c] sm:$0xf]  ;;  %v4323_v58 = vor.u32 %v5637_v50, %v4322_v49 }
  0x44   : > { %911 = vmatpush.bf16.msra.mxu2 %v4259_v33  ;;  %1125 = vperm.xlu0 %5967, %v1122_v21   ;;  %v5644_v33 = vld [vmem:[%s7675_s0 + $0x24c] sm:$0xf]  ;;  %v4363_v36 = vor.u32 %v5646_v32, %v4362_v31  ;;  %v5638_v55 = vld [vmem:[%s7675_s0 + $0x214] sm:$0xf0]  ;;  %v4332_v57 = vld [vmem:[%s7675_s0 + $0x218] sm:$0xf0] }
  0x45   : > { %924 = vmatpush.bf16.msra.mxu3 %v4263_v37  ;;  %v4338_v37 = vld [vmem:[%s7675_s0 + $0x220] sm:$0xf]  ;;  %v4367_v40 = vor.u32 %v5644_v33, %v4364_v10  ;;  %v5633_v62 = vld [vmem:[%s7675_s0 + $0x1ec] sm:$0xf0]  ;;  %v5631_v63 = vld [vmem:[%s7675_s0 + $0x1e4] sm:$0xf] }
  0x46   : > { %v4306_v61 = vld [vmem:[%s7675_s0 + $0x1e0] sm:$0xf]  ;;  %v4314_v2 = vld [vmem:[%s7675_s0 + $0x1e8] sm:$0xf]  ;;  %v5634_v3 = vld [vmem:[%s7675_s0 + $0x1f4] sm:$0xf0] }
  0x47   : > { %886 = vmatpush.bf16.msra.mxu0 %v4235_v43  ;;  %899 = vmatpush.bf16.msra.mxu1 %v4239_v46  ;;  %v5642_v43 = vld [vmem:[%s7675_s0 + $0x234] sm:$0xf0]  ;;  %v4339_v46 = vor.u32 %v5641_v38, %v4338_v37  ;;  %v5632_v4 = vld [vmem:[%s7675_s0 + $0x1ec] sm:$0xf]  ;;  %v4307_v6 = vor.u32 %v5633_v62, %v4306_v61  ;;  %v4315_v8 = vor.u32 %v5634_v3, %v4314_v2  ;;  %vm1232_vm10 = vcmask 490496  }
  0x48   : > { %912 = vmatpush.bf16.msra.mxu2 %v4243_v47  ;;  %v4343_v47 = vor.u32 %v5639_v39, %v4340_v41  ;;  %v4347_v48 = vor.u32 %v5642_v43, %v4346_v42  ;;  %vm1169_vm15 = vcmask 64512   ;;  %vm1184_vm0 = vcmask 621568  }
  0x49   : > { %925 = vmatpush.bf16.msra.mxu3 %v4247_v51  ;;  %v5635_v51 = vld [vmem:[%s7675_s0 + $0x204] sm:$0xf] }
  0x4a   : > { %v4327_v59 = vor.u32 %v5635_v51, %v4324_v53 }
  0x4b   : > { %887 = vmatpush.bf16.msra.mxu0 %v4219_v60  ;;  %900 = vmatpush.bf16.msra.mxu1 %v4223_v0  ;;  %v4331_v60 = vor.u32 %v5638_v55, %v4330_v54  ;;  %v4335_v0 = vor.u32 %v5636_v56, %v4332_v57 }
  0x4c   : > { %913 = vmatpush.bf16.msra.mxu2 %v4227_v1  ;;  %v4308_v1 = vld [vmem:[%s7675_s0 + $0x1f0] sm:$0xf0] }
  0x4d   : > { %926 = vmatpush.bf16.msra.mxu3 %v4231_v5  ;;  %v4316_v5 = vld [vmem:[%s7675_s0 + $0x1f8] sm:$0xf0]  ;;  %v4311_v7 = vor.u32 %v5631_v63, %v4308_v1 }
  0x4e   : > { %v4319_v9 = vor.u32 %v5632_v4, %v4316_v5 }
  0x4f   : > { %888 = vmatpush.bf16.msra.mxu0 %v4203_v15  ;;  %901 = vmatpush.bf16.msra.mxu1 %v4207_v17 }
  0x50   : > { %914 = vmatpush.bf16.msra.mxu2 %v4211_v18 }
  0x51   : > { %927 = vmatpush.bf16.msra.mxu3 %v4215_v19 }
  0x52   : > { %4280 = vmatmul.msk.bf16.vlgmr.msra.gmra.mxu0 %vm495_vm2, %v6281_v28  ;;  %4281 = vmatmul.msk.bf16.vlgmr.msra.gmra.mxu1 %vm495_vm2, %v6281_v28 }
  0x53   : > { %1069 = vmatpush.bf16.msrb.mxu0 %v1055_v20  ;;  %1082 = vmatpush.bf16.msrb.mxu1 %v1058_v22 }
  0x54   : > { %1095 = vmatpush.bf16.msrb.mxu2 %v1061_v23  ;;  %4283 = vmatmul.msk.bf16.vlgmr.msra.gmra.mxu3 %vm495_vm2, %v6281_v28 }
  0x55   : > { %1108 = vmatpush.bf16.msrb.mxu3 %v1064_v29  ;;  %4282 = vmatmul.msk.bf16.vlgmr.msra.gmra.mxu2 %vm495_vm2, %v6281_v28 }
  0x57   : > { %1070 = vmatpush.bf16.msrb.mxu0 %v4355_v34  ;;  %1083 = vmatpush.bf16.msrb.mxu1 %v4359_v35 }
  0x58   : > { %1096 = vmatpush.bf16.msrb.mxu2 %v4363_v36 }
  0x59   : > { %1109 = vmatpush.bf16.msrb.mxu3 %v4367_v40 }
  0x5b   : > { %1071 = vmatpush.bf16.msrb.mxu0 %v4339_v46  ;;  %1084 = vmatpush.bf16.msrb.mxu1 %v4343_v47  ;;  %v1142_v47 = vlaneseq }
  0x5c   : > { %1097 = vmatpush.bf16.msrb.mxu2 %v4347_v48 }
  0x5d   : > { %1110 = vmatpush.bf16.msrb.mxu3 %v4351_v52  ;;  %vm6642_vm4 = vcmp.lt.s32.totalorder %v1142_v47, 196  ;;  %vm1157_vm6 = vcmp.ge.s32.totalorder %v1142_v47, 68  ;;  %vm1158_vm7 = vcmp.lt.s32.totalorder %v1142_v47, 264  ;;  %vm6669_vm11 = vcmp.ge.s32.totalorder %v1142_v47, 8 }
  0x5e   : > { %vm1159_vm9 = vmand %vm1157_vm6, %vm1158_vm7  ;;  %vm6674_vm12 = vcmp.lt.s32.totalorder %v1142_v47, 204  ;;  %vm6679_vm13 = vcmp.ge.s32.totalorder %v1142_v47, 76  ;;  %vm6684_vm14 = vcmp.lt.s32.totalorder %v1142_v47, 272  ;;  %vm1217_vm7 = vcmp.ge.s32.totalorder %v1142_v47, 84 }
  0x5f   : > { %1072 = vmatpush.bf16.msrb.mxu0 %v4323_v58  ;;  %1085 = vmatpush.bf16.msrb.mxu1 %v4327_v59  ;;  %vm1174_vm1 = vmand %vm6669_vm11, %vm6674_vm12 }
  0x60   : > { %1098 = vmatpush.bf16.msrb.mxu2 %v4331_v60 }
  0x61   : > { %1111 = vmatpush.bf16.msrb.mxu3 %v4335_v0 }
  0x63   : > { %1073 = vmatpush.bf16.msrb.mxu0 %v4307_v6  ;;  %1086 = vmatpush.bf16.msrb.mxu1 %v4311_v7 }
  0x64   : > { %1099 = vmatpush.bf16.msrb.mxu2 %v4315_v8 }
  0x65   : > { %1112 = vmatpush.bf16.msrb.mxu3 %v4319_v9 }
  0x66   : > { %4384 = vmatmul.msk.bf16.vlgmr.msrb.gmra.mxu0 %vm495_vm2, %v6281_v28  ;;  %4385 = vmatmul.msk.bf16.vlgmr.msrb.gmra.mxu1 %vm495_vm2, %v6281_v28 }
  0x67   : > { %4386 = vmatmul.msk.bf16.vlgmr.msrb.gmra.mxu2 %vm495_vm2, %v6281_v28 }
  0x68   : > { %4387 = vmatmul.msk.bf16.vlgmr.msrb.gmra.mxu3 %vm495_vm2, %v6281_v28  ;;  %vm1189_vm2 = vmand %vm6679_vm13, %vm6684_vm14 }
  0xa7   : > { %v524_v11 = vpop.f32.mrf.mxu0  ;;  %v537_v12 = vpop.f32.mrf.mxu1 }
  0xaf   : > { %v526_v14 = vpop.f32.mrf.mxu0  ;;  %v539_v15 = vpop.f32.mrf.mxu1 }
  0xb0   : > { %v550_v13 = vpop.f32.mrf.mxu2  ;;  %v563_v16 = vpop.f32.mrf.mxu3 }
  0xb6   : > { %v1126_v39 = vpop.permute.xlu0 %1125 }
  0xb8   : > { %v552_v17 = vpop.f32.mrf.mxu2  ;;  %v565_v18 = vpop.f32.mrf.mxu3 }
  0xbb   : > { %v705_v19 = vpop.f32.mrf.mxu0  ;;  %v718_v20 = vpop.f32.mrf.mxu1 }
  0xbc   : > { %v748_v33 = vmax.f32 %v524_v11, %v705_v19  ;;  %v749_v10 = vmax.f32 %v537_v12, %v718_v20 }
  0xc3   : > { %v707_v22 = vpop.f32.mrf.mxu0  ;;  %v744_v23 = vpop.f32.mrf.mxu3 }
  0xc4   : > { %v731_v21 = vpop.f32.mrf.mxu2  ;;  %v720_v24 = vpop.f32.mrf.mxu1  ;;  %v751_v44 = vmax.f32 %v563_v16, %v744_v23 }
  0xc5   : > { %v750_v42 = vmax.f32 %v550_v13, %v731_v21 }
  0xcb   : > { %v746_v26 = vpop.f32.mrf.mxu3 }
  0xcc   : > { %v733_v25 = vpop.f32.mrf.mxu2 }
  0xcf   : > { %v890_v27 = vpop.f32.mrf.mxu0  ;;  %v903_v29 = vpop.f32.mrf.mxu1 }
  0xd0   : > { %v933_v35 = vmax.f32 %v748_v33, %v890_v27  ;;  %v934_v37 = vmax.f32 %v749_v10, %v903_v29 }
  0xd7   : > { %v929_v28 = vpop.f32.mrf.mxu3  ;;  %v892_v31 = vpop.f32.mrf.mxu0 }
  0xd8   : > { %v916_v30 = vpop.f32.mrf.mxu2  ;;  %v905_v32 = vpop.f32.mrf.mxu1  ;;  %v936_v51 = vmax.f32 %v751_v44, %v929_v28 }
  0xd9   : > { %v935_v49 = vmax.f32 %v750_v42, %v916_v30 }
  0xdf   : > { %v931_v36 = vpop.f32.mrf.mxu3 }
  0xe0   : > { %v918_v34 = vpop.f32.mrf.mxu2 }
  0xe3   : > { %v1075_v38 = vpop.f32.mrf.mxu0  ;;  %v1088_v41 = vpop.f32.mrf.mxu1 }
  0xe4   : > { %v1118_v40 = vmax.f32 %v933_v35, %v1075_v38  ;;  %v1119_v43 = vmax.f32 %v934_v37, %v1088_v41 }
  0xe6   : > { %v1128_v45 = vadd.f32 %v1126_v39, %v1118_v40  ;;  %v1129_v46 = vadd.f32 %v1126_v39, %v1119_v43 }
  0xe8   : > { %v1132_v48 = vmax.f32 %v1128_v45, 0.0  ;;  %v6638_v50 = vmax.f32 %v1129_v46, 0.0 }
  0xea   : > { %1147 = vst [vmem:[#allocation1] sm:$0xff] %v1132_v48  ;;  %v1101_v52 = vpop.f32.mrf.mxu2  ;;  %v1138_v57 = vrot.slane %v6638_v50, 7 }
  0xeb   : > { %1148 = vst [vmem:[#allocation1 + $0x9] sm:$0xff] %v6638_v50  ;;  %v1120_v53 = vmax.f32 %v935_v49, %v1101_v52  ;;  %v1114_v54 = vpop.f32.mrf.mxu3  ;;  %v1077_v55 = vpop.f32.mrf.mxu0 }
  0xec   : > { %v1121_v58 = vmax.f32 %v936_v51, %v1114_v54  ;;  %v1090_v59 = vpop.f32.mrf.mxu1  ;;  %v1140_v61 = vsel %vm1139_vm3, %v1132_v48, %v1138_v57 }
  0xed   : > { %v1130_v60 = vadd.f32 %v1126_v39, %v1120_v53  ;;  %1146 = vst.msk [vmem:[#allocation2] ss:$2 sm:$0x3] %vm6642_vm4, %v1140_v61 }
  0xee   : > { %v1131_v62 = vadd.f32 %v1126_v39, %v1121_v58 }
  0xef   : > { %v1134_v63 = vmax.f32 %v1130_v60, 0.0 }
  0xf0   : > { %v1135_v0 = vmax.f32 %v1131_v62, 0.0 }
  0xf1   : > { %v1224_v1 = vrot.slane %v1134_v63, 7 }
  0xf2   : > { %v1150_v2 = vld [vmem:[#allocation1 + $0x1] ss:$9 sm:$0xff]  ;;  %v1225_v3 = vrot.slane %v1135_v0, 6  ;;  %v1103_v4 = vpop.f32.mrf.mxu2 }
  0xf3   : > { %1162 = vst [vmem:[#allocation1] sm:$0xff] %v1132_v48  ;;  %1151 = vrot.lane.b32.xlu1 %v1150_v2, %s6013_s28  ;;  %v1226_v5 = vsel %vm1139_vm3, %v6638_v50, %v1224_v1  ;;  %v1116_v6 = vpop.f32.mrf.mxu3  ;;  %vm6709_vm3 = vcmp.ge.s32.totalorder %v1142_v47, 16 }
  0xf4   : > { %1163 = vst [vmem:[#allocation1 + $0x9] sm:$0xff] %v6638_v50  ;;  %v1228_v7 = vsel %vm1227_vm5, %v1226_v5, %v1225_v3  ;;  %vm1199_vm5 = vcmask 130048  }
  0xf5   : > { %1229 = vrot.lane.b32.xlu0 %v1228_v7, %s6014_s29 }
  0xfb   : > { %v1165_v8 = vld [vmem:[#allocation1 + $0x2] ss:$9 sm:$0xff] }
  0xfc   : > { %1177 = vst [vmem:[#allocation1] sm:$0xff] %v1132_v48  ;;  %1166 = vrot.lane.b32.xlu1 %v1165_v8, %s6015_s30 }
  0xfd   : > { %1178 = vst [vmem:[#allocation1 + $0x9] sm:$0xff] %v6638_v50 }
 0x104   : > { %v1180_v9 = vld [vmem:[#allocation1 + $0x3] ss:$9 sm:$0xff] }
 0x105   : > { %1192 = vst [vmem:[#allocation1] sm:$0xff] %v1132_v48  ;;  %1181 = vrot.lane.b32.xlu2 %v1180_v9, %s6016_s12 }
 0x106   : > { %1193 = vst [vmem:[#allocation1 + $0x9] sm:$0xff] %v6638_v50 }
 0x10d   : > { %v1195_v11 = vld [vmem:[#allocation1 + $0x4] ss:$9 sm:$0xff] }
 0x10e   : > { %1207 = vst [vmem:[#allocation1] sm:$0xff] %v1132_v48  ;;  %1196 = vrot.lane.b32.xlu1 %v1195_v11, %s6017_s13 }
 0x10f   : > { %1208 = vst [vmem:[#allocation1 + $0x9] sm:$0xff] %v6638_v50 }
 0x116   : > { %v1210_v12 = vld [vmem:[#allocation1 + $0x5] ss:$9 sm:$0xff] }
 0x117   : > { %1237 = vst [vmem:[#allocation1] sm:$0xff] %v6638_v50 }
 0x118   : > { %1238 = vst [vmem:[#allocation1 + $0x9] sm:$0xff] %v1134_v63 }
 0x119   : > { %1239 = vst [vmem:[#allocation1 + $0x12] sm:$0xff] %v1135_v0 }
 0x120   : > { %v1241_v13 = vld [vmem:[#allocation1 + $0x1] ss:$9 sm:$0xff] }
 0x121   : > { %1247 = vst [vmem:[#allocation1 + $0x12] sm:$0xff] %v1135_v0 }
 0x122   : > { %1245 = vst [vmem:[#allocation1] sm:$0xff] %v6638_v50 }
 0x123   : > { %1246 = vst [vmem:[#allocation1 + $0x9] sm:$0xff] %v1134_v63 }
 0x12a   : > { %v1249_v14 = vld [vmem:[#allocation1 + $0x2] ss:$9 sm:$0xff] }
 0x12b   : > { %1250 = vrot.lane.b32.xlu2 %v1249_v14, %s6013_s28  ;;  %1257 = vst [vmem:[#allocation1] sm:$0xff] %v6638_v50 }
 0x12c   : > { %1258 = vst [vmem:[#allocation1 + $0x9] sm:$0xff] %v1134_v63 }
 0x12d   : > { %1259 = vst [vmem:[#allocation1 + $0x12] sm:$0xff] %v1135_v0 }
 0x134   : > { %v1261_v15 = vld [vmem:[#allocation1 + $0x3] ss:$9 sm:$0xff] }
 0x135   : > { %1262 = vrot.lane.b32.xlu0 %v1261_v15, %s6015_s30  ;;  %1269 = vst [vmem:[#allocation1] sm:$0xff] %v6638_v50 }
 0x136   : > { %1270 = vst [vmem:[#allocation1 + $0x9] sm:$0xff] %v1134_v63 }
 0x137   : > { %1271 = vst [vmem:[#allocation1 + $0x12] sm:$0xff] %v1135_v0 }
 0x13d   : > { %1211 = vrot.lane.b32.xlu0 %v1210_v12, %s6018_s14 }
 0x13e   : > { %v1273_v16 = vld [vmem:[#allocation1 + $0x4] ss:$9 sm:$0xff] }
 0x13f   : > { %1274 = vrot.lane.b32.xlu2 %v1273_v16, %s6016_s12  ;;  %1281 = vst [vmem:[#allocation1] sm:$0xff] %v6638_v50 }
 0x140   : > { %1282 = vst [vmem:[#allocation1 + $0x9] sm:$0xff] %v1134_v63 }
 0x141   : > { %1283 = vst [vmem:[#allocation1 + $0x12] sm:$0xff] %v1135_v0 }
 0x148   : > { %v1285_v17 = vld [vmem:[#allocation1 + $0x5] ss:$9 sm:$0xff] }
 0x149   : > { %1286 = vrot.lane.b32.xlu1 %v1285_v17, %s6017_s13 }
 0x15f   : > { %v1182_v24 = vpop.permute.xlu2 %1181 }
 0x160   : > { %v1183_v30 = vrot.slane %v1182_v24, 7 }
 0x162   : > { %v1185_v33 = vsel %vm1184_vm0, %v1183_v30, %v1182_v24 }
 0x165   : > { %v1152_v18 = vpop.permute.xlu1 %1151 }
 0x166   : > { %v1153_v19 = vrot.slane %v1152_v18, 7 }
 0x167   : > { %v1230_v20 = vpop.permute.xlu0 %1229 }
 0x168   : > { %v1155_v21 = vsel %vm1154_vm8, %v1153_v19, %v1152_v18  ;;  %v1231_v22 = vrot.slane %v1230_v20, 1 }
 0x169   : > { %1161 = vst.msk [vmem:[#allocation2 + $0x2] ss:$2 sm:$0x7] %vm1159_vm9, %v1155_v21 }
 0x16a   : > { %v1233_v23 = vsel %vm1232_vm10, %v1230_v20, %v1231_v22 }
 0x16b   : > { %1236 = vst.msk [vmem:[#allocation2 + $0x1] ss:$2 sm:$0x3] %vm6642_vm4, %v1233_v23  ;;  %vm6714_vm4 = vcmp.lt.s32.totalorder %v1142_v47, 212 }
 0x16c   : > { %1244 = vst.msk [vmem:[#allocation2 + $0x3] ss:$2 sm:$0x7] %vm1159_vm9, %v1241_v13  ;;  %vm1204_vm6 = vmand %vm6709_vm3, %vm6714_vm4  ;;  %vm1214_vm9 = vcmask 687104  }
 0x16e   : > { %v1167_v28 = vpop.permute.xlu1 %1166 }
 0x16f   : > { %v1168_v31 = vrot.slane %v1167_v28, 7 }
 0x171   : > { %v1170_v32 = vsel %vm1169_vm15, %v1168_v31, %v1167_v28 }
 0x172   : > { %1176 = vst.msk [vmem:[#allocation2 + $0x6] ss:$2 sm:$0x3] %vm1174_vm1, %v1170_v32 }
 0x173   : > { %1191 = vst.msk [vmem:[#allocation2 + $0x8] ss:$2 sm:$0x7] %vm1189_vm2, %v1185_v33 }
 0x180   : > { %v1197_v35 = vpop.permute.xlu1 %1196 }
 0x181   : > { %v1198_v36 = vrot.slane %v1197_v35, 7 }
 0x183   : > { %v1200_v37 = vsel %vm1199_vm5, %v1198_v36, %v1197_v35 }
 0x184   : > { %1206 = vst.msk [vmem:[#allocation2 + $0xc] ss:$2 sm:$0x3] %vm1204_vm6, %v1200_v37 }
 0x185   : > { %v1251_v38 = vpop.permute.xlu2 %1250 }
 0x186   : > { %v1252_v39 = vrot.slane %v1251_v38, 1 }
 0x188   : > { %v1253_v40 = vsel %vm1154_vm8, %v1251_v38, %v1252_v39  ;;  %vm1218_vm8 = vcmp.lt.s32.totalorder %v1142_v47, 280 }
 0x189   : > { %1256 = vst.msk [vmem:[#allocation2 + $0x7] ss:$2 sm:$0x3] %vm1174_vm1, %v1253_v40  ;;  %vm1219_vm10 = vmand %vm1217_vm7, %vm1218_vm8 }
 0x199   : > { %v1275_v41 = vpop.permute.xlu2 %1274 }
 0x19a   : > { %v1276_v42 = vrot.slane %v1275_v41, 1 }
 0x19c   : > { %v1277_v46 = vsel %vm1184_vm0, %v1275_v41, %v1276_v42 }
 0x1a7   : > { %v1263_v43 = vpop.permute.xlu0 %1262 }
 0x1a8   : > { %v1264_v44 = vrot.slane %v1263_v43, 7 }
 0x1aa   : > { %v1265_v45 = vsel %vm1169_vm15, %v1264_v44, %v1263_v43 }
 0x1ab   : > { %1268 = vst.msk [vmem:[#allocation2 + $0x9] ss:$2 sm:$0x7] %vm1189_vm2, %v1265_v45 }
 0x1ac   : > { %1280 = vst.msk [vmem:[#allocation2 + $0xd] ss:$2 sm:$0x3] %vm1204_vm6, %v1277_v46 }
 0x1af   : > { %v1212_v48 = vpop.permute.xlu0 %1211 }
 0x1b0   : > { %v1213_v49 = vrot.slane %v1212_v48, 7 }
 0x1b2   : > { %v1215_v50 = vsel %vm1214_vm9, %v1213_v49, %v1212_v48 }
 0x1b3   : > { %1221 = vst.msk [vmem:[#allocation2 + $0xe] ss:$2 sm:$0x7] %vm1219_vm10, %v1215_v50 }
 0x1bb   : > { %v1287_v51 = vpop.permute.xlu1 %1286 }
 0x1bc   : > { %v1288_v52 = vrot.slane %v1287_v51, 7 }
 0x1be   : > { %v1289_v53 = vsel %vm1199_vm5, %v1288_v52, %v1287_v51 }
 0x1bf   : > { %1292 = vst.msk [vmem:[#allocation2 + $0xf] ss:$2 sm:$0x7] %vm1219_vm10, %v1289_v53 }
 0x1c0 PF: > { %v4502_v47 = vld [vmem:[%s6095_s23 + $0xe0] sm:$0xf]  ;;  %v5681_v54 = vld [vmem:[%s6095_s23 + $0xec] sm:$0xf0]  ;;  %vm3101_vm11 = vcmask 1043456   ;;  %vm3097_vm12 = vcmask 195584  }
 0x1c1   : > { %v4758_v55 = vld [vmem:[%s6095_s23 + $0x2e0] sm:$0xf]  ;;  %v4503_v56 = vor.u32 %v5681_v54, %v4502_v47  ;;  %v5745_v57 = vld [vmem:[%s6095_s23 + $0x2ec] sm:$0xf0] }
 0x1c2   : > { %v4486_v58 = vld [vmem:[%s6095_s23 + $0xc0] sm:$0xf]  ;;  %v5677_v59 = vld [vmem:[%s6095_s23 + $0xcc] sm:$0xf0]  ;;  %v4759_v60 = vor.u32 %v5745_v57, %v4758_v55 }
 0x1c3   : > { %v4742_v61 = vld [vmem:[%s6095_s23 + $0x2c0] sm:$0xf]  ;;  %v5741_v62 = vld [vmem:[%s6095_s23 + $0x2cc] sm:$0xf0]  ;;  %3114 = vmatpush.bf16.msra.mxu0 %v4503_v56  ;;  %v4487_v0 = vor.u32 %v5677_v59, %v4486_v58 }
 0x1c4   : > { %v4886_v63 = vld [vmem:[%s6095_s23 + $0x3e0] sm:$0xf]  ;;  %v5777_v1 = vld [vmem:[%s6095_s23 + $0x3ec] sm:$0xf0]  ;;  %3140 = vmatpush.bf16.msra.mxu2 %v4759_v60  ;;  %v4743_v4 = vor.u32 %v5741_v62, %v4742_v61 }
 0x1c5   : > { %v4630_v2 = vld [vmem:[%s6095_s23 + $0x1e0] sm:$0xf]  ;;  %v5713_v3 = vld [vmem:[%s6095_s23 + $0x1ec] sm:$0xf0]  ;;  %v4887_v5 = vor.u32 %v5777_v1, %v4886_v63 }
 0x1c6   : > { %v4631_v6 = vor.u32 %v5713_v3, %v4630_v2  ;;  %v4470_v7 = vld [vmem:[%s6095_s23 + $0xa0] sm:$0xf]  ;;  %v5673_v8 = vld [vmem:[%s6095_s23 + $0xac] sm:$0xf0] }
 0x1c7   : > { %v4726_v9 = vld [vmem:[%s6095_s23 + $0x2a0] sm:$0xf]  ;;  %v5737_v11 = vld [vmem:[%s6095_s23 + $0x2ac] sm:$0xf0]  ;;  %3153 = vmatpush.bf16.msra.mxu3 %v4887_v5  ;;  %3115 = vmatpush.bf16.msra.mxu0 %v4487_v0  ;;  %v4471_v17 = vor.u32 %v5673_v8, %v4470_v7 }
 0x1c8   : > { %v4870_v12 = vld [vmem:[%s6095_s23 + $0x3c0] sm:$0xf]  ;;  %v5773_v13 = vld [vmem:[%s6095_s23 + $0x3cc] sm:$0xf0]  ;;  %3127 = vmatpush.bf16.msra.mxu1 %v4631_v6  ;;  %3141 = vmatpush.bf16.msra.mxu2 %v4743_v4  ;;  %v4727_v21 = vor.u32 %v5737_v11, %v4726_v9 }
 0x1c9   : > { %v4871_v14 = vor.u32 %v5773_v13, %v4870_v12  ;;  %v4614_v15 = vld [vmem:[%s6095_s23 + $0x1c0] sm:$0xf]  ;;  %v5709_v16 = vld [vmem:[%s6095_s23 + $0x1cc] sm:$0xf0] }
 0x1ca   : > { %v4615_v18 = vor.u32 %v5709_v16, %v4614_v15  ;;  %v4454_v19 = vld [vmem:[%s6095_s23 + $0x80] sm:$0xf]  ;;  %v5669_v20 = vld [vmem:[%s6095_s23 + $0x8c] sm:$0xf0] }
 0x1cb   : > { %v4854_v22 = vld [vmem:[%s6095_s23 + $0x3a0] sm:$0xf]  ;;  %v5769_v23 = vld [vmem:[%s6095_s23 + $0x3ac] sm:$0xf0]  ;;  %3154 = vmatpush.bf16.msra.mxu3 %v4871_v14  ;;  %3116 = vmatpush.bf16.msra.mxu0 %v4471_v17  ;;  %v4455_v31 = vor.u32 %v5669_v20, %v4454_v19 }
 0x1cc   : > { %v4598_v24 = vld [vmem:[%s6095_s23 + $0x1a0] sm:$0xf]  ;;  %v5733_v26 = vld [vmem:[%s6095_s23 + $0x28c] sm:$0xf0]  ;;  %3128 = vmatpush.bf16.msra.mxu1 %v4615_v18  ;;  %v4855_v29 = vor.u32 %v5769_v23, %v4854_v22  ;;  %3142 = vmatpush.bf16.msra.mxu2 %v4727_v21 }
 0x1cd   : > { %v4710_v25 = vld [vmem:[%s6095_s23 + $0x280] sm:$0xf]  ;;  %v5705_v27 = vld [vmem:[%s6095_s23 + $0x1ac] sm:$0xf0] }
 0x1ce   : > { %v4599_v30 = vor.u32 %v5705_v27, %v4598_v24  ;;  %v4838_v28 = vld [vmem:[%s6095_s23 + $0x380] sm:$0xf]  ;;  %v5765_v32 = vld [vmem:[%s6095_s23 + $0x38c] sm:$0xf0]  ;;  %v4711_v34 = vor.u32 %v5733_v26, %v4710_v25 }
 0x1cf   : > { %v4582_v33 = vld [vmem:[%s6095_s23 + $0x180] sm:$0xf]  ;;  %v5701_v10 = vld [vmem:[%s6095_s23 + $0x18c] sm:$0xf0]  ;;  %3155 = vmatpush.bf16.msra.mxu3 %v4855_v29  ;;  %v4839_v39 = vor.u32 %v5765_v32, %v4838_v28  ;;  %3117 = vmatpush.bf16.msra.mxu0 %v4455_v31 }
 0x1d0   : > { %v4438_v35 = vld [vmem:[%s6095_s23 + $0x60] sm:$0xf]  ;;  %v5665_v36 = vld [vmem:[%s6095_s23 + $0x6c] sm:$0xf0]  ;;  %3129 = vmatpush.bf16.msra.mxu1 %v4599_v30  ;;  %v4583_v40 = vor.u32 %v5701_v10, %v4582_v33  ;;  %3143 = vmatpush.bf16.msra.mxu2 %v4711_v34 }
 0x1d1   : > { %v4694_v37 = vld [vmem:[%s6095_s23 + $0x260] sm:$0xf]  ;;  %v5729_v38 = vld [vmem:[%s6095_s23 + $0x26c] sm:$0xf0]  ;;  %v4439_v42 = vor.u32 %v5665_v36, %v4438_v35 }
 0x1d2   : > { %v4822_v41 = vld [vmem:[%s6095_s23 + $0x360] sm:$0xf]  ;;  %v5761_v43 = vld [vmem:[%s6095_s23 + $0x36c] sm:$0xf0]  ;;  %v4695_v46 = vor.u32 %v5729_v38, %v4694_v37 }
 0x1d3   : > { %v4566_v44 = vld [vmem:[%s6095_s23 + $0x160] sm:$0xf]  ;;  %v5697_v45 = vld [vmem:[%s6095_s23 + $0x16c] sm:$0xf0]  ;;  %3156 = vmatpush.bf16.msra.mxu3 %v4839_v39  ;;  %v4823_v52 = vor.u32 %v5761_v43, %v4822_v41  ;;  %3118 = vmatpush.bf16.msra.mxu0 %v4439_v42  ;;  %v1293_v42 = vld [vmem:[#allocation2] sm:$0xff] }
 0x1d4   : > { %v4422_v48 = vld [vmem:[%s6095_s23 + $0x40] sm:$0xf]  ;;  %v5661_v49 = vld [vmem:[%s6095_s23 + $0x4c] sm:$0xf0]  ;;  %3130 = vmatpush.bf16.msra.mxu1 %v4583_v40  ;;  %v4567_v53 = vor.u32 %v5697_v45, %v4566_v44  ;;  %3144 = vmatpush.bf16.msra.mxu2 %v4695_v46  ;;  %1299 = vst [vmem:[#allocation1] ss:$4 sm:$0xff] %v1293_v42 }
 0x1d5   : > { %v4678_v50 = vld [vmem:[%s6095_s23 + $0x240] sm:$0xf]  ;;  %v5725_v51 = vld [vmem:[%s6095_s23 + $0x24c] sm:$0xf0]  ;;  %v4423_v54 = vor.u32 %v5661_v49, %v4422_v48 }
 0x1d6   : > { %v4806_v47 = vld [vmem:[%s6095_s23 + $0x340] sm:$0xf]  ;;  %v5757_v55 = vld [vmem:[%s6095_s23 + $0x34c] sm:$0xf0]  ;;  %v4679_v58 = vor.u32 %v5725_v51, %v4678_v50 }
 0x1d7   : > { %v4550_v56 = vld [vmem:[%s6095_s23 + $0x140] sm:$0xf]  ;;  %v5693_v57 = vld [vmem:[%s6095_s23 + $0x14c] sm:$0xf0]  ;;  %3157 = vmatpush.bf16.msra.mxu3 %v4823_v52  ;;  %v4807_v63 = vor.u32 %v5757_v55, %v4806_v47  ;;  %3119 = vmatpush.bf16.msra.mxu0 %v4423_v54 }
 0x1d8   : > { %v4406_v59 = vld [vmem:[%s6095_s23 + $0x20] sm:$0xf]  ;;  %v5657_v60 = vld [vmem:[%s6095_s23 + $0x2c] sm:$0xf0]  ;;  %3131 = vmatpush.bf16.msra.mxu1 %v4567_v53  ;;  %v4551_v0 = vor.u32 %v5693_v57, %v4550_v56  ;;  %3145 = vmatpush.bf16.msra.mxu2 %v4679_v58 }
 0x1d9   : > { %v4662_v61 = vld [vmem:[%s6095_s23 + $0x220] sm:$0xf]  ;;  %v5721_v62 = vld [vmem:[%s6095_s23 + $0x22c] sm:$0xf0]  ;;  %v4407_v3 = vor.u32 %v5657_v60, %v4406_v59 }
 0x1da   : > { %v4390_v1 = vld [vmem:[%s6095_s23] sm:$0xf]  ;;  %v5753_v4 = vld [vmem:[%s6095_s23 + $0x32c] sm:$0xf0]  ;;  %v4663_v7 = vor.u32 %v5721_v62, %v4662_v61 }
 0x1db   : > { %v4790_v2 = vld [vmem:[%s6095_s23 + $0x320] sm:$0xf]  ;;  %v5689_v6 = vld [vmem:[%s6095_s23 + $0x12c] sm:$0xf0]  ;;  %3158 = vmatpush.bf16.msra.mxu3 %v4807_v63  ;;  %3120 = vmatpush.bf16.msra.mxu0 %v4407_v3 }
 0x1dc   : > { %v4534_v5 = vld [vmem:[%s6095_s23 + $0x120] sm:$0xf]  ;;  %v5653_v8 = vld [vmem:[%s6095_s23 + $0xc] sm:$0xf0]  ;;  %3132 = vmatpush.bf16.msra.mxu1 %v4551_v0  ;;  %v4791_v15 = vor.u32 %v5753_v4, %v4790_v2  ;;  %3146 = vmatpush.bf16.msra.mxu2 %v4663_v7  ;;  %v1295_v4 = vld [vmem:[#allocation2 + $0x10] sm:$0xf] }
 0x1dd   : > { %v4646_v9 = vld [vmem:[%s6095_s23 + $0x200] sm:$0xf]  ;;  %v5717_v11 = vld [vmem:[%s6095_s23 + $0x20c] sm:$0xf0]  ;;  %v4535_v16 = vor.u32 %v5689_v6, %v4534_v5  ;;  %v4391_v20 = vor.u32 %v5653_v8, %v4390_v1 }
 0x1de   : > { %v5014_v12 = vld [vmem:[%s6095_s23 + $0x4e0] sm:$0xf]  ;;  %v5809_v13 = vld [vmem:[%s6095_s23 + $0x4ec] sm:$0xf0]  ;;  %v4647_v24 = vor.u32 %v5717_v11, %v4646_v9 }
 0x1df   : > { %v5270_v14 = vld [vmem:[%s6095_s23 + $0x6e0] sm:$0xf]  ;;  %v5873_v17 = vld [vmem:[%s6095_s23 + $0x6ec] sm:$0xf0]  ;;  %v5015_v25 = vor.u32 %v5809_v13, %v5014_v12  ;;  %3159 = vmatpush.bf16.msra.mxu3 %v4791_v15  ;;  %3121 = vmatpush.bf16.msra.mxu0 %v4391_v20 }
 0x1e0   : > { %v4774_v18 = vld [vmem:[%s6095_s23 + $0x300] sm:$0xf]  ;;  %v5749_v19 = vld [vmem:[%s6095_s23 + $0x30c] sm:$0xf0]  ;;  %v5271_v30 = vor.u32 %v5873_v17, %v5270_v14  ;;  %3133 = vmatpush.bf16.msra.mxu1 %v4535_v16  ;;  %3147 = vmatpush.bf16.msra.mxu2 %v4647_v24 }
 0x1e1   : > { %v4518_v21 = vld [vmem:[%s6095_s23 + $0x100] sm:$0xf]  ;;  %v5685_v22 = vld [vmem:[%s6095_s23 + $0x10c] sm:$0xf0]  ;;  %v4775_v32 = vor.u32 %v5749_v19, %v4774_v18 }
 0x1e2   : > { %v5398_v23 = vld [vmem:[%s6095_s23 + $0x7e0] sm:$0xf]  ;;  %v5905_v26 = vld [vmem:[%s6095_s23 + $0x7ec] sm:$0xf0]  ;;  %v4519_v33 = vor.u32 %v5685_v22, %v4518_v21 }
 0x1e3   : > { %v5142_v27 = vld [vmem:[%s6095_s23 + $0x5e0] sm:$0xf]  ;;  %v5841_v29 = vld [vmem:[%s6095_s23 + $0x5ec] sm:$0xf0]  ;;  %v5399_v35 = vor.u32 %v5905_v26, %v5398_v23  ;;  %3166 = vmatpush.bf16.msrb.mxu0 %v5015_v25  ;;  %3160 = vmatpush.bf16.msra.mxu3 %v4775_v32 }
 0x1e4   : > { %v4998_v28 = vld [vmem:[%s6095_s23 + $0x4c0] sm:$0xf]  ;;  %v5805_v31 = vld [vmem:[%s6095_s23 + $0x4cc] sm:$0xf0]  ;;  %v5143_v36 = vor.u32 %v5841_v29, %v5142_v27  ;;  %3192 = vmatpush.bf16.msrb.mxu2 %v5271_v30  ;;  %3134 = vmatpush.bf16.msra.mxu1 %v4519_v33 }
 0x1e5   : > { %v5254_v10 = vld [vmem:[%s6095_s23 + $0x6c0] sm:$0xf]  ;;  %v5869_v34 = vld [vmem:[%s6095_s23 + $0x6cc] sm:$0xf0]  ;;  %v4999_v39 = vor.u32 %v5805_v31, %v4998_v28 }
 0x1e6   : > { %v5382_v37 = vld [vmem:[%s6095_s23 + $0x7c0] sm:$0xf]  ;;  %v5901_v38 = vld [vmem:[%s6095_s23 + $0x7cc] sm:$0xf0]  ;;  %v5255_v43 = vor.u32 %v5869_v34, %v5254_v10 }
 0x1e7   : > { %v5126_v40 = vld [vmem:[%s6095_s23 + $0x5c0] sm:$0xf]  ;;  %v5837_v41 = vld [vmem:[%s6095_s23 + $0x5cc] sm:$0xf0]  ;;  %3205 = vmatpush.bf16.msrb.mxu3 %v5399_v35  ;;  %v5383_v49 = vor.u32 %v5901_v38, %v5382_v37  ;;  %3167 = vmatpush.bf16.msrb.mxu0 %v4999_v39 }
 0x1e8   : > { %v4982_v44 = vld [vmem:[%s6095_s23 + $0x4a0] sm:$0xf]  ;;  %v5801_v45 = vld [vmem:[%s6095_s23 + $0x4ac] sm:$0xf0]  ;;  %3179 = vmatpush.bf16.msrb.mxu1 %v5143_v36  ;;  %v5127_v50 = vor.u32 %v5837_v41, %v5126_v40  ;;  %3193 = vmatpush.bf16.msrb.mxu2 %v5255_v43 }
 0x1e9   : > { %v5238_v46 = vld [vmem:[%s6095_s23 + $0x6a0] sm:$0xf]  ;;  %v5865_v48 = vld [vmem:[%s6095_s23 + $0x6ac] sm:$0xf0]  ;;  %v4983_v52 = vor.u32 %v5801_v45, %v4982_v44 }
 0x1ea   : > { %v5366_v51 = vld [vmem:[%s6095_s23 + $0x7a0] sm:$0xf]  ;;  %v5897_v53 = vld [vmem:[%s6095_s23 + $0x7ac] sm:$0xf0]  ;;  %v5239_v55 = vor.u32 %v5865_v48, %v5238_v46 }
 0x1eb   : > { %v5110_v47 = vld [vmem:[%s6095_s23 + $0x5a0] sm:$0xf]  ;;  %v5833_v54 = vld [vmem:[%s6095_s23 + $0x5ac] sm:$0xf0]  ;;  %3206 = vmatpush.bf16.msrb.mxu3 %v5383_v49  ;;  %v5367_v62 = vor.u32 %v5897_v53, %v5366_v51  ;;  %3168 = vmatpush.bf16.msrb.mxu0 %v4983_v52 }
 0x1ec   : > { %v4966_v56 = vld [vmem:[%s6095_s23 + $0x480] sm:$0xf]  ;;  %v5797_v57 = vld [vmem:[%s6095_s23 + $0x48c] sm:$0xf0]  ;;  %3180 = vmatpush.bf16.msrb.mxu1 %v5127_v50  ;;  %v5111_v63 = vor.u32 %v5833_v54, %v5110_v47  ;;  %3194 = vmatpush.bf16.msrb.mxu2 %v5239_v55 }
 0x1ed   : > { %v5222_v58 = vld [vmem:[%s6095_s23 + $0x680] sm:$0xf]  ;;  %v5861_v59 = vld [vmem:[%s6095_s23 + $0x68c] sm:$0xf0]  ;;  %v4967_v5 = vor.u32 %v5797_v57, %v4966_v56 }
 0x1ee   : > { %v5350_v60 = vld [vmem:[%s6095_s23 + $0x780] sm:$0xf]  ;;  %v5893_v61 = vld [vmem:[%s6095_s23 + $0x78c] sm:$0xf0]  ;;  %v5223_v8 = vor.u32 %v5861_v59, %v5222_v58  ;;  %v5679_v58 = vld [vmem:[%s6095_s23 + $0xe4] sm:$0xf] }
 0x1ef   : > { %v4950_v0 = vld [vmem:[%s6095_s23 + $0x460] sm:$0xf]  ;;  %v5793_v1 = vld [vmem:[%s6095_s23 + $0x46c] sm:$0xf0]  ;;  %3207 = vmatpush.bf16.msrb.mxu3 %v5367_v62  ;;  %v5351_v18 = vor.u32 %v5893_v61, %v5350_v60  ;;  %3169 = vmatpush.bf16.msrb.mxu0 %v4967_v5  ;;  %v4504_v61 = vld [vmem:[%s6095_s23 + $0xf0] sm:$0xf0] }
 0x1f0   : > { %v5094_v2 = vld [vmem:[%s6095_s23 + $0x580] sm:$0xf]  ;;  %v5829_v3 = vld [vmem:[%s6095_s23 + $0x58c] sm:$0xf0]  ;;  %3181 = vmatpush.bf16.msrb.mxu1 %v5111_v63  ;;  %v4951_v21 = vor.u32 %v5793_v1, %v4950_v0  ;;  %3195 = vmatpush.bf16.msrb.mxu2 %v5223_v8 }
 0x1f1   : > { %v1304_v6 = vld.sshfl [vmem:[#allocation1 + $0x10] sm:$0xff pattern:$0x73625140]  ;;  %v1302_v7 = vld.sshfl [vmem:[#allocation1] sm:$0xff pattern:$0x73625140]  ;;  %v5095_v19 = vor.u32 %v5829_v3, %v5094_v2 }
 0x1f2   : > { %v6837_v9 = vpack.c.bf16 %v1304_v6, %v1304_v6  ;;  %v6839_v11 = vpack.c.bf16 %v1302_v7, %v1302_v7  ;;  %v1305_v12 = vld.sshfl [vmem:[#allocation1 + $0x18] sm:$0xff pattern:$0x73625140]  ;;  %v1303_v13 = vld.sshfl [vmem:[#allocation1 + $0x8] sm:$0xff pattern:$0x73625140] }
 0x1f3   : > { %v5206_v14 = vld [vmem:[%s6095_s23 + $0x660] sm:$0xf]  ;;  %v5857_v15 = vld [vmem:[%s6095_s23 + $0x66c] sm:$0xf0]  ;;  %v6843_v16 = vpack.c.bf16 %v1305_v12, %v1305_v12  ;;  %1310 = vst [vmem:[#allocation1] ss:$4 sm:$0xff] %v1295_v4  ;;  %v6845_v17 = vpack.c.bf16 %v1303_v13, %v1303_v13  ;;  %3208 = vmatpush.bf16.msrb.mxu3 %v5351_v18  ;;  %3170 = vmatpush.bf16.msrb.mxu0 %v4951_v21 }
 0x1f4   : > { %v5334_v20 = vld [vmem:[%s6095_s23 + $0x760] sm:$0xf]  ;;  %3148 = vmatmul.bf16.vlgmr.msra.gmra.mxu2 %v6837_v9  ;;  %v5889_v22 = vld [vmem:[%s6095_s23 + $0x76c] sm:$0xf0]  ;;  %v5207_v25 = vor.u32 %v5857_v15, %v5206_v14  ;;  %3122 = vmatmul.bf16.vlgmr.msra.gmra.mxu0 %v6839_v11  ;;  %v4507_v12 = vor.u32 %v5679_v58, %v4504_v61  ;;  %v5675_v13 = vld [vmem:[%s6095_s23 + $0xc4] sm:$0xf] }
 0x1f5   : > { %v5078_v23 = vld [vmem:[%s6095_s23 + $0x560] sm:$0xf]  ;;  %v5825_v24 = vld [vmem:[%s6095_s23 + $0x56c] sm:$0xf0]  ;;  %3161 = vmatmul.bf16.vlgmr.msra.gmra.mxu3 %v6843_v16  ;;  %3135 = vmatmul.bf16.vlgmr.msra.gmra.mxu1 %v6845_v17  ;;  %v5335_v28 = vor.u32 %v5889_v22, %v5334_v20  ;;  %v5711_v14 = vld [vmem:[%s6095_s23 + $0x1e4] sm:$0xf] }
 0x1f6   : > { %v4934_v26 = vld [vmem:[%s6095_s23 + $0x440] sm:$0xf]  ;;  %v5789_v27 = vld [vmem:[%s6095_s23 + $0x44c] sm:$0xf0]  ;;  %3182 = vmatpush.bf16.msrb.mxu1 %v5095_v19  ;;  %v5079_v31 = vor.u32 %v5825_v24, %v5078_v23  ;;  %3196 = vmatpush.bf16.msrb.mxu2 %v5207_v25  ;;  %v4632_v15 = vld [vmem:[%s6095_s23 + $0x1f0] sm:$0xf0] }
 0x1f7   : > { %v5190_v29 = vld [vmem:[%s6095_s23 + $0x640] sm:$0xf]  ;;  %v5853_v30 = vld [vmem:[%s6095_s23 + $0x64c] sm:$0xf0]  ;;  %v4935_v34 = vor.u32 %v5789_v27, %v4934_v26  ;;  %3209 = vmatpush.bf16.msrb.mxu3 %v5335_v28  ;;  %v4488_v20 = vld [vmem:[%s6095_s23 + $0xd0] sm:$0xf0] }
 0x1f8   : > { %v5318_v32 = vld [vmem:[%s6095_s23 + $0x740] sm:$0xf]  ;;  %v5885_v33 = vld [vmem:[%s6095_s23 + $0x74c] sm:$0xf0]  ;;  %v5191_v37 = vor.u32 %v5853_v30, %v5190_v29  ;;  %v5735_v61 = vld [vmem:[%s6095_s23 + $0x2a4] sm:$0xf] }
 0x1f9   : > { %v1294_v10 = vld [vmem:[#allocation2 + $0x8] sm:$0xff]  ;;  %v5062_v35 = vld [vmem:[%s6095_s23 + $0x540] sm:$0xf]  ;;  %v5319_v43 = vor.u32 %v5885_v33, %v5318_v32  ;;  %3171 = vmatpush.bf16.msrb.mxu0 %v4935_v34  ;;  %v4491_v32 = vor.u32 %v5675_v13, %v4488_v20  ;;  %v5743_v34 = vld [vmem:[%s6095_s23 + $0x2e4] sm:$0xf] }
 0x1fa   : > { %v5821_v36 = vld [vmem:[%s6095_s23 + $0x54c] sm:$0xf0]  ;;  %1301 = vst [vmem:[#allocation1 + $0x20] ss:$4 sm:$0xff] %v1294_v10  ;;  %v4918_v38 = vld [vmem:[%s6095_s23 + $0x420] sm:$0xf]  ;;  %3183 = vmatpush.bf16.msrb.mxu1 %v5079_v31  ;;  %3197 = vmatpush.bf16.msrb.mxu2 %v5191_v37  ;;  %v4635_v31 = vor.u32 %v5711_v14, %v4632_v15 }
 0x1fb   : > { %v5785_v39 = vld [vmem:[%s6095_s23 + $0x42c] sm:$0xf0]  ;;  %v5174_v40 = vld [vmem:[%s6095_s23 + $0x620] sm:$0xf]  ;;  %v5063_v44 = vor.u32 %v5821_v36, %v5062_v35  ;;  %3210 = vmatpush.bf16.msrb.mxu3 %v5319_v43  ;;  %v5671_v10 = vld [vmem:[%s6095_s23 + $0xa4] sm:$0xf] }
 0x1fc   : > { %v5849_v41 = vld [vmem:[%s6095_s23 + $0x62c] sm:$0xf0]  ;;  %v6868_v42 = vld [vmem:[%s6095_s23 + $0x920] sm:$0xff]  ;;  %v4919_v48 = vor.u32 %v5785_v39, %v4918_v38  ;;  %v4760_v35 = vld [vmem:[%s6095_s23 + $0x2f0] sm:$0xf0] }
 0x1fd   : > { %v4902_v45 = vld [vmem:[%s6095_s23 + $0x400] sm:$0xf]  ;;  %v5881_v49 = vld [vmem:[%s6095_s23 + $0x72c] sm:$0xf0]  ;;  %v5175_v52 = vor.u32 %v5849_v41, %v5174_v40  ;;  %v2505_v55 = vunpack.c.l.b16 %v6868_v42  ;;  %v4472_v38 = vld [vmem:[%s6095_s23 + $0xb0] sm:$0xf0] }
 0x1fe   : > { %v5302_v46 = vld [vmem:[%s6095_s23 + $0x720] sm:$0xf]  ;;  %v5817_v51 = vld [vmem:[%s6095_s23 + $0x52c] sm:$0xf0]  ;;  %3184 = vmatpush.bf16.msrb.mxu1 %v5063_v44  ;;  %3172 = vmatpush.bf16.msrb.mxu0 %v4919_v48  ;;  %v5707_v39 = vld [vmem:[%s6095_s23 + $0x1c4] sm:$0xf]  ;;  %v4763_v44 = vor.u32 %v5743_v34, %v4760_v35  ;;  %v4475_v48 = vor.u32 %v5671_v10, %v4472_v38 }
 0x1ff   : > { %v5046_v50 = vld [vmem:[%s6095_s23 + $0x520] sm:$0xf]  ;;  %v5781_v53 = vld [vmem:[%s6095_s23 + $0x40c] sm:$0xf0]  ;;  %v5303_v59 = vor.u32 %v5881_v49, %v5302_v46  ;;  %3198 = vmatpush.bf16.msrb.mxu2 %v5175_v52  ;;  %v2801_v8 = vpack.c.b16 %v2505_v55, %v2505_v55  ;;  %v4616_v40 = vld [vmem:[%s6095_s23 + $0x1d0] sm:$0xf0] }
 0x200   : > { %v5158_v47 = vld [vmem:[%s6095_s23 + $0x600] sm:$0xf]  ;;  %v5845_v54 = vld [vmem:[%s6095_s23 + $0x60c] sm:$0xf0]  ;;  %v5047_v60 = vor.u32 %v5817_v51, %v5046_v50  ;;  %v4903_v0 = vor.u32 %v5781_v53, %v4902_v45  ;;  %v5667_v49 = vld [vmem:[%s6095_s23 + $0x84] sm:$0xf]  ;;  %v4619_v52 = vor.u32 %v5707_v39, %v4616_v40 }
 0x201   : > { %v5526_v56 = vld [vmem:[%s6095_s23 + $0x8e0] sm:$0xf]  ;;  %v5937_v57 = vld [vmem:[%s6095_s23 + $0x8ec] sm:$0xf0]  ;;  %v5159_v4 = vor.u32 %v5845_v54, %v5158_v47  ;;  %3211 = vmatpush.bf16.msrb.mxu3 %v5303_v59  ;;  %v3103_v29 = vsel %vm3101_vm11, %v2801_v8, 0 }
 0x202   : > { %v5286_v62 = vld [vmem:[%s6095_s23 + $0x700] sm:$0xf]  ;;  %v5877_v63 = vld [vmem:[%s6095_s23 + $0x70c] sm:$0xf0]  ;;  %v5527_v5 = vor.u32 %v5937_v57, %v5526_v56  ;;  %3185 = vmatpush.bf16.msrb.mxu1 %v5047_v60  ;;  %3173 = vmatpush.bf16.msrb.mxu0 %v4903_v0  ;;  %v5739_v50 = vld [vmem:[%s6095_s23 + $0x2c4] sm:$0xf] }
 0x203   : > { %v5030_v1 = vld [vmem:[%s6095_s23 + $0x500] sm:$0xf]  ;;  %v5813_v2 = vld [vmem:[%s6095_s23 + $0x50c] sm:$0xf0]  ;;  %v5287_v18 = vor.u32 %v5877_v63, %v5286_v62  ;;  %3199 = vmatpush.bf16.msrb.mxu2 %v5159_v4  ;;  %v4744_v51 = vld [vmem:[%s6095_s23 + $0x2d0] sm:$0xf0] }
 0x204   : > { %v5510_v3 = vld [vmem:[%s6095_s23 + $0x8c0] sm:$0xf]  ;;  %v1308_v6 = vld.sshfl [vmem:[#allocation1 + $0x30] sm:$0xff pattern:$0x73625140]  ;;  %v5031_v19 = vor.u32 %v5813_v2, %v5030_v1  ;;  %v4747_v56 = vor.u32 %v5739_v50, %v4744_v51 }
 0x205   : > { %v5933_v7 = vld [vmem:[%s6095_s23 + $0x8cc] sm:$0xf0]  ;;  %v1306_v21 = vld.sshfl [vmem:[#allocation1 + $0x20] sm:$0xff pattern:$0x73625140]  ;;  %v6893_v22 = vpack.c.bf16 %v1308_v6, %v1308_v6  ;;  %3212 = vmatpush.bf16.msrb.mxu3 %v5287_v18 }
 0x206   : > { %v1309_v23 = vld.sshfl [vmem:[#allocation1 + $0x38] sm:$0xff pattern:$0x73625140]  ;;  %v1307_v24 = vld.sshfl [vmem:[#allocation1 + $0x28] sm:$0xff pattern:$0x73625140]  ;;  %3218 = vmatpush.bf16.msra.mxu0 %v5527_v5  ;;  %v5511_v27 = vor.u32 %v5933_v7, %v5510_v3  ;;  %v6900_v33 = vpack.c.bf16 %v1306_v21, %v1306_v21  ;;  %3186 = vmatpush.bf16.msrb.mxu1 %v5031_v19 }
 0x207   : > { %v5494_v25 = vld [vmem:[%s6095_s23 + $0x8a0] sm:$0xf]  ;;  %v5929_v26 = vld [vmem:[%s6095_s23 + $0x8ac] sm:$0xf0]  ;;  %3244 = vmatpush.bf16.msra.mxu2 %v4507_v12  ;;  %v6905_v36 = vpack.c.bf16 %v1309_v23, %v1309_v23  ;;  %v6907_v37 = vpack.c.bf16 %v1307_v24, %v1307_v24  ;;  %v4456_v53 = vld [vmem:[%s6095_s23 + $0x90] sm:$0xf0] }
 0x208   : > { %v5542_v30 = vld [vmem:[%s6095_s23 + $0x900] sm:$0xf]  ;;  %v5941_v28 = vld [vmem:[%s6095_s23 + $0x90c] sm:$0xf0]  ;;  %3200 = vmatmul.bf16.vlgmr.msrb.gmra.mxu2 %v6893_v22  ;;  %v5495_v43 = vor.u32 %v5929_v26, %v5494_v25  ;;  %3174 = vmatmul.bf16.vlgmr.msrb.gmra.mxu0 %v6900_v33  ;;  %v5703_v47 = vld [vmem:[%s6095_s23 + $0x1a4] sm:$0xf]  ;;  %v4459_v59 = vor.u32 %v5667_v49, %v4456_v53 }
 0x209   : > { %v5543_v41 = vor.u32 %v5941_v28, %v5542_v30  ;;  %v5478_v45 = vld [vmem:[%s6095_s23 + $0x880] sm:$0xf]  ;;  %v5925_v46 = vld [vmem:[%s6095_s23 + $0x88c] sm:$0xf0]  ;;  %3257 = vmatpush.bf16.msra.mxu3 %v4635_v31  ;;  %3187 = vmatmul.bf16.vlgmr.msrb.gmra.mxu1 %v6907_v37  ;;  %v4600_v54 = vld [vmem:[%s6095_s23 + $0x1b0] sm:$0xf0] }
 0x20a   : > { %3237 = vmatpush.bf16.msra.mxu1 %v3103_v29  ;;  %3219 = vmatpush.bf16.msra.mxu0 %v5511_v27  ;;  %v5479_v55 = vor.u32 %v5925_v46, %v5478_v45  ;;  %v5462_v57 = vld [vmem:[%s6095_s23 + $0x860] sm:$0xf]  ;;  %v5921_v58 = vld [vmem:[%s6095_s23 + $0x86c] sm:$0xf0]  ;;  %v5663_v60 = vld [vmem:[%s6095_s23 + $0x64] sm:$0xf]  ;;  %v4603_v63 = vor.u32 %v5703_v47, %v4600_v54 }
 0x20b   : > { %3245 = vmatpush.bf16.msra.mxu2 %v4491_v32  ;;  %3213 = vmatmul.bf16.vlgmr.msrb.gmra.mxu3 %v6905_v36  ;;  %v4728_v62 = vld [vmem:[%s6095_s23 + $0x2b0] sm:$0xf0]  ;;  %v5699_v1 = vld [vmem:[%s6095_s23 + $0x184] sm:$0xf]  ;;  %v5463_v3 = vor.u32 %v5921_v58, %v5462_v57  ;;  %v5446_v5 = vld [vmem:[%s6095_s23 + $0x840] sm:$0xf] }
 0x20c   : > { %v4440_v0 = vld [vmem:[%s6095_s23 + $0x70] sm:$0xf0]  ;;  %v4731_v4 = vor.u32 %v5735_v61, %v4728_v62  ;;  %v5917_v6 = vld [vmem:[%s6095_s23 + $0x84c] sm:$0xf0]  ;;  %v5659_v8 = vld [vmem:[%s6095_s23 + $0x44] sm:$0xf] }
 0x20d   : > { %3258 = vmatpush.bf16.msra.mxu3 %v4619_v52  ;;  %v4584_v2 = vld [vmem:[%s6095_s23 + $0x190] sm:$0xf0]  ;;  %v4443_v7 = vor.u32 %v5663_v60, %v4440_v0  ;;  %v5731_v12 = vld [vmem:[%s6095_s23 + $0x284] sm:$0xf]  ;;  %v5447_v21 = vor.u32 %v5917_v6, %v5446_v5  ;;  %v5430_v24 = vld [vmem:[%s6095_s23 + $0x820] sm:$0xf] }
 0x20e   : > { %3238 = vmatpush.bf16.msra.mxu1 %v5543_v41  ;;  %3220 = vmatpush.bf16.msra.mxu0 %v5495_v43  ;;  %v4712_v13 = vld [vmem:[%s6095_s23 + $0x290] sm:$0xf0]  ;;  %v4587_v14 = vor.u32 %v5699_v1, %v4584_v2  ;;  %v5695_v18 = vld [vmem:[%s6095_s23 + $0x164] sm:$0xf]  ;;  %v5913_v25 = vld [vmem:[%s6095_s23 + $0x82c] sm:$0xf0] }
 0x20f   : > { %3246 = vmatpush.bf16.msra.mxu2 %v4475_v48  ;;  %v4424_v15 = vld [vmem:[%s6095_s23 + $0x50] sm:$0xf0]  ;;  %v1312_v20 = vld.sshfl [vmem:[#allocation1 + $0x8] sm:$0xff pattern:$0x73625140]  ;;  %v4715_v23 = vor.u32 %v5731_v12, %v4712_v13  ;;  %v5431_v35 = vor.u32 %v5913_v25, %v5430_v24 }
 0x210   : > { %v4568_v19 = vld [vmem:[%s6095_s23 + $0x170] sm:$0xf0]  ;;  %v4427_v26 = vor.u32 %v5659_v8, %v4424_v15  ;;  %v5655_v27 = vld [vmem:[%s6095_s23 + $0x24] sm:$0xf]  ;;  %v6946_v32 = vpack.c.bf16 %v1312_v20, %v1312_v20  ;;  %v5414_v39 = vld [vmem:[%s6095_s23 + $0x800] sm:$0xf] }
 0x211   : > { %3259 = vmatpush.bf16.msra.mxu3 %v4603_v63  ;;  %v5727_v29 = vld [vmem:[%s6095_s23 + $0x264] sm:$0xf]  ;;  %v4696_v30 = vld [vmem:[%s6095_s23 + $0x270] sm:$0xf0]  ;;  %v4571_v28 = vor.u32 %v5695_v18, %v4568_v19  ;;  %v5909_v40 = vld [vmem:[%s6095_s23 + $0x80c] sm:$0xf0] }
 0x212   : > { %3270 = vmatpush.bf16.msrb.mxu1 %v4763_v44  ;;  %3221 = vmatpush.bf16.msra.mxu0 %v5479_v55  ;;  %v4408_v31 = vld [vmem:[%s6095_s23 + $0x30] sm:$0xf0]  ;;  %v5691_v10 = vld [vmem:[%s6095_s23 + $0x144] sm:$0xf]  ;;  %v4699_v38 = vor.u32 %v5727_v29, %v4696_v30  ;;  %v5415_v54 = vor.u32 %v5909_v40, %v5414_v39 }
 0x213   : > { %3247 = vmatpush.bf16.msra.mxu2 %v4459_v59  ;;  %v4552_v34 = vld [vmem:[%s6095_s23 + $0x150] sm:$0xf0]  ;;  %v5651_v41 = vld [vmem:[%s6095_s23 + $0x4] sm:$0xf]  ;;  %v4411_v43 = vor.u32 %v5655_v27, %v4408_v31 }
 0x214   : > { %v4392_v44 = vld [vmem:[%s6095_s23 + $0x10] sm:$0xf0]  ;;  %v5723_v45 = vld [vmem:[%s6095_s23 + $0x244] sm:$0xf]  ;;  %v4555_v48 = vor.u32 %v5691_v10, %v4552_v34 }
 0x215   : > { %3260 = vmatpush.bf16.msra.mxu3 %v4587_v14  ;;  %v4680_v46 = vld [vmem:[%s6095_s23 + $0x250] sm:$0xf0]  ;;  %v5775_v49 = vld [vmem:[%s6095_s23 + $0x3e4] sm:$0xf]  ;;  %v4395_v57 = vor.u32 %v5651_v41, %v4392_v44 }
 0x216   : > { %3271 = vmatpush.bf16.msrb.mxu1 %v4747_v56  ;;  %3222 = vmatpush.bf16.msra.mxu0 %v5463_v3  ;;  %v4888_v50 = vld [vmem:[%s6095_s23 + $0x3f0] sm:$0xf0]  ;;  %v5807_v51 = vld [vmem:[%s6095_s23 + $0x4e4] sm:$0xf]  ;;  %v4683_v55 = vor.u32 %v5723_v45, %v4680_v46 }
 0x217   : > { %3248 = vmatpush.bf16.msra.mxu2 %v4443_v7  ;;  %v5016_v52 = vld [vmem:[%s6095_s23 + $0x4f0] sm:$0xf0]  ;;  %v5687_v53 = vld [vmem:[%s6095_s23 + $0x124] sm:$0xf]  ;;  %v4891_v58 = vor.u32 %v5775_v49, %v4888_v50 }
 0x218   : > { %v4536_v47 = vld [vmem:[%s6095_s23 + $0x130] sm:$0xf0]  ;;  %v1311_v56 = vld.sshfl [vmem:[#allocation1] sm:$0xff pattern:$0x73625140]  ;;  %v5019_v61 = vor.u32 %v5807_v51, %v5016_v52 }
 0x219   : > { %3261 = vmatpush.bf16.msra.mxu3 %v4571_v28  ;;  %5556 = vmatmul.msk.bf16.vlgmr.msra.gmra.mxu1 %vm3097_vm12, %v6946_v32  ;;  %v5719_v59 = vld [vmem:[%s6095_s23 + $0x224] sm:$0xf]  ;;  %v4664_v60 = vld [vmem:[%s6095_s23 + $0x230] sm:$0xf0]  ;;  %v4539_v1 = vor.u32 %v5687_v53, %v4536_v47  ;;  %v6969_v2 = vpack.c.bf16 %v1311_v56, %v1311_v56 }
 0x21a   : > { %3272 = vmatpush.bf16.msrb.mxu1 %v4731_v4  ;;  %3223 = vmatpush.bf16.msra.mxu0 %v5447_v21  ;;  %v5771_v62 = vld [vmem:[%s6095_s23 + $0x3c4] sm:$0xf]  ;;  %v4872_v63 = vld [vmem:[%s6095_s23 + $0x3d0] sm:$0xf0]  ;;  %v4667_v6 = vor.u32 %v5719_v59, %v4664_v60 }
 0x21b   : > { %3249 = vmatpush.bf16.msra.mxu2 %v4427_v26  ;;  %v5803_v0 = vld [vmem:[%s6095_s23 + $0x4c4] sm:$0xf]  ;;  %v5000_v3 = vld [vmem:[%s6095_s23 + $0x4d0] sm:$0xf0]  ;;  %v4875_v12 = vor.u32 %v5771_v62, %v4872_v63 }
 0x21c   : > { %v5683_v4 = vld [vmem:[%s6095_s23 + $0x104] sm:$0xf]  ;;  %v4520_v5 = vld [vmem:[%s6095_s23 + $0x110] sm:$0xf0]  ;;  %v5003_v18 = vor.u32 %v5803_v0, %v5000_v3 }
 0x21d   : > { %3262 = vmatpush.bf16.msra.mxu3 %v4555_v48  ;;  %v5839_v7 = vld [vmem:[%s6095_s23 + $0x5e4] sm:$0xf]  ;;  %v5144_v8 = vld [vmem:[%s6095_s23 + $0x5f0] sm:$0xf0] }
 0x21e   : > { %3273 = vmatpush.bf16.msrb.mxu1 %v4715_v23  ;;  %3224 = vmatpush.bf16.msra.mxu0 %v5431_v35  ;;  %v5767_v13 = vld [vmem:[%s6095_s23 + $0x3a4] sm:$0xf]  ;;  %v4648_v15 = vld [vmem:[%s6095_s23 + $0x210] sm:$0xf0]  ;;  %v4523_v23 = vor.u32 %v5683_v4, %v4520_v5  ;;  %v5147_v26 = vor.u32 %v5839_v7, %v5144_v8 }
 0x21f   : > { %3250 = vmatpush.bf16.msra.mxu2 %v4411_v43  ;;  %v5715_v14 = vld [vmem:[%s6095_s23 + $0x204] sm:$0xf]  ;;  %v4856_v19 = vld [vmem:[%s6095_s23 + $0x3b0] sm:$0xf0] }
 0x220   : > { %v5871_v20 = vld [vmem:[%s6095_s23 + $0x6e4] sm:$0xf]  ;;  %v5272_v21 = vld [vmem:[%s6095_s23 + $0x6f0] sm:$0xf0]  ;;  %v4651_v27 = vor.u32 %v5715_v14, %v4648_v15  ;;  %v4859_v28 = vor.u32 %v5767_v13, %v4856_v19 }
 0x221   : > { %3263 = vmatpush.bf16.msra.mxu3 %v4539_v1  ;;  %v5799_v24 = vld [vmem:[%s6095_s23 + $0x4a4] sm:$0xf]  ;;  %v4984_v25 = vld [vmem:[%s6095_s23 + $0x4b0] sm:$0xf0]  ;;  %v5275_v31 = vor.u32 %v5871_v20, %v5272_v21 }
 0x222   : > { %3274 = vmatpush.bf16.msrb.mxu1 %v4699_v38  ;;  %3225 = vmatpush.bf16.msra.mxu0 %v5415_v54  ;;  %v5835_v29 = vld [vmem:[%s6095_s23 + $0x5c4] sm:$0xf]  ;;  %v5128_v30 = vld [vmem:[%s6095_s23 + $0x5d0] sm:$0xf0]  ;;  %v4987_v34 = vor.u32 %v5799_v24, %v4984_v25 }
 0x223   : > { %3251 = vmatpush.bf16.msra.mxu2 %v4395_v57  ;;  %v5763_v10 = vld [vmem:[%s6095_s23 + $0x384] sm:$0xf]  ;;  %v4840_v35 = vld [vmem:[%s6095_s23 + $0x390] sm:$0xf0]  ;;  %v5131_v43 = vor.u32 %v5835_v29, %v5128_v30 }
 0x224   : > { %v5867_v38 = vld [vmem:[%s6095_s23 + $0x6c4] sm:$0xf]  ;;  %v5256_v39 = vld [vmem:[%s6095_s23 + $0x6d0] sm:$0xf0]  ;;  %v4843_v46 = vor.u32 %v5763_v10, %v4840_v35 }
 0x225   : > { %3226 = vmatmul.bf16.vlgmr.msra.gmra.mxu0 %v6969_v2  ;;  %3264 = vmatpush.bf16.msra.mxu3 %v4523_v23  ;;  %v5795_v40 = vld [vmem:[%s6095_s23 + $0x484] sm:$0xf]  ;;  %v4968_v41 = vld [vmem:[%s6095_s23 + $0x490] sm:$0xf0]  ;;  %v5259_v48 = vor.u32 %v5867_v38, %v5256_v39 }
 0x226   : > { %3275 = vmatpush.bf16.msrb.mxu1 %v4683_v55  ;;  %3283 = vmatpush.bf16.msrb.mxu0 %v4891_v58  ;;  %v5831_v44 = vld [vmem:[%s6095_s23 + $0x5a4] sm:$0xf]  ;;  %v5112_v45 = vld [vmem:[%s6095_s23 + $0x5b0] sm:$0xf0]  ;;  %v4971_v50 = vor.u32 %v5795_v40, %v4968_v41 }
 0x227   : > { %3296 = vmatpush.bf16.msrb.mxu2 %v5019_v61  ;;  %v5759_v49 = vld [vmem:[%s6095_s23 + $0x364] sm:$0xf]  ;;  %v4824_v51 = vld [vmem:[%s6095_s23 + $0x370] sm:$0xf0]  ;;  %v5115_v55 = vor.u32 %v5831_v44, %v5112_v45 }
 0x228   : > { %3252 = vmatmul.bf16.vlgmr.msra.gmra.mxu2 %v6839_v11  ;;  %v5863_v52 = vld [vmem:[%s6095_s23 + $0x6a4] sm:$0xf]  ;;  %v5240_v53 = vld [vmem:[%s6095_s23 + $0x6b0] sm:$0xf0]  ;;  %3265 = vmatmul.bf16.vlgmr.msra.gmra.mxu3 %v6845_v17  ;;  %v4827_v58 = vor.u32 %v5759_v49, %v4824_v51 }
 0x229   : > { %3309 = vmatpush.bf16.msrb.mxu3 %v5147_v26  ;;  %v5791_v47 = vld [vmem:[%s6095_s23 + $0x464] sm:$0xf]  ;;  %v4952_v54 = vld [vmem:[%s6095_s23 + $0x470] sm:$0xf0]  ;;  %v5243_v59 = vor.u32 %v5863_v52, %v5240_v53 }
 0x22a   : > { %3276 = vmatpush.bf16.msrb.mxu1 %v4667_v6  ;;  %3284 = vmatpush.bf16.msrb.mxu0 %v4875_v12  ;;  %v5827_v56 = vld [vmem:[%s6095_s23 + $0x584] sm:$0xf]  ;;  %v5096_v57 = vld [vmem:[%s6095_s23 + $0x590] sm:$0xf0]  ;;  %v4955_v61 = vor.u32 %v5791_v47, %v4952_v54 }
 0x22b   : > { %3297 = vmatpush.bf16.msrb.mxu2 %v5003_v18  ;;  %v5755_v60 = vld [vmem:[%s6095_s23 + $0x344] sm:$0xf]  ;;  %v4808_v62 = vld [vmem:[%s6095_s23 + $0x350] sm:$0xf0]  ;;  %v5099_v4 = vor.u32 %v5827_v56, %v5096_v57 }
 0x22c   : > { %v5859_v63 = vld [vmem:[%s6095_s23 + $0x684] sm:$0xf]  ;;  %v5224_v0 = vld [vmem:[%s6095_s23 + $0x690] sm:$0xf0]  ;;  %v4811_v7 = vor.u32 %v5755_v60, %v4808_v62 }
 0x22d   : > { %3310 = vmatpush.bf16.msrb.mxu3 %v5131_v43  ;;  %v5787_v1 = vld [vmem:[%s6095_s23 + $0x444] sm:$0xf]  ;;  %v4936_v3 = vld [vmem:[%s6095_s23 + $0x450] sm:$0xf0]  ;;  %v5227_v8 = vor.u32 %v5859_v63, %v5224_v0 }
 0x22e   : > { %3277 = vmatpush.bf16.msrb.mxu1 %v4651_v27  ;;  %3285 = vmatpush.bf16.msrb.mxu0 %v4859_v28  ;;  %v5823_v5 = vld [vmem:[%s6095_s23 + $0x564] sm:$0xf]  ;;  %v5080_v6 = vld [vmem:[%s6095_s23 + $0x570] sm:$0xf0]  ;;  %v4939_v13 = vor.u32 %v5787_v1, %v4936_v3 }
 0x22f   : > { %3298 = vmatpush.bf16.msrb.mxu2 %v4987_v34  ;;  %v5751_v12 = vld [vmem:[%s6095_s23 + $0x324] sm:$0xf]  ;;  %v4792_v14 = vld [vmem:[%s6095_s23 + $0x330] sm:$0xf0]  ;;  %v5083_v21 = vor.u32 %v5823_v5, %v5080_v6  ;;  %v5682_v5 = vld [vmem:[%s6095_s23 + $0xf4] sm:$0xf0] }
 0x230   : > { %v5855_v15 = vld [vmem:[%s6095_s23 + $0x664] sm:$0xf]  ;;  %v5208_v18 = vld [vmem:[%s6095_s23 + $0x670] sm:$0xf0]  ;;  %v4795_v25 = vor.u32 %v5751_v12, %v4792_v14 }
 0x231   : > { %3278 = vmatmul.bf16.vlgmr.msrb.gmra.mxu1 %v6837_v9  ;;  %3311 = vmatpush.bf16.msrb.mxu3 %v5115_v55  ;;  %v5783_v19 = vld [vmem:[%s6095_s23 + $0x424] sm:$0xf]  ;;  %v4920_v20 = vld [vmem:[%s6095_s23 + $0x430] sm:$0xf0]  ;;  %v5211_v26 = vor.u32 %v5855_v15, %v5208_v18 }
 0x232   : > { %3322 = vmatpush.bf16.msra.mxu1 %v5275_v31  ;;  %3286 = vmatpush.bf16.msrb.mxu0 %v4843_v46  ;;  %v5819_v23 = vld [vmem:[%s6095_s23 + $0x544] sm:$0xf]  ;;  %v5064_v24 = vld [vmem:[%s6095_s23 + $0x550] sm:$0xf0]  ;;  %v4923_v28 = vor.u32 %v5783_v19, %v4920_v20 }
 0x233   : > { %3299 = vmatpush.bf16.msrb.mxu2 %v4971_v50  ;;  %v5747_v27 = vld [vmem:[%s6095_s23 + $0x304] sm:$0xf]  ;;  %v4776_v29 = vld [vmem:[%s6095_s23 + $0x310] sm:$0xf0]  ;;  %v5067_v40 = vor.u32 %v5819_v23, %v5064_v24  ;;  %v5714_v23 = vld [vmem:[%s6095_s23 + $0x1f4] sm:$0xf0] }
 0x234   : > { %v5779_v30 = vld [vmem:[%s6095_s23 + $0x404] sm:$0xf]  ;;  %v4904_v31 = vld [vmem:[%s6095_s23 + $0x410] sm:$0xf0]  ;;  %v4779_v45 = vor.u32 %v5747_v27, %v4776_v29  ;;  %v5678_v27 = vld [vmem:[%s6095_s23 + $0xd4] sm:$0xf0] }
 0x235   : > { %3312 = vmatpush.bf16.msrb.mxu3 %v5099_v4  ;;  %v5851_v10 = vld [vmem:[%s6095_s23 + $0x644] sm:$0xf]  ;;  %v5192_v34 = vld [vmem:[%s6095_s23 + $0x650] sm:$0xf0]  ;;  %v4907_v49 = vor.u32 %v5779_v30, %v4904_v31  ;;  %v4510_v4 = vld [vmem:[%s6095_s23 + $0xe8] sm:$0xf] }
 0x236   : > { %3323 = vmatpush.bf16.msra.mxu1 %v5259_v48  ;;  %3287 = vmatpush.bf16.msrb.mxu0 %v4827_v58  ;;  %v5903_v35 = vld [vmem:[%s6095_s23 + $0x7e4] sm:$0xf]  ;;  %v5400_v38 = vld [vmem:[%s6095_s23 + $0x7f0] sm:$0xf0]  ;;  %v5195_v46 = vor.u32 %v5851_v10, %v5192_v34  ;;  %v2506_v48 = vunpack.c.h.b16 %v6868_v42  ;;  %v4511_v19 = vor.u32 %v5682_v5, %v4510_v4  ;;  %v5666_v4 = vld [vmem:[%s6095_s23 + $0x74] sm:$0xf0] }
 0x237   : > { %3300 = vmatpush.bf16.msrb.mxu2 %v4955_v61  ;;  %v5935_v39 = vld [vmem:[%s6095_s23 + $0x8e4] sm:$0xf]  ;;  %v5528_v41 = vld [vmem:[%s6095_s23 + $0x8f0] sm:$0xf0]  ;;  %v5403_v50 = vor.u32 %v5903_v35, %v5400_v38  ;;  %v4622_v38 = vld [vmem:[%s6095_s23 + $0x1c8] sm:$0xf] }
 0x238   : > { %v5815_v43 = vld [vmem:[%s6095_s23 + $0x524] sm:$0xf]  ;;  %v5048_v44 = vld [vmem:[%s6095_s23 + $0x530] sm:$0xf0]  ;;  %v5531_v53 = vor.u32 %v5935_v39, %v5528_v41  ;;  %v2802_v60 = vpack.c.b16 %v2506_v48, %v2506_v48  ;;  %v5710_v39 = vld [vmem:[%s6095_s23 + $0x1d4] sm:$0xf0] }
 0x239   : > { %3313 = vmatpush.bf16.msrb.mxu3 %v5083_v21  ;;  %v5847_v51 = vld [vmem:[%s6095_s23 + $0x624] sm:$0xf]  ;;  %v5176_v52 = vld [vmem:[%s6095_s23 + $0x630] sm:$0xf0]  ;;  %v5051_v56 = vor.u32 %v5815_v43, %v5048_v44  ;;  %v4638_v21 = vld [vmem:[%s6095_s23 + $0x1e8] sm:$0xf]  ;;  %v4623_v48 = vor.u32 %v5710_v39, %v4622_v38 }
 0x23a   : > { %3324 = vmatpush.bf16.msra.mxu1 %v5243_v59  ;;  %3288 = vmatpush.bf16.msrb.mxu0 %v4811_v7  ;;  %v5899_v47 = vld [vmem:[%s6095_s23 + $0x7c4] sm:$0xf]  ;;  %v5384_v54 = vld [vmem:[%s6095_s23 + $0x7d0] sm:$0xf0]  ;;  %v5179_v42 = vor.u32 %v5847_v51, %v5176_v52  ;;  %v4639_v31 = vor.u32 %v5714_v23, %v4638_v21  ;;  %v4478_v43 = vld [vmem:[%s6095_s23 + $0xa8] sm:$0xf] }
 0x23b   : > { %3301 = vmatpush.bf16.msrb.mxu2 %v4939_v13  ;;  %v5931_v55 = vld [vmem:[%s6095_s23 + $0x8c4] sm:$0xf]  ;;  %v5512_v57 = vld [vmem:[%s6095_s23 + $0x8d0] sm:$0xf0]  ;;  %v5387_v61 = vor.u32 %v5899_v47, %v5384_v54  ;;  %v3106_v13 = vsel %vm3101_vm11, %v2802_v60, 0 }
 0x23c   : > { %v5811_v58 = vld [vmem:[%s6095_s23 + $0x504] sm:$0xf]  ;;  %v5032_v59 = vld [vmem:[%s6095_s23 + $0x510] sm:$0xf0]  ;;  %v5515_v1 = vor.u32 %v5931_v55, %v5512_v57  ;;  %v5674_v44 = vld [vmem:[%s6095_s23 + $0xb4] sm:$0xf0] }
 0x23d   : > { %3314 = vmatpush.bf16.msrb.mxu3 %v5067_v40  ;;  %v5895_v62 = vld [vmem:[%s6095_s23 + $0x7a4] sm:$0xf]  ;;  %v5160_v0 = vld [vmem:[%s6095_s23 + $0x610] sm:$0xf0]  ;;  %v5035_v6 = vor.u32 %v5811_v58, %v5032_v59  ;;  %v4606_v52 = vld [vmem:[%s6095_s23 + $0x1a8] sm:$0xf] }
 0x23e   : > { %3325 = vmatpush.bf16.msra.mxu1 %v5227_v8  ;;  %3289 = vmatpush.bf16.msrb.mxu0 %v4795_v25  ;;  %v5843_v63 = vld [vmem:[%s6095_s23 + $0x604] sm:$0xf]  ;;  %v5368_v3 = vld [vmem:[%s6095_s23 + $0x7b0] sm:$0xf0]  ;;  %v4462_v55 = vld [vmem:[%s6095_s23 + $0x88] sm:$0xf] }
 0x23f   : > { %3302 = vmatpush.bf16.msrb.mxu2 %v4923_v28  ;;  %v5927_v7 = vld [vmem:[%s6095_s23 + $0x8a4] sm:$0xf]  ;;  %v5496_v8 = vld [vmem:[%s6095_s23 + $0x8b0] sm:$0xf0]  ;;  %v5163_v12 = vor.u32 %v5843_v63, %v5160_v0  ;;  %v5371_v18 = vor.u32 %v5895_v62, %v5368_v3  ;;  %v4590_v62 = vld [vmem:[%s6095_s23 + $0x188] sm:$0xf] }
 0x240   : > { %v5939_v14 = vld [vmem:[%s6095_s23 + $0x904] sm:$0xf]  ;;  %v5544_v15 = vld [vmem:[%s6095_s23 + $0x910] sm:$0xf0]  ;;  %v5499_v24 = vor.u32 %v5927_v7, %v5496_v8  ;;  %v5702_v63 = vld [vmem:[%s6095_s23 + $0x194] sm:$0xf0] }
 0x241   : > { %3315 = vmatpush.bf16.msrb.mxu3 %v5051_v56  ;;  %v5891_v20 = vld [vmem:[%s6095_s23 + $0x784] sm:$0xf]  ;;  %v5352_v25 = vld [vmem:[%s6095_s23 + $0x790] sm:$0xf0]  ;;  %v5547_v28 = vor.u32 %v5939_v14, %v5544_v15  ;;  %v5670_v56 = vld [vmem:[%s6095_s23 + $0x94] sm:$0xf0]  ;;  %v4591_v8 = vor.u32 %v5702_v63, %v4590_v62 }
 0x242   : > { %3326 = vmatpush.bf16.msra.mxu1 %v5211_v26  ;;  %3290 = vmatpush.bf16.msrb.mxu0 %v4779_v45  ;;  %v4494_v26 = vld [vmem:[%s6095_s23 + $0xc8] sm:$0xf]  ;;  %v5923_v29 = vld [vmem:[%s6095_s23 + $0x884] sm:$0xf]  ;;  %v5480_v30 = vld [vmem:[%s6095_s23 + $0x890] sm:$0xf0]  ;;  %v5355_v10 = vor.u32 %v5891_v20, %v5352_v25  ;;  %v4463_v60 = vor.u32 %v5670_v56, %v4462_v55 }
 0x243   : > { %3303 = vmatpush.bf16.msrb.mxu2 %v4907_v49  ;;  %v4495_v34 = vor.u32 %v5678_v27, %v4494_v26  ;;  %v5887_v35 = vld [vmem:[%s6095_s23 + $0x764] sm:$0xf]  ;;  %v5483_v40 = vor.u32 %v5923_v29, %v5480_v30  ;;  %v5336_v41 = vld [vmem:[%s6095_s23 + $0x770] sm:$0xf0]  ;;  %v4446_v3 = vld [vmem:[%s6095_s23 + $0x68] sm:$0xf] }
 0x244   : > { %v5919_v45 = vld [vmem:[%s6095_s23 + $0x864] sm:$0xf]  ;;  %v5339_v49 = vor.u32 %v5887_v35, %v5336_v41  ;;  %v5320_v54 = vld [vmem:[%s6095_s23 + $0x750] sm:$0xf0]  ;;  %v4574_v15 = vld [vmem:[%s6095_s23 + $0x168] sm:$0xf] }
 0x245   : > { %3291 = vmatmul.bf16.vlgmr.msrb.gmra.mxu0 %v6843_v16  ;;  %3316 = vmatpush.bf16.msrb.mxu3 %v5035_v6  ;;  %v5883_v51 = vld [vmem:[%s6095_s23 + $0x744] sm:$0xf]  ;;  %v5448_v58 = vld [vmem:[%s6095_s23 + $0x850] sm:$0xf0]  ;;  %v4430_v21 = vld [vmem:[%s6095_s23 + $0x48] sm:$0xf] }
 0x246   : > { %3327 = vmatpush.bf16.msra.mxu1 %v5195_v46  ;;  %3335 = vmatpush.bf16.msra.mxu0 %v5403_v50  ;;  %v5464_v46 = vld [vmem:[%s6095_s23 + $0x870] sm:$0xf0]  ;;  %v4479_v50 = vor.u32 %v5674_v44, %v4478_v43  ;;  %v5915_v57 = vld [vmem:[%s6095_s23 + $0x844] sm:$0xf]  ;;  %v5662_v23 = vld [vmem:[%s6095_s23 + $0x54] sm:$0xf0] }
 0x247   : > { %3348 = vmatpush.bf16.msra.mxu2 %v5531_v53  ;;  %v5706_v53 = vld [vmem:[%s6095_s23 + $0x1b4] sm:$0xf0]  ;;  %v5467_v47 = vor.u32 %v5919_v45, %v5464_v46  ;;  %v5451_v0 = vor.u32 %v5915_v57, %v5448_v58  ;;  %v5911_v5 = vld [vmem:[%s6095_s23 + $0x824] sm:$0xf]  ;;  %v5432_v6 = vld [vmem:[%s6095_s23 + $0x830] sm:$0xf0] }
 0x248   : > { %3304 = vmatmul.bf16.vlgmr.msrb.gmra.mxu2 %v6900_v33  ;;  %3317 = vmatmul.bf16.vlgmr.msrb.gmra.mxu3 %v6907_v37  ;;  %v4607_v59 = vor.u32 %v5706_v53, %v4606_v52  ;;  %v5875_v7 = vld [vmem:[%s6095_s23 + $0x704] sm:$0xf]  ;;  %v5288_v14 = vld [vmem:[%s6095_s23 + $0x710] sm:$0xf0]  ;;  %v4766_v25 = vld [vmem:[%s6095_s23 + $0x2e8] sm:$0xf] }
 0x249   : > { %3367 = vmatpush.bf16.msra.mxu3 %v3106_v13  ;;  %v4447_v13 = vor.u32 %v5666_v4, %v4446_v3  ;;  %v5907_v20 = vld [vmem:[%s6095_s23 + $0x804] sm:$0xf]  ;;  %v5746_v26 = vld [vmem:[%s6095_s23 + $0x2f4] sm:$0xf0]  ;;  %v4894_v27 = vld [vmem:[%s6095_s23 + $0x3e8] sm:$0xf] }
 0x24a   : > { %3328 = vmatpush.bf16.msra.mxu1 %v5179_v42  ;;  %3336 = vmatpush.bf16.msra.mxu0 %v5387_v61  ;;  %v5323_v42 = vor.u32 %v5883_v51, %v5320_v54  ;;  %v5879_v61 = vld [vmem:[%s6095_s23 + $0x724] sm:$0xf]  ;;  %v5778_v29 = vld [vmem:[%s6095_s23 + $0x3f4] sm:$0xf0]  ;;  %v4767_v38 = vor.u32 %v5746_v26, %v4766_v25  ;;  %v4414_v39 = vld [vmem:[%s6095_s23 + $0x28] sm:$0xf] }
 0x24b   : > { %3349 = vmatpush.bf16.msra.mxu2 %v5515_v1  ;;  %v5304_v1 = vld [vmem:[%s6095_s23 + $0x730] sm:$0xf0]  ;;  %v4895_v41 = vor.u32 %v5778_v29, %v4894_v27  ;;  %v4750_v43 = vld [vmem:[%s6095_s23 + $0x2c8] sm:$0xf]  ;;  %v5742_v44 = vld [vmem:[%s6095_s23 + $0x2d4] sm:$0xf0] }
 0x24c   : > { %v4878_v45 = vld [vmem:[%s6095_s23 + $0x3c8] sm:$0xf]  ;;  %v5774_v46 = vld [vmem:[%s6095_s23 + $0x3d4] sm:$0xf0]  ;;  %v4751_v52 = vor.u32 %v5742_v44, %v4750_v43 }
 0x24d   : > { %3368 = vmatpush.bf16.msra.mxu3 %v5547_v28  ;;  %v5291_v28 = vor.u32 %v5875_v7, %v5288_v14  ;;  %v5690_v51 = vld [vmem:[%s6095_s23 + $0x134] sm:$0xf0]  ;;  %v4734_v53 = vld [vmem:[%s6095_s23 + $0x2a8] sm:$0xf]  ;;  %v4879_v55 = vor.u32 %v5774_v46, %v4878_v45 }
 0x24e   : > { %3329 = vmatpush.bf16.msra.mxu1 %v5163_v12  ;;  %3337 = vmatpush.bf16.msra.mxu0 %v5371_v18  ;;  %v5307_v12 = vor.u32 %v5879_v61, %v5304_v1  ;;  %v5698_v18 = vld [vmem:[%s6095_s23 + $0x174] sm:$0xf0]  ;;  %v5022_v57 = vld [vmem:[%s6095_s23 + $0x4e8] sm:$0xf] }
 0x24f   : > { %3350 = vmatpush.bf16.msra.mxu2 %v5499_v24  ;;  %v5416_v24 = vld [vmem:[%s6095_s23 + $0x810] sm:$0xf0]  ;;  %v4575_v30 = vor.u32 %v5698_v18, %v4574_v15  ;;  %v5654_v54 = vld [vmem:[%s6095_s23 + $0x14] sm:$0xf0]  ;;  %v4526_v62 = vld [vmem:[%s6095_s23 + $0x108] sm:$0xf] }
 0x250   : > { %v5419_v35 = vor.u32 %v5907_v20, %v5416_v24  ;;  %v5738_v56 = vld [vmem:[%s6095_s23 + $0x2b4] sm:$0xf0]  ;;  %v4718_v3 = vld [vmem:[%s6095_s23 + $0x288] sm:$0xf] }
 0x251   : > { %3330 = vmatmul.bf16.vlgmr.msra.gmra.mxu1 %v6893_v22  ;;  %3387 = vmatpush.bf16.msrb.mxu3 %v4639_v31  ;;  %v4431_v31 = vor.u32 %v5662_v23, %v4430_v21  ;;  %v5810_v58 = vld [vmem:[%s6095_s23 + $0x4f4] sm:$0xf0]  ;;  %v5150_v4 = vld [vmem:[%s6095_s23 + $0x5e8] sm:$0xf] }
 0x252   : > { %3374 = vmatpush.bf16.msrb.mxu1 %v4511_v19  ;;  %3338 = vmatpush.bf16.msra.mxu0 %v5355_v10  ;;  %v5435_v19 = vor.u32 %v5911_v5, %v5432_v6  ;;  %v4558_v10 = vld [vmem:[%s6095_s23 + $0x148] sm:$0xf]  ;;  %v5686_v63 = vld [vmem:[%s6095_s23 + $0x114] sm:$0xf0]  ;;  %v5023_v1 = vor.u32 %v5810_v58, %v5022_v57 }
 0x253   : > { %3351 = vmatpush.bf16.msra.mxu2 %v5483_v40  ;;  %v5658_v40 = vld [vmem:[%s6095_s23 + $0x34] sm:$0xf0]  ;;  %v4527_v15 = vor.u32 %v5686_v63, %v4526_v62  ;;  %v4702_v21 = vld [vmem:[%s6095_s23 + $0x268] sm:$0xf] }
 0x254   : > { %v5842_v5 = vld [vmem:[%s6095_s23 + $0x5f4] sm:$0xf0]  ;;  %v5134_v23 = vld [vmem:[%s6095_s23 + $0x5c8] sm:$0xf] }
 0x255   : > { %3388 = vmatpush.bf16.msrb.mxu3 %v4623_v48  ;;  %v5734_v7 = vld [vmem:[%s6095_s23 + $0x294] sm:$0xf0]  ;;  %v5151_v18 = vor.u32 %v5842_v5, %v5150_v4  ;;  %v4990_v27 = vld [vmem:[%s6095_s23 + $0x4a8] sm:$0xf] }
 0x256   : > { %3375 = vmatpush.bf16.msrb.mxu1 %v4495_v34  ;;  %3339 = vmatpush.bf16.msra.mxu0 %v5339_v49  ;;  %v5694_v34 = vld [vmem:[%s6095_s23 + $0x154] sm:$0xf0]  ;;  %v4415_v49 = vor.u32 %v5658_v40, %v4414_v39  ;;  %v4974_v43 = vld [vmem:[%s6095_s23 + $0x488] sm:$0xf] }
 0x257   : > { %3352 = vmatpush.bf16.msra.mxu2 %v5467_v47  ;;  %v4559_v48 = vor.u32 %v5694_v34, %v4558_v10  ;;  %v4398_v47 = vld [vmem:[%s6095_s23 + $0x8] sm:$0xf]  ;;  %v5766_v14 = vld [vmem:[%s6095_s23 + $0x394] sm:$0xf0] }
 0x258   : > { %5557 = vmatmul.msk.bf16.vlgmr.msra.gmra.mxu3 %vm3097_vm12, %v6946_v32  ;;  %v4399_v61 = vor.u32 %v5654_v54, %v4398_v47  ;;  %v5838_v24 = vld [vmem:[%s6095_s23 + $0x5d4] sm:$0xf0]  ;;  %v4814_v45 = vld [vmem:[%s6095_s23 + $0x348] sm:$0xf] }
 0x259   : > { %3389 = vmatpush.bf16.msrb.mxu3 %v4607_v59  ;;  %v4862_v59 = vld [vmem:[%s6095_s23 + $0x3a8] sm:$0xf]  ;;  %v5730_v26 = vld [vmem:[%s6095_s23 + $0x274] sm:$0xf0] }
 0x25a   : > { %3376 = vmatpush.bf16.msrb.mxu1 %v4479_v50  ;;  %3340 = vmatpush.bf16.msra.mxu0 %v5323_v42  ;;  %v4542_v50 = vld [vmem:[%s6095_s23 + $0x128] sm:$0xf]  ;;  %v5770_v42 = vld [vmem:[%s6095_s23 + $0x3b4] sm:$0xf0]  ;;  %v4703_v10 = vor.u32 %v5730_v26, %v4702_v21 }
 0x25b   : > { %3353 = vmatpush.bf16.msra.mxu2 %v5451_v0  ;;  %v4735_v0 = vor.u32 %v5738_v56, %v4734_v53  ;;  %v4863_v6 = vor.u32 %v5770_v42, %v4862_v59  ;;  %v5802_v29 = vld [vmem:[%s6095_s23 + $0x4b4] sm:$0xf0]  ;;  %v4798_v57 = vld [vmem:[%s6095_s23 + $0x328] sm:$0xf] }
 0x25c   : > { %v4991_v34 = vor.u32 %v5802_v29, %v4990_v27  ;;  %v5834_v39 = vld [vmem:[%s6095_s23 + $0x5b4] sm:$0xf0]  ;;  %v4654_v59 = vld [vmem:[%s6095_s23 + $0x208] sm:$0xf] }
 0x25d   : > { %3390 = vmatpush.bf16.msrb.mxu3 %v4591_v8  ;;  %v5006_v8 = vld [vmem:[%s6095_s23 + $0x4c8] sm:$0xf]  ;;  %v5798_v44 = vld [vmem:[%s6095_s23 + $0x494] sm:$0xf0] }
 0x25e   : > { %3377 = vmatpush.bf16.msrb.mxu1 %v4463_v60  ;;  %3341 = vmatpush.bf16.msra.mxu0 %v5307_v12  ;;  %v4543_v60 = vor.u32 %v5690_v51, %v4542_v50  ;;  %v5806_v12 = vld [vmem:[%s6095_s23 + $0x4d4] sm:$0xf0]  ;;  %v4975_v50 = vor.u32 %v5798_v44, %v4974_v43  ;;  %v4670_v51 = vld [vmem:[%s6095_s23 + $0x228] sm:$0xf] }
 0x25f   : > { %3354 = vmatpush.bf16.msra.mxu2 %v5435_v19  ;;  %v4719_v19 = vor.u32 %v5734_v7, %v4718_v3  ;;  %v5007_v20 = vor.u32 %v5806_v12, %v5006_v8  ;;  %v5758_v46 = vld [vmem:[%s6095_s23 + $0x354] sm:$0xf0]  ;;  %v5086_v63 = vld [vmem:[%s6095_s23 + $0x568] sm:$0xf] }
 0x260   : > { %v5830_v53 = vld [vmem:[%s6095_s23 + $0x594] sm:$0xf0]  ;;  %v4815_v47 = vor.u32 %v5758_v46, %v4814_v45  ;;  %v4782_v3 = vld [vmem:[%s6095_s23 + $0x308] sm:$0xf] }
 0x261   : > { %3391 = vmatpush.bf16.msrb.mxu3 %v4575_v30  ;;  %v4830_v30 = vld [vmem:[%s6095_s23 + $0x368] sm:$0xf]  ;;  %v5722_v54 = vld [vmem:[%s6095_s23 + $0x234] sm:$0xf0] }
 0x262   : > { %3378 = vmatpush.bf16.msrb.mxu1 %v4447_v13  ;;  %3342 = vmatpush.bf16.msra.mxu0 %v5291_v28  ;;  %v4846_v13 = vld [vmem:[%s6095_s23 + $0x388] sm:$0xf]  ;;  %v5762_v28 = vld [vmem:[%s6095_s23 + $0x374] sm:$0xf0] }
 0x263   : > { %3355 = vmatpush.bf16.msra.mxu2 %v5419_v35  ;;  %v4847_v25 = vor.u32 %v5766_v14, %v4846_v13  ;;  %v4686_v35 = vld [vmem:[%s6095_s23 + $0x248] sm:$0xf]  ;;  %v4831_v40 = vor.u32 %v5762_v28, %v4830_v30  ;;  %v5794_v56 = vld [vmem:[%s6095_s23 + $0x474] sm:$0xf0] }
 0x264   : > { %v5754_v58 = vld [vmem:[%s6095_s23 + $0x334] sm:$0xf0]  ;;  %v4942_v4 = vld [vmem:[%s6095_s23 + $0x448] sm:$0xf] }
 0x265   : > { %3343 = vmatmul.bf16.vlgmr.msra.gmra.mxu0 %v6905_v36  ;;  %3392 = vmatpush.bf16.msrb.mxu3 %v4559_v48  ;;  %v5718_v62 = vld [vmem:[%s6095_s23 + $0x214] sm:$0xf0]  ;;  %v5278_v8 = vld [vmem:[%s6095_s23 + $0x6e8] sm:$0xf] }
 0x266   : > { %3379 = vmatpush.bf16.msrb.mxu1 %v4431_v31  ;;  %3400 = vmatpush.bf16.msrb.mxu0 %v4767_v38  ;;  %v5135_v31 = vor.u32 %v5838_v24, %v5134_v23  ;;  %v5118_v38 = vld [vmem:[%s6095_s23 + $0x5a8] sm:$0xf]  ;;  %v5790_v5 = vld [vmem:[%s6095_s23 + $0x454] sm:$0xf0] }
 0x267   : > { %3413 = vmatpush.bf16.msrb.mxu2 %v4895_v41  ;;  %v5726_v41 = vld [vmem:[%s6095_s23 + $0x254] sm:$0xf0]  ;;  %v5119_v48 = vor.u32 %v5834_v39, %v5118_v38  ;;  %v5406_v13 = vld [vmem:[%s6095_s23 + $0x7e8] sm:$0xf]  ;;  %v4943_v21 = vor.u32 %v5790_v5, %v4942_v4 }
 0x268   : > { %3356 = vmatmul.bf16.vlgmr.msra.gmra.mxu2 %v6969_v2  ;;  %v5750_v7 = vld [vmem:[%s6095_s23 + $0x314] sm:$0xf0]  ;;  %v5070_v23 = vld [vmem:[%s6095_s23 + $0x548] sm:$0xf] }
 0x269   : > { %3393 = vmatpush.bf16.msrb.mxu3 %v4543_v60  ;;  %v4671_v60 = vor.u32 %v5722_v54, %v4670_v51  ;;  %v5874_v12 = vld [vmem:[%s6095_s23 + $0x6f4] sm:$0xf0]  ;;  %v4926_v27 = vld [vmem:[%s6095_s23 + $0x428] sm:$0xf] }
 0x26a   : > { %3380 = vmatpush.bf16.msrb.mxu1 %v4415_v49  ;;  %3401 = vmatpush.bf16.msrb.mxu0 %v4751_v52  ;;  %v4687_v49 = vor.u32 %v5726_v41, %v4686_v35  ;;  %v5102_v52 = vld [vmem:[%s6095_s23 + $0x588] sm:$0xf]  ;;  %v5906_v14 = vld [vmem:[%s6095_s23 + $0x7f4] sm:$0xf0]  ;;  %v5279_v26 = vor.u32 %v5874_v12, %v5278_v8 }
 0x26b   : > { %3414 = vmatpush.bf16.msrb.mxu2 %v4879_v55  ;;  %v4958_v55 = vld [vmem:[%s6095_s23 + $0x468] sm:$0xf]  ;;  %v5103_v42 = vor.u32 %v5830_v53, %v5102_v52  ;;  %v5822_v24 = vld [vmem:[%s6095_s23 + $0x554] sm:$0xf0]  ;;  %v5407_v30 = vor.u32 %v5906_v14, %v5406_v13 }
 0x26c   : > { %v5786_v29 = vld [vmem:[%s6095_s23 + $0x434] sm:$0xf0]  ;;  %v5262_v28 = vld [vmem:[%s6095_s23 + $0x6c8] sm:$0xf]  ;;  %v5071_v39 = vor.u32 %v5822_v24, %v5070_v23 }
 0x26d   : > { %3394 = vmatpush.bf16.msrb.mxu3 %v4527_v15  ;;  %v5390_v35 = vld [vmem:[%s6095_s23 + $0x7c8] sm:$0xf]  ;;  %v5902_v38 = vld [vmem:[%s6095_s23 + $0x7d4] sm:$0xf0]  ;;  %v4927_v41 = vor.u32 %v5786_v29, %v4926_v27 }
 0x26e   : > { %3381 = vmatpush.bf16.msrb.mxu1 %v4399_v61  ;;  %3402 = vmatpush.bf16.msrb.mxu0 %v4735_v0  ;;  %v4959_v61 = vor.u32 %v5794_v56, %v4958_v55  ;;  %v5826_v0 = vld [vmem:[%s6095_s23 + $0x574] sm:$0xf0]  ;;  %v5054_v43 = vld [vmem:[%s6095_s23 + $0x528] sm:$0xf]  ;;  %v5391_v52 = vor.u32 %v5902_v38, %v5390_v35 }
 0x26f   : > { %3415 = vmatpush.bf16.msrb.mxu2 %v4863_v6  ;;  %v5818_v44 = vld [vmem:[%s6095_s23 + $0x534] sm:$0xf0]  ;;  %v5534_v55 = vld [vmem:[%s6095_s23 + $0x8e8] sm:$0xf] }
 0x270   : > { %3395 = vmatmul.bf16.vlgmr.msrb.gmra.mxu3 %v6845_v17  ;;  %v5866_v54 = vld [vmem:[%s6095_s23 + $0x6b4] sm:$0xf0]  ;;  %v5358_v12 = vld [vmem:[%s6095_s23 + $0x788] sm:$0xf] }
 0x271   : > { %3382 = vmatmul.bf16.vlgmr.msrb.gmra.mxu1 %v6839_v11  ;;  %3439 = vmatpush.bf16.msra.mxu3 %v5151_v18  ;;  %v3123_v6 = vpop.f32.mrf.mxu0  ;;  %v5087_v18 = vor.u32 %v5826_v0, %v5086_v63  ;;  %v5938_v56 = vld [vmem:[%s6095_s23 + $0x8f4] sm:$0xf0]  ;;  %v5550_v24 = vld [vmem:[%s6095_s23 + $0x908] sm:$0xf] }
 0x272   : > { %3426 = vmatpush.bf16.msra.mxu1 %v5023_v1  ;;  %3403 = vmatpush.bf16.msrb.mxu0 %v4719_v19  ;;  %v4799_v1 = vor.u32 %v5754_v58, %v4798_v57  ;;  %v3136_v15 = vpop.f32.mrf.mxu1  ;;  %v4655_v19 = vor.u32 %v5718_v62, %v4654_v59  ;;  %v5374_v57 = vld [vmem:[%s6095_s23 + $0x7a8] sm:$0xf]  ;;  %v5898_v58 = vld [vmem:[%s6095_s23 + $0x7b4] sm:$0xf0]  ;;  %v5535_v0 = vor.u32 %v5938_v56, %v5534_v55 }
 0x273   : > { %3416 = vmatpush.bf16.msrb.mxu2 %v4847_v25  ;;  %v4783_v25 = vor.u32 %v5750_v7, %v4782_v3  ;;  %v5814_v62 = vld [vmem:[%s6095_s23 + $0x514] sm:$0xf0]  ;;  %v5375_v4 = vor.u32 %v5898_v58, %v5374_v57  ;;  %v5342_v27 = vld [vmem:[%s6095_s23 + $0x768] sm:$0xf] }
 0x274   : > { %v5862_v5 = vld [vmem:[%s6095_s23 + $0x694] sm:$0xf0]  ;;  %v5502_v29 = vld [vmem:[%s6095_s23 + $0x8a8] sm:$0xf] }
 0x275   : > { %3440 = vmatpush.bf16.msra.mxu3 %v5135_v31  ;;  %v5870_v31 = vld [vmem:[%s6095_s23 + $0x6d4] sm:$0xf0]  ;;  %v5182_v57 = vld [vmem:[%s6095_s23 + $0x628] sm:$0xf] }
 0x276   : > { %3427 = vmatpush.bf16.msra.mxu1 %v5007_v20  ;;  %3404 = vmatpush.bf16.msrb.mxu0 %v4703_v10  ;;  %v3137_v20 = vadd.f32 %v3136_v15, %v3123_v6  ;;  %v7179_v10 = vld [vmem:[%s6095_s23 + $0x928] sm:$0xff]  ;;  %v5263_v45 = vor.u32 %v5870_v31, %v5262_v28  ;;  %v5934_v7 = vld [vmem:[%s6095_s23 + $0x8d4] sm:$0xf0] }
 0x277   : > { %3417 = vmatpush.bf16.msrb.mxu2 %v4831_v40  ;;  %v2507_v51 = vunpack.c.l.b16 %v7179_v10  ;;  %v5518_v6 = vld [vmem:[%s6095_s23 + $0x8c8] sm:$0xf]  ;;  %v5894_v13 = vld [vmem:[%s6095_s23 + $0x794] sm:$0xf0]  ;;  %v5744_v31 = vld [vmem:[%s6095_s23 + $0x2ec] sm:$0xf] }
 0x278   : > { %v3162_v46 = vpop.f32.mrf.mxu3  ;;  %v5214_v15 = vld [vmem:[%s6095_s23 + $0x668] sm:$0xf]  ;;  %v5890_v28 = vld [vmem:[%s6095_s23 + $0x774] sm:$0xf0] }
 0x279   : > { %3441 = vmatpush.bf16.msra.mxu3 %v5119_v48  ;;  %v5246_v48 = vld [vmem:[%s6095_s23 + $0x6a8] sm:$0xf]  ;;  %v2803_v3 = vpack.c.b16 %v2507_v51, %v2507_v51  ;;  %v5740_v51 = vld [vmem:[%s6095_s23 + $0x2cc] sm:$0xf]  ;;  %v5850_v58 = vld [vmem:[%s6095_s23 + $0x634] sm:$0xf0] }
 0x27a   : > { %3428 = vmatpush.bf16.msra.mxu1 %v4991_v34  ;;  %3405 = vmatpush.bf16.msrb.mxu0 %v4687_v49  ;;  %v3149_v34 = vpop.f32.mrf.mxu2  ;;  %v4910_v49 = vld [vmem:[%s6095_s23 + $0x408] sm:$0xf]  ;;  %v3138_v59 = vpop.f32.mrf.mxu1  ;;  %v5247_v63 = vor.u32 %v5866_v54, %v5246_v48 }
 0x27b   : > { %3418 = vmatpush.bf16.msrb.mxu2 %v4815_v47  ;;  %v3150_v40 = vadd.f32 %v3149_v34, %v3137_v20  ;;  %v3125_v47 = vpop.f32.mrf.mxu0  ;;  %v3109_v23 = vsel %vm3101_vm11, %v2803_v3, 0  ;;  %v4768_v34 = vld [vmem:[%s6095_s23 + $0x2f8] sm:$0xf0] }
 0x27c   : > { %v4771_v48 = vor.u32 %v5744_v31, %v4768_v34  ;;  %v4736_v3 = vld [vmem:[%s6095_s23 + $0x2b8] sm:$0xf0]  ;;  %v5732_v31 = vld [vmem:[%s6095_s23 + $0x28c] sm:$0xf] }
 0x27d   : > { %3442 = vmatpush.bf16.msra.mxu3 %v5103_v42  ;;  %v7189_v53 = vadd.f32 %v3162_v46, %v3150_v40  ;;  %v5055_v42 = vor.u32 %v5818_v44, %v5054_v43  ;;  %v5198_v40 = vld [vmem:[%s6095_s23 + $0x648] sm:$0xf]  ;;  %v5343_v43 = vor.u32 %v5890_v28, %v5342_v27  ;;  %v5926_v46 = vld [vmem:[%s6095_s23 + $0x894] sm:$0xf0]  ;;  %v4640_v27 = vld [vmem:[%s6095_s23 + $0x1f8] sm:$0xf0] }
 0x27e   : > { %3429 = vmatpush.bf16.msra.mxu1 %v4975_v50  ;;  %3406 = vmatpush.bf16.msrb.mxu0 %v4671_v60  ;;  %v5782_v50 = vld [vmem:[%s6095_s23 + $0x414] sm:$0xf0]  ;;  %v5326_v44 = vld [vmem:[%s6095_s23 + $0x748] sm:$0xf]  ;;  %v4720_v34 = vld [vmem:[%s6095_s23 + $0x298] sm:$0xf0] }
 0x27f   : > { %3419 = vmatpush.bf16.msrb.mxu2 %v4799_v1  ;;  %v4911_v60 = vor.u32 %v5782_v50, %v4910_v49  ;;  %v5230_v1 = vld [vmem:[%s6095_s23 + $0x688] sm:$0xf]  ;;  %v5886_v50 = vld [vmem:[%s6095_s23 + $0x754] sm:$0xf0] }
 0x280   : > { %v3164_v20 = vpop.f32.mrf.mxu3 }
 0x281   : > { %3443 = vmatpush.bf16.msra.mxu3 %v5087_v18  ;;  %v5858_v18 = vld [vmem:[%s6095_s23 + $0x674] sm:$0xf0] }
 0x282   : > { %3430 = vmatpush.bf16.msra.mxu1 %v4959_v61  ;;  %3407 = vmatpush.bf16.msrb.mxu0 %v4655_v19  ;;  %v5038_v61 = vld [vmem:[%s6095_s23 + $0x508] sm:$0xf]  ;;  %v3151_v8 = vpop.f32.mrf.mxu2  ;;  %v5231_v19 = vor.u32 %v5862_v5, %v5230_v1  ;;  %v5215_v38 = vor.u32 %v5858_v18, %v5214_v15  ;;  %v5736_v1 = vld [vmem:[%s6095_s23 + $0x2ac] sm:$0xf]  ;;  %v5183_v5 = vor.u32 %v5850_v58, %v5182_v57  ;;  %v5918_v18 = vld [vmem:[%s6095_s23 + $0x854] sm:$0xf0] }
 0x283   : > { %3420 = vmatpush.bf16.msrb.mxu2 %v4783_v25  ;;  %v5039_v14 = vor.u32 %v5814_v62, %v5038_v61  ;;  %v5942_v25 = vld [vmem:[%s6095_s23 + $0x914] sm:$0xf0]  ;;  %v5470_v61 = vld [vmem:[%s6095_s23 + $0x868] sm:$0xf] }
 0x284   : > { %v5551_v35 = vor.u32 %v5942_v25, %v5550_v24  ;;  %v5922_v62 = vld [vmem:[%s6095_s23 + $0x874] sm:$0xf0]  ;;  %v5454_v15 = vld [vmem:[%s6095_s23 + $0x848] sm:$0xf]  ;;  %v4512_v24 = vld [vmem:[%s6095_s23 + $0xf8] sm:$0xf0] }
 0x285   : > { %3444 = vmatpush.bf16.msra.mxu3 %v5071_v39  ;;  %3408 = vmatmul.bf16.vlgmr.msrb.gmra.mxu0 %v6837_v9  ;;  %v3175_v49 = vpop.f32.mrf.mxu0  ;;  %v5846_v8 = vld [vmem:[%s6095_s23 + $0x614] sm:$0xf0]  ;;  %v5455_v28 = vor.u32 %v5918_v18, %v5454_v15  ;;  %v4592_v15 = vld [vmem:[%s6095_s23 + $0x198] sm:$0xf0] }
 0x286   : > { %3431 = vmatpush.bf16.msra.mxu1 %v4943_v21  ;;  %3452 = vmatpush.bf16.msra.mxu0 %v5279_v26  ;;  %v5519_v21 = vor.u32 %v5934_v7, %v5518_v6  ;;  %v5359_v26 = vor.u32 %v5894_v13, %v5358_v12  ;;  %v3176_v47 = vadd.f32 %v3175_v49, %v7189_v53  ;;  %v3188_v54 = vpop.f32.mrf.mxu1  ;;  %v5166_v7 = vld [vmem:[%s6095_s23 + $0x608] sm:$0xf] }
 0x287   : > { %3465 = vmatpush.bf16.msra.mxu2 %v5407_v30  ;;  %v5930_v30 = vld [vmem:[%s6095_s23 + $0x8b4] sm:$0xf0]  ;;  %v5471_v6 = vor.u32 %v5922_v62, %v5470_v61  ;;  %v4723_v49 = vor.u32 %v5732_v31, %v4720_v34  ;;  %v5704_v61 = vld [vmem:[%s6095_s23 + $0x1ac] sm:$0xf]  ;;  %v4608_v62 = vld [vmem:[%s6095_s23 + $0x1b8] sm:$0xf0] }
 0x288   : > { %3421 = vmatmul.bf16.vlgmr.msrb.gmra.mxu2 %v6843_v16  ;;  %v5503_v39 = vor.u32 %v5930_v30, %v5502_v29  ;;  %v3189_v59 = vadd.f32 %v3188_v54, %v3176_v47  ;;  %v5167_v30 = vor.u32 %v5846_v8, %v5166_v7  ;;  %v5672_v54 = vld [vmem:[%s6095_s23 + $0xac] sm:$0xf]  ;;  %v4611_v7 = vor.u32 %v5704_v61, %v4608_v62  ;;  %v4464_v8 = vld [vmem:[%s6095_s23 + $0x98] sm:$0xf0] }
 0x289   : > { %3445 = vmatpush.bf16.msra.mxu3 %v5055_v42  ;;  %v5327_v42 = vor.u32 %v5886_v50, %v5326_v44  ;;  %v4496_v44 = vld [vmem:[%s6095_s23 + $0xd8] sm:$0xf0] }
 0x28a   : > { %3432 = vmatpush.bf16.msra.mxu1 %v4927_v41  ;;  %3453 = vmatpush.bf16.msra.mxu0 %v5263_v45  ;;  %v5854_v41 = vld [vmem:[%s6095_s23 + $0x654] sm:$0xf0]  ;;  %v5486_v45 = vld [vmem:[%s6095_s23 + $0x888] sm:$0xf]  ;;  %v4576_v31 = vld [vmem:[%s6095_s23 + $0x178] sm:$0xf0] }
 0x28b   : > { %3466 = vmatpush.bf16.msra.mxu2 %v5391_v52  ;;  %v4752_v52 = vld [vmem:[%s6095_s23 + $0x2d8] sm:$0xf0]  ;;  %v5199_v55 = vor.u32 %v5854_v41, %v5198_v40  ;;  %v5487_v56 = vor.u32 %v5926_v46, %v5486_v45  ;;  %v5914_v40 = vld [vmem:[%s6095_s23 + $0x834] sm:$0xf0]  ;;  %v5708_v46 = vld [vmem:[%s6095_s23 + $0x1cc] sm:$0xf] }
 0x28c   : > { %v4755_v53 = vor.u32 %v5740_v51, %v4752_v52  ;;  %v5728_v51 = vld [vmem:[%s6095_s23 + $0x26c] sm:$0xf]  ;;  %v4704_v52 = vld [vmem:[%s6095_s23 + $0x278] sm:$0xf0] }
 0x28d   : > { %3446 = vmatpush.bf16.msra.mxu3 %v5039_v14  ;;  %v5294_v14 = vld [vmem:[%s6095_s23 + $0x708] sm:$0xf]  ;;  %v3177_v25 = vpop.f32.mrf.mxu0  ;;  %v4416_v62 = vld [vmem:[%s6095_s23 + $0x38] sm:$0xf0] }
 0x28e   : > { %3433 = vmatpush.bf16.msra.mxu1 %v4911_v60  ;;  %3454 = vmatpush.bf16.msra.mxu0 %v5247_v63  ;;  %v5310_v60 = vld [vmem:[%s6095_s23 + $0x728] sm:$0xf]  ;;  %v3201_v63 = vpop.f32.mrf.mxu2  ;;  %v3214_v12 = vpop.f32.mrf.mxu3  ;;  %v5664_v25 = vld [vmem:[%s6095_s23 + $0x6c] sm:$0xf] }
 0x28f   : > { %3467 = vmatpush.bf16.msra.mxu2 %v5375_v4  ;;  %v3202_v4 = vadd.f32 %v3201_v63, %v3189_v59  ;;  %v3190_v29 = vpop.f32.mrf.mxu1  ;;  %v4480_v59 = vld [vmem:[%s6095_s23 + $0xb8] sm:$0xf0]  ;;  %v4707_v63 = vor.u32 %v5728_v51, %v4704_v52  ;;  %v5764_v51 = vld [vmem:[%s6095_s23 + $0x38c] sm:$0xf] }
 0x290   : > { %3447 = vmatmul.bf16.vlgmr.msra.gmra.mxu3 %v6907_v37  ;;  %v5768_v29 = vld [vmem:[%s6095_s23 + $0x3ac] sm:$0xf]  ;;  %v4848_v52 = vld [vmem:[%s6095_s23 + $0x398] sm:$0xf0] }
 0x291   : > { %3434 = vmatmul.bf16.vlgmr.msra.gmra.mxu1 %v6900_v33  ;;  %3497 = vmatpush.bf16.msrb.mxu3 %v3109_v23  ;;  %v7241_v20 = vadd.f32 %v3214_v12, %v3202_v4  ;;  %v5680_v23 = vld [vmem:[%s6095_s23 + $0xec] sm:$0xf]  ;;  %v4483_v4 = vor.u32 %v5672_v54, %v4480_v59  ;;  %v4560_v54 = vld [vmem:[%s6095_s23 + $0x158] sm:$0xf0] }
 0x292   : > { %3478 = vmatpush.bf16.msrb.mxu1 %v5535_v0  ;;  %3455 = vmatpush.bf16.msra.mxu0 %v5231_v19  ;;  %v5882_v0 = vld [vmem:[%s6095_s23 + $0x734] sm:$0xf0]  ;;  %v4739_v19 = vor.u32 %v5736_v1, %v4736_v3  ;;  %v5724_v1 = vld [vmem:[%s6095_s23 + $0x24c] sm:$0xf]  ;;  %v4688_v3 = vld [vmem:[%s6095_s23 + $0x258] sm:$0xf0] }
 0x293   : > { %3468 = vmatpush.bf16.msra.mxu2 %v5359_v26  ;;  %v5311_v13 = vor.u32 %v5882_v0, %v5310_v60  ;;  %v5712_v26 = vld [vmem:[%s6095_s23 + $0x1ec] sm:$0xf]  ;;  %v4896_v60 = vld [vmem:[%s6095_s23 + $0x3f8] sm:$0xf0]  ;;  %v4691_v18 = vor.u32 %v5724_v1, %v4688_v3 }
 0x294   : > { %v4643_v41 = vor.u32 %v5712_v26, %v4640_v27  ;;  %v5772_v12 = vld [vmem:[%s6095_s23 + $0x3cc] sm:$0xf]  ;;  %v4448_v27 = vld [vmem:[%s6095_s23 + $0x78] sm:$0xf0] }
 0x295   : > { %3498 = vmatpush.bf16.msrb.mxu3 %v5551_v35  ;;  %v5656_v59 = vld [vmem:[%s6095_s23 + $0x2c] sm:$0xf]  ;;  %v4544_v1 = vld [vmem:[%s6095_s23 + $0x138] sm:$0xf0] }
 0x296   : > { %3479 = vmatpush.bf16.msrb.mxu1 %v5519_v21  ;;  %3456 = vmatpush.bf16.msra.mxu0 %v5215_v38  ;;  %v5878_v21 = vld [vmem:[%s6095_s23 + $0x714] sm:$0xf0]  ;;  %v4515_v38 = vor.u32 %v5680_v23, %v4512_v24  ;;  %v3203_v45 = vpop.f32.mrf.mxu2  ;;  %v3216_v57 = vpop.f32.mrf.mxu3 }
 0x297   : > { %3469 = vmatpush.bf16.msra.mxu2 %v5343_v43  ;;  %v5295_v35 = vor.u32 %v5878_v21, %v5294_v14  ;;  %v5676_v43 = vld [vmem:[%s6095_s23 + $0xcc] sm:$0xf]  ;;  %v4672_v21 = vld [vmem:[%s6095_s23 + $0x238] sm:$0xf0] }
 0x298   : > { %v4499_v47 = vor.u32 %v5676_v43, %v4496_v44  ;;  %v5700_v14 = vld [vmem:[%s6095_s23 + $0x18c] sm:$0xf]  ;;  %v4451_v43 = vor.u32 %v5664_v25, %v4448_v27 }
 0x299   : > { %3530 = vmatpush.bf16.msra.mxu3 %v4771_v48  ;;  %v4624_v48 = vld [vmem:[%s6095_s23 + $0x1d8] sm:$0xf0]  ;;  %v4595_v26 = vor.u32 %v5700_v14, %v4592_v15  ;;  %v5660_v45 = vld [vmem:[%s6095_s23 + $0x4c] sm:$0xf] }
 0x29a   : > { %3480 = vmatpush.bf16.msrb.mxu1 %v5503_v39  ;;  %3457 = vmatpush.bf16.msra.mxu0 %v5199_v55  ;;  %v5438_v39 = vld [vmem:[%s6095_s23 + $0x828] sm:$0xf]  ;;  %v4627_v58 = vor.u32 %v5708_v46, %v4624_v48  ;;  %v5872_v46 = vld [vmem:[%s6095_s23 + $0x6ec] sm:$0xf]  ;;  %v5280_v48 = vld [vmem:[%s6095_s23 + $0x6f8] sm:$0xf0] }
 0x29b   : > { %3470 = vmatpush.bf16.msra.mxu2 %v5327_v42  ;;  %v5439_v50 = vor.u32 %v5914_v40, %v5438_v39  ;;  %v5422_v55 = vld [vmem:[%s6095_s23 + $0x808] sm:$0xf]  ;;  %v5776_v42 = vld [vmem:[%s6095_s23 + $0x3ec] sm:$0xf]  ;;  %v4656_v40 = vld [vmem:[%s6095_s23 + $0x218] sm:$0xf0] }
 0x29c   : > { %v5716_v39 = vld [vmem:[%s6095_s23 + $0x20c] sm:$0xf]  ;;  %v5248_v15 = vld [vmem:[%s6095_s23 + $0x6b8] sm:$0xf0] }
 0x29d   : > { %3531 = vmatpush.bf16.msra.mxu3 %v4755_v53  ;;  %v3240_v53 = vpop.f32.mrf.mxu1  ;;  %v5864_v14 = vld [vmem:[%s6095_s23 + $0x6ac] sm:$0xf] }
 0x29e   : > { %3481 = vmatpush.bf16.msrb.mxu1 %v5487_v56  ;;  %3458 = vmatpush.bf16.msra.mxu0 %v5183_v5  ;;  %v5910_v56 = vld [vmem:[%s6095_s23 + $0x814] sm:$0xf0]  ;;  %v4899_v5 = vor.u32 %v5776_v42, %v4896_v60  ;;  %v5868_v42 = vld [vmem:[%s6095_s23 + $0x6cc] sm:$0xf]  ;;  %v5264_v60 = vld [vmem:[%s6095_s23 + $0x6d8] sm:$0xf0] }
 0x29f   : > { %3471 = vmatpush.bf16.msra.mxu2 %v5311_v13  ;;  %v5423_v0 = vor.u32 %v5910_v56, %v5422_v55  ;;  %v4880_v13 = vld [vmem:[%s6095_s23 + $0x3d8] sm:$0xf0]  ;;  %v4659_v55 = vor.u32 %v5716_v39, %v4656_v40  ;;  %v5283_v56 = vor.u32 %v5872_v46, %v5280_v48  ;;  %v5808_v25 = vld [vmem:[%s6095_s23 + $0x4ec] sm:$0xf] }
 0x2a0   : > { %5558 = vmatmul.msk.bf16.vlgmr.msrb.gmra.mxu3 %vm3097_vm12, %v6946_v32  ;;  %v4883_v24 = vor.u32 %v5772_v12, %v4880_v13  ;;  %v4400_v13 = vld [vmem:[%s6095_s23 + $0x18] sm:$0xf0]  ;;  %v5840_v27 = vld [vmem:[%s6095_s23 + $0x5ec] sm:$0xf] }
 0x2a1   : > { %3532 = vmatpush.bf16.msra.mxu3 %v4739_v19  ;;  %v5720_v19 = vld [vmem:[%s6095_s23 + $0x22c] sm:$0xf]  ;;  %v5008_v46 = vld [vmem:[%s6095_s23 + $0x4d8] sm:$0xf0] }
 0x2a2   : > { %3482 = vmatpush.bf16.msrb.mxu1 %v5471_v6  ;;  %3459 = vmatpush.bf16.msra.mxu0 %v5167_v30  ;;  %v5668_v6 = vld [vmem:[%s6095_s23 + $0x8c] sm:$0xf]  ;;  %v4864_v30 = vld [vmem:[%s6095_s23 + $0x3b8] sm:$0xf0]  ;;  %v4675_v34 = vor.u32 %v5720_v19, %v4672_v21 }
 0x2a3   : > { %3472 = vmatpush.bf16.msra.mxu2 %v5295_v35  ;;  %v4467_v23 = vor.u32 %v5668_v6, %v4464_v8  ;;  %v4867_v44 = vor.u32 %v5768_v29, %v4864_v30  ;;  %v4419_v8 = vor.u32 %v5656_v59, %v4416_v62  ;;  %v5684_v19 = vld [vmem:[%s6095_s23 + $0x10c] sm:$0xf]  ;;  %v5152_v29 = vld [vmem:[%s6095_s23 + $0x5f8] sm:$0xf0]  ;;  %v5251_v30 = vor.u32 %v5864_v14, %v5248_v15 }
 0x2a4   : > { %v5756_v21 = vld [vmem:[%s6095_s23 + $0x34c] sm:$0xf]  ;;  %v5392_v15 = vld [vmem:[%s6095_s23 + $0x7d8] sm:$0xf0] }
 0x2a5   : > { %3460 = vmatmul.bf16.vlgmr.msra.gmra.mxu0 %v6893_v22  ;;  %3533 = vmatpush.bf16.msra.mxu3 %v4723_v49  ;;  %v3242_v35 = vpop.f32.mrf.mxu1  ;;  %v5752_v40 = vld [vmem:[%s6095_s23 + $0x32c] sm:$0xf] }
 0x2a6   : > { %3483 = vmatpush.bf16.msrb.mxu1 %v5455_v28  ;;  %3504 = vmatpush.bf16.msrb.mxu0 %v4515_v38  ;;  %v5696_v28 = vld [vmem:[%s6095_s23 + $0x16c] sm:$0xf]  ;;  %v3227_v38 = vpop.f32.mrf.mxu0 }
 0x2a7   : > { %3517 = vmatpush.bf16.msrb.mxu2 %v4643_v41  ;;  %v3228_v41 = vadd.f32 %v3227_v38, %v7241_v20  ;;  %v4579_v49 = vor.u32 %v5696_v28, %v4576_v31  ;;  %v5692_v20 = vld [vmem:[%s6095_s23 + $0x14c] sm:$0xf] }
 0x2a8   : > { %3473 = vmatmul.bf16.vlgmr.msra.gmra.mxu2 %v6905_v36  ;;  %v4563_v61 = vor.u32 %v5692_v20, %v4560_v54  ;;  %v5860_v35 = vld [vmem:[%s6095_s23 + $0x68c] sm:$0xf] }
 0x2a9   : > { %3534 = vmatpush.bf16.msra.mxu3 %v4707_v63  ;;  %v4832_v63 = vld [vmem:[%s6095_s23 + $0x378] sm:$0xf0]  ;;  %v5748_v59 = vld [vmem:[%s6095_s23 + $0x30c] sm:$0xf] }
 0x2aa   : > { %3484 = vmatpush.bf16.msrb.mxu1 %v5439_v50  ;;  %3505 = vmatpush.bf16.msrb.mxu0 %v4499_v47  ;;  %v4432_v50 = vld [vmem:[%s6095_s23 + $0x58] sm:$0xf0]  ;;  %v7296_v47 = vadd.f32 %v3240_v53, %v3228_v41  ;;  %v5760_v53 = vld [vmem:[%s6095_s23 + $0x36c] sm:$0xf] }
 0x2ab   : > { %3518 = vmatpush.bf16.msrb.mxu2 %v4627_v58  ;;  %v4435_v57 = vor.u32 %v5660_v45, %v4432_v50  ;;  %v4851_v58 = vor.u32 %v5764_v51, %v4848_v52  ;;  %v3253_v3 = vpop.f32.mrf.mxu2  ;;  %v4835_v12 = vor.u32 %v5760_v53, %v4832_v63  ;;  %v4800_v41 = vld [vmem:[%s6095_s23 + $0x338] sm:$0xf0]  ;;  %v5804_v45 = vld [vmem:[%s6095_s23 + $0x4cc] sm:$0xf] }
 0x2ac   : > { %v5136_v50 = vld [vmem:[%s6095_s23 + $0x5d8] sm:$0xf0]  ;;  %v4803_v54 = vor.u32 %v5752_v40, %v4800_v41  ;;  %v5904_v62 = vld [vmem:[%s6095_s23 + $0x7ec] sm:$0xf] }
 0x2ad   : > { %3535 = vmatpush.bf16.msra.mxu3 %v4691_v18  ;;  %v5408_v53 = vld [vmem:[%s6095_s23 + $0x7f8] sm:$0xf0]  ;;  %v5832_v63 = vld [vmem:[%s6095_s23 + $0x5ac] sm:$0xf] }
 0x2ae   : > { %3485 = vmatpush.bf16.msrb.mxu1 %v5423_v0  ;;  %3506 = vmatpush.bf16.msrb.mxu0 %v4483_v4  ;;  %v5688_v0 = vld [vmem:[%s6095_s23 + $0x12c] sm:$0xf]  ;;  %v3229_v6 = vpop.f32.mrf.mxu0 }
 0x2af   : > { %3519 = vmatpush.bf16.msrb.mxu2 %v4611_v7  ;;  %v5652_v4 = vld [vmem:[%s6095_s23 + $0xc] sm:$0xf]  ;;  %v3279_v7 = vpop.f32.mrf.mxu1  ;;  %v4547_v18 = vor.u32 %v5688_v0, %v4544_v1  ;;  %v5120_v0 = vld [vmem:[%s6095_s23 + $0x5b8] sm:$0xf0] }
 0x2b0   : > { %v4403_v28 = vor.u32 %v5652_v4, %v4400_v13  ;;  %v5200_v6 = vld [vmem:[%s6095_s23 + $0x658] sm:$0xf0]  ;;  %v5900_v14 = vld [vmem:[%s6095_s23 + $0x7cc] sm:$0xf] }
 0x2b1   : > { %3486 = vmatmul.bf16.vlgmr.msrb.gmra.mxu1 %v6969_v2  ;;  %3536 = vmatpush.bf16.msra.mxu3 %v4675_v34  ;;  %v3266_v34 = vpop.f32.mrf.mxu3  ;;  %v4976_v13 = vld [vmem:[%s6095_s23 + $0x498] sm:$0xf0] }
 0x2b2   : > { %3543 = vmatpush.bf16.msra.mxu1 %v4899_v5  ;;  %3507 = vmatpush.bf16.msrb.mxu0 %v4467_v23  ;;  %v5267_v5 = vor.u32 %v5868_v42, %v5264_v60  ;;  %v4816_v23 = vld [vmem:[%s6095_s23 + $0x358] sm:$0xf0] }
 0x2b3   : > { %3520 = vmatpush.bf16.msrb.mxu2 %v4595_v26  ;;  %v5024_v26 = vld [vmem:[%s6095_s23 + $0x4f8] sm:$0xf0]  ;;  %v4819_v31 = vor.u32 %v5756_v21, %v4816_v23  ;;  %v3255_v48 = vpop.f32.mrf.mxu2  ;;  %v5848_v21 = vld [vmem:[%s6095_s23 + $0x62c] sm:$0xf] }
 0x2b4   : > { %v5027_v39 = vor.u32 %v5808_v25, %v5024_v26  ;;  %v4784_v42 = vld [vmem:[%s6095_s23 + $0x318] sm:$0xf0]  ;;  %v5395_v25 = vor.u32 %v5900_v14, %v5392_v15  ;;  %v5792_v26 = vld [vmem:[%s6095_s23 + $0x46c] sm:$0xf] }
 0x2b5   : > { %3537 = vmatpush.bf16.msra.mxu3 %v4659_v55  ;;  %v5856_v55 = vld [vmem:[%s6095_s23 + $0x66c] sm:$0xf]  ;;  %v5184_v23 = vld [vmem:[%s6095_s23 + $0x638] sm:$0xf0] }
 0x2b6   : > { %3544 = vmatpush.bf16.msra.mxu1 %v4883_v24  ;;  %3508 = vmatpush.bf16.msrb.mxu0 %v4451_v43  ;;  %v4528_v24 = vld [vmem:[%s6095_s23 + $0x118] sm:$0xf0]  ;;  %v3267_v43 = vadd.f32 %v3266_v34, %v3253_v3  ;;  %v4787_v3 = vor.u32 %v5748_v59, %v4784_v42  ;;  %v5816_v59 = vld [vmem:[%s6095_s23 + $0x52c] sm:$0xf] }
 0x2b7   : > { %3521 = vmatpush.bf16.msrb.mxu2 %v4579_v49  ;;  %v4531_v38 = vor.u32 %v5684_v19, %v4528_v24  ;;  %v5836_v49 = vld [vmem:[%s6095_s23 + $0x5cc] sm:$0xf]  ;;  %v3281_v20 = vpop.f32.mrf.mxu1  ;;  %v5088_v34 = vld [vmem:[%s6095_s23 + $0x578] sm:$0xf0] }
 0x2b8   : > { %3538 = vmatmul.bf16.vlgmr.msra.gmra.mxu3 %v6837_v9  ;;  %v5232_v9 = vld [vmem:[%s6095_s23 + $0x698] sm:$0xf0]  ;;  %v7329_v52 = vadd.f32 %v3279_v7, %v3267_v43  ;;  %v5139_v60 = vor.u32 %v5836_v49, %v5136_v50  ;;  %v5788_v43 = vld [vmem:[%s6095_s23 + $0x44c] sm:$0xf] }
 0x2b9   : > { %3582 = vmatpush.bf16.msrb.mxu3 %v5283_v56  ;;  %v5235_v51 = vor.u32 %v5860_v35, %v5232_v9  ;;  %v5216_v56 = vld [vmem:[%s6095_s23 + $0x678] sm:$0xf0]  ;;  %v3268_v4 = vpop.f32.mrf.mxu3  ;;  %v5187_v35 = vor.u32 %v5848_v21, %v5184_v23  ;;  %v5820_v49 = vld [vmem:[%s6095_s23 + $0x54c] sm:$0xf] }
 0x2ba   : > { %3545 = vmatpush.bf16.msra.mxu1 %v4867_v44  ;;  %3509 = vmatpush.bf16.msrb.mxu0 %v4435_v57  ;;  %v5155_v44 = vor.u32 %v5840_v27, %v5152_v29  ;;  %v5011_v57 = vor.u32 %v5804_v45, %v5008_v46  ;;  %v5219_v1 = vor.u32 %v5856_v55, %v5216_v56  ;;  %v4960_v29 = vld [vmem:[%s6095_s23 + $0x478] sm:$0xf0]  ;;  %v5784_v55 = vld [vmem:[%s6095_s23 + $0x42c] sm:$0xf] }
 0x2bb   : > { %3522 = vmatpush.bf16.msrb.mxu2 %v4563_v61  ;;  %v4992_v61 = vld [vmem:[%s6095_s23 + $0x4b8] sm:$0xf0]  ;;  %v4963_v40 = vor.u32 %v5792_v26, %v4960_v29  ;;  %v5880_v23 = vld [vmem:[%s6095_s23 + $0x72c] sm:$0xf] }
 0x2bc   : > { %v4944_v46 = vld [vmem:[%s6095_s23 + $0x458] sm:$0xf0] }
 0x2bd   : > { %3583 = vmatpush.bf16.msrb.mxu3 %v5267_v5  ;;  %v5852_v5 = vld [vmem:[%s6095_s23 + $0x64c] sm:$0xf]  ;;  %v5360_v48 = vld [vmem:[%s6095_s23 + $0x798] sm:$0xf0]  ;;  %v4947_v20 = vor.u32 %v5788_v43, %v4944_v46 }
 0x2be   : > { %3546 = vmatpush.bf16.msra.mxu1 %v4851_v58  ;;  %3510 = vmatpush.bf16.msrb.mxu0 %v4419_v8  ;;  %v5800_v58 = vld [vmem:[%s6095_s23 + $0x4ac] sm:$0xf]  ;;  %v5411_v8 = vor.u32 %v5904_v62, %v5408_v53  ;;  %v5203_v19 = vor.u32 %v5852_v5, %v5200_v6  ;;  %v5072_v50 = vld [vmem:[%s6095_s23 + $0x558] sm:$0xf0] }
 0x2bf   : > { %3523 = vmatpush.bf16.msrb.mxu2 %v4547_v18  ;;  %v4995_v7 = vor.u32 %v5800_v58, %v4992_v61  ;;  %v5828_v18 = vld [vmem:[%s6095_s23 + $0x58c] sm:$0xf]  ;;  %v4928_v56 = vld [vmem:[%s6095_s23 + $0x438] sm:$0xf0] }
 0x2c0   : > { %v5344_v58 = vld [vmem:[%s6095_s23 + $0x778] sm:$0xf0]  ;;  %v5812_v6 = vld [vmem:[%s6095_s23 + $0x50c] sm:$0xf] }
 0x2c1   : > { %3584 = vmatpush.bf16.msrb.mxu3 %v5251_v30  ;;  %v5896_v30 = vld [vmem:[%s6095_s23 + $0x7ac] sm:$0xf]  ;;  %v5056_v42 = vld [vmem:[%s6095_s23 + $0x538] sm:$0xf0] }
 0x2c2   : > { %3547 = vmatpush.bf16.msra.mxu1 %v4835_v12  ;;  %3511 = vmatpush.bf16.msrb.mxu0 %v4403_v28  ;;  %v5796_v12 = vld [vmem:[%s6095_s23 + $0x48c] sm:$0xf]  ;;  %v5376_v28 = vld [vmem:[%s6095_s23 + $0x7b8] sm:$0xf0]  ;;  %v3292_v9 = vpop.f32.mrf.mxu0  ;;  %v5059_v5 = vor.u32 %v5816_v59, %v5056_v42 }
 0x2c3   : > { %3524 = vmatpush.bf16.msrb.mxu2 %v4531_v38  ;;  %v4979_v24 = vor.u32 %v5796_v12, %v4976_v13  ;;  %v5844_v38 = vld [vmem:[%s6095_s23 + $0x60c] sm:$0xf]  ;;  %v5379_v41 = vor.u32 %v5896_v30, %v5376_v28  ;;  %v4912_v4 = vld [vmem:[%s6095_s23 + $0x418] sm:$0xf0] }
 0x2c4   : > { %v5040_v12 = vld [vmem:[%s6095_s23 + $0x518] sm:$0xf0]  ;;  %v5940_v30 = vld [vmem:[%s6095_s23 + $0x90c] sm:$0xf] }
 0x2c5   : > { %3585 = vmatpush.bf16.msrb.mxu3 %v5235_v51  ;;  %3512 = vmatmul.bf16.vlgmr.msrb.gmra.mxu0 %v6839_v11  ;;  %v5123_v11 = vor.u32 %v5832_v63, %v5120_v0  ;;  %v2508_v63 = vunpack.c.h.b16 %v7179_v10  ;;  %v4931_v0 = vor.u32 %v5784_v55, %v4928_v56  ;;  %v5536_v10 = vld [vmem:[%s6095_s23 + $0x8f8] sm:$0xf0]  ;;  %v5924_v46 = vld [vmem:[%s6095_s23 + $0x88c] sm:$0xf] }
 0x2c6   : > { %3548 = vmatpush.bf16.msra.mxu1 %v4819_v31  ;;  %3556 = vmatpush.bf16.msra.mxu0 %v5027_v39  ;;  %v5824_v31 = vld [vmem:[%s6095_s23 + $0x56c] sm:$0xf]  ;;  %v5168_v39 = vld [vmem:[%s6095_s23 + $0x618] sm:$0xf0] }
 0x2c7   : > { %3569 = vmatpush.bf16.msra.mxu2 %v5155_v44  ;;  %v3293_v44 = vadd.f32 %v3292_v9, %v7329_v52  ;;  %v5091_v45 = vor.u32 %v5824_v31, %v5088_v34  ;;  %v5171_v51 = vor.u32 %v5844_v38, %v5168_v39  ;;  %v5075_v52 = vor.u32 %v5820_v49, %v5072_v50  ;;  %v5552_v28 = vld [vmem:[%s6095_s23 + $0x918] sm:$0xf0]  ;;  %v5876_v9 = vld [vmem:[%s6095_s23 + $0x70c] sm:$0xf] }
 0x2c8   : > { %3525 = vmatmul.bf16.vlgmr.msrb.gmra.mxu2 %v6845_v17  ;;  %v5104_v17 = vld [vmem:[%s6095_s23 + $0x598] sm:$0xf0]  ;;  %v2804_v13 = vpack.c.b16 %v2508_v63, %v2508_v63  ;;  %v5928_v39 = vld [vmem:[%s6095_s23 + $0x8ac] sm:$0xf] }
 0x2c9   : > { %3586 = vmatpush.bf16.msrb.mxu3 %v5219_v1  ;;  %v5107_v27 = vor.u32 %v5828_v18, %v5104_v17  ;;  %v5043_v17 = vor.u32 %v5812_v6, %v5040_v12  ;;  %v5296_v38 = vld [vmem:[%s6095_s23 + $0x718] sm:$0xf0]  ;;  %v5920_v49 = vld [vmem:[%s6095_s23 + $0x86c] sm:$0xf] }
 0x2ca   : > { %3549 = vmatpush.bf16.msra.mxu1 %v4803_v54  ;;  %3557 = vmatpush.bf16.msra.mxu0 %v5011_v57  ;;  %v5888_v57 = vld [vmem:[%s6095_s23 + $0x76c] sm:$0xf]  ;;  %v3294_v62 = vpop.f32.mrf.mxu0  ;;  %v3112_v29 = vsel %vm3101_vm11, %v2804_v13, 0  ;;  %v5299_v43 = vor.u32 %v5876_v9, %v5296_v38  ;;  %v5472_v50 = vld [vmem:[%s6095_s23 + $0x878] sm:$0xf0] }
 0x2cb   : > { %3570 = vmatpush.bf16.msra.mxu2 %v5139_v60  ;;  %v3305_v60 = vpop.f32.mrf.mxu2  ;;  %v5347_v1 = vor.u32 %v5888_v57, %v5344_v58  ;;  %v3318_v15 = vpop.f32.mrf.mxu3  ;;  %v5456_v55 = vld [vmem:[%s6095_s23 + $0x858] sm:$0xf0]  ;;  %v5912_v56 = vld [vmem:[%s6095_s23 + $0x82c] sm:$0xf] }
 0x2cc   : > { %v3306_v61 = vadd.f32 %v3305_v60, %v3293_v44  ;;  %v5440_v57 = vld [vmem:[%s6095_s23 + $0x838] sm:$0xf0] }
 0x2cd   : > { %3587 = vmatpush.bf16.msrb.mxu3 %v5203_v19  ;;  %v5443_v60 = vor.u32 %v5912_v56, %v5440_v57  ;;  %v5424_v63 = vld [vmem:[%s6095_s23 + $0x818] sm:$0xf0] }
 0x2ce   : > { %3550 = vmatpush.bf16.msra.mxu1 %v4787_v3  ;;  %3558 = vmatpush.bf16.msra.mxu0 %v4995_v7  ;;  %v3331_v53 = vpop.f32.mrf.mxu1  ;;  %v5780_v3 = vld [vmem:[%s6095_s23 + $0x40c] sm:$0xf]  ;;  %v3319_v21 = vadd.f32 %v3318_v15, %v3306_v61 }
 0x2cf   : > { %3571 = vmatpush.bf16.msra.mxu2 %v5123_v11  ;;  %v5884_v7 = vld [vmem:[%s6095_s23 + $0x74c] sm:$0xf]  ;;  %v4915_v14 = vor.u32 %v5780_v3, %v4912_v4 }
 0x2d0   : > { %v5936_v11 = vld [vmem:[%s6095_s23 + $0x8ec] sm:$0xf] }
 0x2d1   : > { %3551 = vmatmul.bf16.vlgmr.msra.gmra.mxu1 %v6843_v16  ;;  %v5892_v16 = vld [vmem:[%s6095_s23 + $0x78c] sm:$0xf]  ;;  %3588 = vmatpush.bf16.msrb.mxu3 %v5187_v35  ;;  %v5539_v19 = vor.u32 %v5936_v11, %v5536_v10 }
 0x2d2   : > { %3595 = vmatpush.bf16.msrb.mxu1 %v5411_v8  ;;  %3559 = vmatpush.bf16.msra.mxu0 %v4979_v24  ;;  %v5363_v54 = vor.u32 %v5892_v16, %v5360_v48  ;;  %v5328_v8 = vld [vmem:[%s6095_s23 + $0x758] sm:$0xf0]  ;;  %v5932_v24 = vld [vmem:[%s6095_s23 + $0x8cc] sm:$0xf] }
 0x2d3   : > { %3572 = vmatpush.bf16.msra.mxu2 %v5107_v27  ;;  %v5331_v18 = vor.u32 %v5884_v7, %v5328_v8  ;;  %v3307_v26 = vpop.f32.mrf.mxu2  ;;  %v3332_v27 = vadd.f32 %v3331_v53, %v3319_v21  ;;  %v3320_v44 = vpop.f32.mrf.mxu3  ;;  %v5488_v16 = vld [vmem:[%s6095_s23 + $0x898] sm:$0xf0]  ;;  %v5908_v53 = vld [vmem:[%s6095_s23 + $0x80c] sm:$0xf] }
 0x2d4   : > { %v5491_v48 = vor.u32 %v5924_v46, %v5488_v16 }
 0x2d5   : > { %3589 = vmatpush.bf16.msrb.mxu3 %v5171_v51 }
 0x2d6   : > { %3596 = vmatpush.bf16.msrb.mxu1 %v5395_v25  ;;  %3560 = vmatpush.bf16.msra.mxu0 %v4963_v40  ;;  %v5520_v25 = vld [vmem:[%s6095_s23 + $0x8d8] sm:$0xf0]  ;;  %v3333_v31 = vpop.f32.mrf.mxu1 }
 0x2d7   : > { %3573 = vmatpush.bf16.msra.mxu2 %v5091_v45  ;;  %v5523_v35 = vor.u32 %v5932_v24, %v5520_v25  ;;  %v5504_v40 = vld [vmem:[%s6095_s23 + $0x8b8] sm:$0xf0] }
 0x2d8   : > { %3590 = vmatmul.bf16.vlgmr.msrb.gmra.mxu3 %v6893_v22  ;;  %v5312_v22 = vld [vmem:[%s6095_s23 + $0x738] sm:$0xf0]  ;;  %v5507_v45 = vor.u32 %v5928_v39, %v5504_v40 }
 0x2d9   : > { %v5315_v34 = vor.u32 %v5880_v23, %v5312_v22 }
 0x2da   : > { %3597 = vmatpush.bf16.msrb.mxu1 %v5379_v41  ;;  %3561 = vmatpush.bf16.msra.mxu0 %v4947_v20  ;;  %v5555_v41 = vor.u32 %v5940_v30, %v5552_v28  ;;  %v5475_v20 = vor.u32 %v5920_v49, %v5472_v50 }
 0x2db   : > { %3574 = vmatpush.bf16.msra.mxu2 %v5075_v52 }
 0x2de   : > { %3598 = vmatpush.bf16.msrb.mxu1 %v5363_v54  ;;  %3562 = vmatpush.bf16.msra.mxu0 %v4931_v0  ;;  %v5916_v54 = vld [vmem:[%s6095_s23 + $0x84c] sm:$0xf]  ;;  %v5427_v0 = vor.u32 %v5908_v53, %v5424_v63 }
 0x2df   : > { %3575 = vmatpush.bf16.msra.mxu2 %v5059_v5  ;;  %v5459_v52 = vor.u32 %v5916_v54, %v5456_v55 }
 0x2e2   : > { %3599 = vmatpush.bf16.msrb.mxu1 %v5347_v1  ;;  %3563 = vmatpush.bf16.msra.mxu0 %v4915_v14 }
 0x2e3   : > { %3576 = vmatpush.bf16.msra.mxu2 %v5043_v17 }
 0x2e5   : > { %3564 = vmatmul.bf16.vlgmr.msra.gmra.mxu0 %v6900_v33  ;;  %v3344_v33 = vpop.f32.mrf.mxu0 }
 0x2e6   : > { %3600 = vmatpush.bf16.msrb.mxu1 %v5331_v18  ;;  %3608 = vmatpush.bf16.msrb.mxu0 %v5539_v19  ;;  %v3345_v51 = vadd.f32 %v3344_v33, %v3332_v27 }
 0x2e7   : > { %3627 = vmatpush.bf16.msrb.mxu2 %v3112_v29 }
 0x2e8   : > { %3577 = vmatmul.bf16.vlgmr.msra.gmra.mxu2 %v6907_v37  ;;  %v3370_v37 = vpop.f32.mrf.mxu3 }
 0x2ea   : > { %3601 = vmatpush.bf16.msrb.mxu1 %v5315_v34  ;;  %3609 = vmatpush.bf16.msrb.mxu0 %v5523_v35 }
 0x2eb   : > { %3628 = vmatpush.bf16.msrb.mxu2 %v5555_v41  ;;  %v3357_v58 = vpop.f32.mrf.mxu2 }
 0x2ec   : > { %v3358_v59 = vadd.f32 %v3357_v58, %v3345_v51 }
 0x2ed   : > { %v3346_v42 = vpop.f32.mrf.mxu0 }
 0x2ee   : > { %3602 = vmatpush.bf16.msrb.mxu1 %v5299_v43  ;;  %3610 = vmatpush.bf16.msrb.mxu0 %v5507_v45  ;;  %v3383_v61 = vpop.f32.mrf.mxu1  ;;  %v7409_v62 = vadd.f32 %v3370_v37, %v3358_v59 }
 0x2f1   : > { %3603 = vmatmul.bf16.vlgmr.msrb.gmra.mxu1 %v6905_v36  ;;  %v3372_v36 = vpop.f32.mrf.mxu3 }
 0x2f2   : > { %3611 = vmatpush.bf16.msrb.mxu0 %v5491_v48 }
 0x2f3   : > { %v3359_v1 = vpop.f32.mrf.mxu2 }
 0x2f6   : > { %3612 = vmatpush.bf16.msrb.mxu0 %v5475_v20  ;;  %v3385_v4 = vpop.f32.mrf.mxu1 }
 0x2f8   : > { %5559 = vmatmul.msk.bf16.vlgmr.msrb.gmra.mxu2 %vm3097_vm12, %v6946_v32 }
 0x2f9   : > { %v3396_v3 = vpop.f32.mrf.mxu3 }
 0x2fa   : > { %3613 = vmatpush.bf16.msrb.mxu0 %v5459_v52  ;;  %v3397_v5 = vadd.f32 %v3396_v3, %v3383_v61 }
 0x2fe   : > { %3614 = vmatpush.bf16.msrb.mxu0 %v5443_v60 }
 0x301   : > { %v3398_v6 = vpop.f32.mrf.mxu3 }
 0x302   : > { %3615 = vmatpush.bf16.msrb.mxu0 %v5427_v0  ;;  %v3409_v32 = vpop.f32.mrf.mxu0 }
 0x303   : > { %v3410_v7 = vadd.f32 %v3409_v32, %v3397_v5 }
 0x305   : > { %3616 = vmatmul.bf16.vlgmr.msrb.gmra.mxu0 %v6969_v2 }
 0x30a   : > { %v3411_v10 = vpop.f32.mrf.mxu0 }
 0x30b   : > { %v3422_v8 = vpop.f32.mrf.mxu2 }
 0x30c   : > { %v3423_v12 = vadd.f32 %v3422_v8, %v3410_v7 }
 0x30e   : > { %v3435_v11 = vpop.f32.mrf.mxu1 }
 0x30f   : > { %v3436_v13 = vadd.f32 %v3435_v11, %v3423_v12 }
 0x313   : > { %v3424_v14 = vpop.f32.mrf.mxu2  ;;  %v3448_v18 = vpop.f32.mrf.mxu3 }
 0x314   : > { %v3449_v17 = vadd.f32 %v3448_v18, %v3436_v13 }
 0x316   : > { %v3437_v15 = vpop.f32.mrf.mxu1 }
 0x31b   : > { %v3450_v19 = vpop.f32.mrf.mxu3 }
 0x322   : > { %v3461_v21 = vpop.f32.mrf.mxu0 }
 0x323   : > { %v3462_v23 = vadd.f32 %v3461_v21, %v3449_v17  ;;  %v3500_v22 = vpop.f32.mrf.mxu3 }
 0x32a   : > { %v3463_v2 = vpop.f32.mrf.mxu0 }
 0x32b   : > { %v3474_v24 = vpop.f32.mrf.mxu2  ;;  %v3502_v30 = vpop.f32.mrf.mxu3 }
 0x32c   : > { %v3475_v25 = vadd.f32 %v3474_v24, %v3462_v23 }
 0x32e   : > { %v3487_v26 = vpop.f32.mrf.mxu1 }
 0x32f   : > { %v3488_v27 = vadd.f32 %v3487_v26, %v3475_v25 }
 0x331   : > { %v3501_v29 = vadd.f32 %v3500_v22, %v3488_v27 }
 0x333   : > { %v3476_v28 = vpop.f32.mrf.mxu2 }
 0x336   : > { %v3489_v31 = vpop.f32.mrf.mxu1 }
 0x33b   : > { %v3539_v34 = vpop.f32.mrf.mxu3 }
 0x342   : > { %v3513_v35 = vpop.f32.mrf.mxu0 }
 0x343   : > { %v3541_v9 = vpop.f32.mrf.mxu3 }
 0x34a   : > { %v3515_v40 = vpop.f32.mrf.mxu0 }
 0x34b   : > { %v3526_v38 = vpop.f32.mrf.mxu2 }
 0x34c   : > { %v3527_v46 = vadd.f32 %v3526_v38, %v3513_v35 }
 0x34e   : > { %v3552_v39 = vpop.f32.mrf.mxu1  ;;  %v3540_v49 = vadd.f32 %v3539_v34, %v3527_v46 }
 0x350   : > { %v3553_v37 = vadd.f32 %v3552_v39, %v3540_v49 }
 0x353   : > { %v3528_v41 = vpop.f32.mrf.mxu2 }
 0x356   : > { %v3554_v43 = vpop.f32.mrf.mxu1 }
 0x35b   : > { %v3591_v44 = vpop.f32.mrf.mxu3 }
 0x362   : > { %v3565_v45 = vpop.f32.mrf.mxu0 }
 0x363   : > { %v3593_v16 = vpop.f32.mrf.mxu3  ;;  %v3566_v20 = vadd.f32 %v3565_v45, %v3553_v37 }
 0x36a   : > { %v3567_v33 = vpop.f32.mrf.mxu0 }
 0x36b   : > { %v3578_v48 = vpop.f32.mrf.mxu2 }
 0x36c   : > { %v3579_v55 = vadd.f32 %v3578_v48, %v3566_v20 }
 0x36e   : > { %v3604_v50 = vpop.f32.mrf.mxu1  ;;  %v3592_v56 = vadd.f32 %v3591_v44, %v3579_v55 }
 0x370   : > { %v3605_v57 = vadd.f32 %v3604_v50, %v3592_v56 }
 0x373   : > { %v3580_v51 = vpop.f32.mrf.mxu2 }
 0x376   : > { %v3606_v54 = vpop.f32.mrf.mxu1 }
 0x37b   : > { %v3630_v52 = vpop.f32.mrf.mxu2 }
 0x382   : > { %v3617_v58 = vpop.f32.mrf.mxu0 }
 0x383   : > { %v3618_v59 = vadd.f32 %v3617_v58, %v3605_v57  ;;  %v3632_v42 = vpop.f32.mrf.mxu2 }
 0x385   : > { %v3631_v36 = vadd.f32 %v3630_v52, %v3618_v59 }
 0x386   : > { %3636 = sbr.rel (%p3991_p4) target bundleno = 913 (0x391), region = 72 }
 0x38a   : > { %v3619_v60 = vpop.f32.mrf.mxu0 }
 0x38b   : > { %v3641_v61 = vrot.slane %v7409_v62, 6  ;;  %v3642_v53 = vrot.slane %v3501_v29, 4  ;;  %v3643_v63 = vrot.slane %v3631_v36, 2  ;;  %vm3644_vm13 = vcmask 1041408  }
 0x38c   : > { %vm3646_vm14 = vcmask 1045508   ;;  %vm3650_vm15 = vcmask 1043458   ;;  %vm3653_vm0 = vcmask 130054  }
 0x38d   : > { %v3645_v0 = vsel %vm3644_vm13, %v7296_v47, %v3641_v61  ;;  %v3647_v1 = vsel %vm3646_vm14, %v3642_v53, %v3643_v63  ;;  %vm3651_vm1 = vmor %vm3650_vm15, %vm3644_vm13 }
 0x38e   : > { %v3648_v3 = vsel %vm3101_vm11, %v3645_v0, %v3647_v1  ;;  %vm3652_vm2 = vmor %vm3646_vm14, %vm3651_vm1 }
 0x38f   : > { %vm3654_vm3 = vmor %vm3653_vm0, %vm3652_vm2 }
 0x390   : > { %3655 = vst.msk [vmem:[#allocation3] sm:$0xff] %vm3654_vm3, %v3648_v3 }
 0x391 PF: > { %p5561_p5 = scmp.le.s32.totalorder %s6086_s18, 0 }
 0x393   : > { %3659 = sbr.rel (%p5561_p5) target bundleno = 927 (0x39f), region = 76 }
 0x398   : > { %v3665_v4 = vrot.slane %v7409_v62, 6  ;;  %v3666_v5 = vrot.slane %v3501_v29, 4  ;;  %v3667_v6 = vrot.slane %v3631_v36, 2  ;;  %vm3668_vm4 = vcmask 1041408   ;;  %v3660_v32 = vld [vmem:[#allocation3] sm:$0xff] }
 0x399   : > { %vm3670_vm5 = vcmask 1045508   ;;  %vm3675_vm6 = vcmask 1043458   ;;  %vm3678_vm7 = vcmask 130054  }
 0x39a   : > { %v3669_v7 = vsel %vm3668_vm4, %v7296_v47, %v3665_v4  ;;  %v3671_v8 = vsel %vm3670_vm5, %v3666_v5, %v3667_v6  ;;  %vm3676_vm8 = vmor %vm3675_vm6, %vm3668_vm4 }
 0x39b   : > { %v3672_v12 = vsel %vm3101_vm11, %v3669_v7, %v3671_v8  ;;  %vm3677_vm9 = vmor %vm3670_vm5, %vm3676_vm8 }
 0x39c   : > { %v3674_v11 = vmax.f32 %v3660_v32, %v3672_v12  ;;  %vm3679_vm10 = vmor %vm3678_vm7, %vm3677_vm9 }
 0x39e   : > { %3680 = vst.msk [vmem:[#allocation3] sm:$0xff] %vm3679_vm10, %v3674_v11 }
 0x39f PF: > { %p5562_p6 = scmp.ne.s32.totalorder %s6086_s18, 3 }
 0x3a1   : > { %3684 = sbr.rel (%p5562_p6) target bundleno = 1369 (0x559), region = 80 }
 0x3a6   : > { %v3750_v62 = vld [vmem:[%s7680_s5 + $0x178] sm:$0xff]  ;;  %v3749_v10 = vld [vmem:[%s7680_s5 + $0x170] sm:$0xff]  ;;  %v3748_v15 = vld [vmem:[%s7680_s5 + $0x168] sm:$0xff]  ;;  %vm3695_vm12 = vcmask 1041408   ;;  %vm3697_vm13 = vcmask 1045508   ;;  %vm3766_vm14 = vcmask 130048  }
 0x3a7   : > { %v3718_v47 = vld [vmem:[%s7680_s5 + $0x78] sm:$0xff]  ;;  %3809 = vmatpush.msra.mxu2 %v3750_v62  ;;  %v3717_v13 = vld [vmem:[%s7680_s5 + $0x70] sm:$0xff]  ;;  %v3716_v18 = vld [vmem:[%s7680_s5 + $0x68] sm:$0xff]  ;;  %vm3909_vm15 = vcmask 687104   ;;  %vm3936_vm0 = vcmask 74752  }
 0x3a8   : > { %3769 = vmatpush.msra.mxu0 %v3718_v47  ;;  %v3734_v14 = vld [vmem:[%s7680_s5 + $0xf8] sm:$0xff]  ;;  %v3733_v17 = vld [vmem:[%s7680_s5 + $0xf0] sm:$0xff]  ;;  %v3732_v19 = vld [vmem:[%s7680_s5 + $0xe8] sm:$0xff] }
 0x3a9   : > { %3789 = vmatpush.msra.mxu1 %v3734_v14  ;;  %3810 = vmatpush.msra.mxu2 %v3749_v10  ;;  %v3747_v21 = vld [vmem:[%s7680_s5 + $0x160] sm:$0xff]  ;;  %v3746_v24 = vld [vmem:[%s7680_s5 + $0x158] sm:$0xff]  ;;  %v3745_v2 = vld [vmem:[%s7680_s5 + $0x150] sm:$0xff] }
 0x3aa   : > { %3770 = vmatpush.msra.mxu0 %v3717_v13  ;;  %v3715_v23 = vld [vmem:[%s7680_s5 + $0x60] sm:$0xff]  ;;  %v3714_v25 = vld [vmem:[%s7680_s5 + $0x58] sm:$0xff]  ;;  %v3713_v27 = vld [vmem:[%s7680_s5 + $0x50] sm:$0xff] }
 0x3ab   : > { %3790 = vmatpush.msra.mxu1 %v3733_v17  ;;  %3811 = vmatpush.msra.mxu2 %v3748_v15  ;;  %v3731_v22 = vld [vmem:[%s7680_s5 + $0xe0] sm:$0xff]  ;;  %v3730_v26 = vld [vmem:[%s7680_s5 + $0xd8] sm:$0xff]  ;;  %v3729_v29 = vld [vmem:[%s7680_s5 + $0xd0] sm:$0xff] }
 0x3ac   : > { %3771 = vmatpush.msra.mxu0 %v3716_v18  ;;  %v3744_v30 = vld [vmem:[%s7680_s5 + $0x148] sm:$0xff]  ;;  %v3743_v34 = vld [vmem:[%s7680_s5 + $0x140] sm:$0xff]  ;;  %v3742_v38 = vld [vmem:[%s7680_s5 + $0x138] sm:$0xff] }
 0x3ad   : > { %3791 = vmatpush.msra.mxu1 %v3732_v19  ;;  %3812 = vmatpush.msra.mxu2 %v3747_v21  ;;  %v3712_v28 = vld [vmem:[%s7680_s5 + $0x48] sm:$0xff]  ;;  %v3711_v35 = vld [vmem:[%s7680_s5 + $0x40] sm:$0xff]  ;;  %v3710_v39 = vld [vmem:[%s7680_s5 + $0x38] sm:$0xff] }
 0x3ae   : > { %3772 = vmatpush.msra.mxu0 %v3715_v23  ;;  %v3728_v31 = vld [vmem:[%s7680_s5 + $0xc8] sm:$0xff]  ;;  %v3727_v9 = vld [vmem:[%s7680_s5 + $0xc0] sm:$0xff]  ;;  %v3726_v40 = vld [vmem:[%s7680_s5 + $0xb8] sm:$0xff] }
 0x3af   : > { %3792 = vmatpush.msra.mxu1 %v3731_v22  ;;  %3813 = vmatpush.msra.mxu2 %v3746_v24  ;;  %v3752_v41 = vld [vmem:[%s7680_s5 + $0x188] sm:$0xff]  ;;  %v3686_v43 = vld [vmem:[%s7679_s4] sm:$0xf]  ;;  %v3741_v44 = vld [vmem:[%s7680_s5 + $0x130] sm:$0xff] }
 0x3b0   : > { %3773 = vmatpush.msra.mxu0 %v3714_v25  ;;  %v3709_v45 = vld [vmem:[%s7680_s5 + $0x30] sm:$0xff]  ;;  %3843 = vmatpush.msra.mxu3 %v3752_v41  ;;  %v3688_v46 = vperm.slane %v3686_v43, 0  ;;  %v3689_v16 = vperm.slane %v3686_v43, 1  ;;  %v3690_v48 = vperm.slane %v3686_v43, 2  ;;  %v3691_v49 = vperm.slane %v3686_v43, 3  ;;  %v3751_v33 = vld [vmem:[%s7680_s5 + $0x180] sm:$0xff] }
 0x3b1   : > { %3793 = vmatpush.msra.mxu1 %v3730_v26  ;;  %3814 = vmatpush.msra.mxu2 %v3745_v2  ;;  %v3725_v50 = vld [vmem:[%s7680_s5 + $0xb0] sm:$0xff]  ;;  %v3740_v51 = vld [vmem:[%s7680_s5 + $0x128] sm:$0xff]  ;;  %v3739_v54 = vld [vmem:[%s7680_s5 + $0x120] sm:$0xff] }
 0x3b2   : > { %3774 = vmatpush.msra.mxu0 %v3713_v27  ;;  %v3864_v37 = vld [vmem:[%s7682_s7 + $0x70] sm:$0xff]  ;;  %v3708_v20 = vld [vmem:[%s7680_s5 + $0x28] sm:$0xff]  ;;  %v3692_v55 = vrot.slane %v3689_v16, 6  ;;  %v3693_v52 = vrot.slane %v3690_v48, 4  ;;  %v3694_v56 = vrot.slane %v3691_v49, 2  ;;  %3844 = vmatpush.msra.mxu3 %v3751_v33  ;;  %v3685_v58 = vld [vmem:[#allocation3] sm:$0xff] }
 0x3b3   : > { %3794 = vmatpush.msra.mxu1 %v3729_v29  ;;  %3815 = vmatpush.msra.mxu2 %v3744_v30  ;;  %v3724_v57 = vld [vmem:[%s7680_s5 + $0xa8] sm:$0xff]  ;;  %v3707_v42 = vld [vmem:[%s7680_s5 + $0x20] sm:$0xff]  ;;  %v3738_v0 = vld [vmem:[%s7680_s5 + $0x118] sm:$0xff] }
 0x3b4   : > { %3775 = vmatpush.msra.mxu0 %v3712_v28  ;;  %v3863_v59 = vld [vmem:[%s7682_s7 + $0x68] sm:$0xff]  ;;  %v3723_v36 = vld [vmem:[%s7680_s5 + $0xa0] sm:$0xff]  ;;  %v3696_v60 = vsel %vm3695_vm12, %v3688_v46, %v3692_v55  ;;  %v3698_v61 = vsel %vm3697_vm13, %v3693_v52, %v3694_v56  ;;  %3874 = vmatpush.msrb.mxu3 %v3864_v37  ;;  %v3706_v1 = vld [vmem:[%s7680_s5 + $0x18] sm:$0xff] }
 0x3b5   : > { %3795 = vmatpush.msra.mxu1 %v3728_v31  ;;  %3816 = vmatpush.msra.mxu2 %v3743_v34  ;;  %v3699_v53 = vsel %vm3101_vm11, %v3696_v60, %v3698_v61  ;;  %v3862_v63 = vld [vmem:[%s7682_s7 + $0x60] sm:$0xff]  ;;  %v3722_v4 = vld [vmem:[%s7680_s5 + $0x98] sm:$0xff]  ;;  %v3737_v6 = vld [vmem:[%s7680_s5 + $0x110] sm:$0xff] }
 0x3b6   : > { %3776 = vmatpush.msra.mxu0 %v3711_v35  ;;  %v3701_v3 = vadd.f32 %v3699_v53, %v3685_v58  ;;  %3875 = vmatpush.msrb.mxu3 %v3863_v59  ;;  %v3861_v5 = vld [vmem:[%s7682_s7 + $0x58] sm:$0xff]  ;;  %v3705_v32 = vld [vmem:[%s7680_s5 + $0x10] sm:$0xff]  ;;  %v3736_v11 = vld [vmem:[%s7680_s5 + $0x108] sm:$0xff] }
 0x3b7   : > { %3796 = vmatpush.msra.mxu1 %v3727_v9  ;;  %3817 = vmatpush.msra.mxu2 %v3742_v38  ;;  %v3721_v8 = vld [vmem:[%s7680_s5 + $0x90] sm:$0xff]  ;;  %v3704_v62 = vld [vmem:[%s7680_s5 + $0x8] sm:$0xff]  ;;  %v3735_v13 = vld [vmem:[%s7680_s5 + $0x100] sm:$0xff] }
 0x3b8   : > { %3777 = vmatpush.msra.mxu0 %v3710_v39  ;;  %v3702_v7 = vmax.f32 %v3701_v3, 0.0  ;;  %3876 = vmatpush.msrb.mxu3 %v3862_v63  ;;  %v3860_v12 = vld [vmem:[%s7682_s7 + $0x50] sm:$0xff]  ;;  %v3720_v47 = vld [vmem:[%s7680_s5 + $0x88] sm:$0xff]  ;;  %v3703_v14 = vld [vmem:[%s7680_s5] sm:$0xff] }
 0x3b9   : > { %3797 = vmatpush.msra.mxu1 %v3726_v40  ;;  %3818 = vmatpush.msra.mxu2 %v3741_v44  ;;  %v3859_v10 = vld [vmem:[%s7682_s7 + $0x48] sm:$0xff]  ;;  %v3719_v15 = vld [vmem:[%s7680_s5 + $0x80] sm:$0xff]  ;;  %v3857_v17 = vld [vmem:[%s7682_s7 + $0x38] sm:$0xff] }
 0x3ba   : > { %3778 = vmatpush.msra.mxu0 %v3709_v45  ;;  %3758 = vst [vmem:[#allocation1] ss:$4 sm:$0xff] %v3702_v7  ;;  %3877 = vmatpush.msrb.mxu3 %v3861_v5  ;;  %v3858_v18 = vld [vmem:[%s7682_s7 + $0x40] sm:$0xff]  ;;  %v3856_v24 = vld [vmem:[%s7682_s7 + $0x30] sm:$0xff]  ;;  %v3855_v25 = vld [vmem:[%s7682_s7 + $0x28] sm:$0xff] }
 0x3bb   : > { %3798 = vmatpush.msra.mxu1 %v3725_v50  ;;  %3819 = vmatpush.msra.mxu2 %v3740_v51  ;;  %v3854_v26 = vld [vmem:[%s7682_s7 + $0x20] sm:$0xff]  ;;  %v3853_v2 = vld [vmem:[%s7682_s7 + $0x18] sm:$0xff]  ;;  %v3852_v27 = vld [vmem:[%s7682_s7 + $0x10] sm:$0xff] }
 0x3bc   : > { %3779 = vmatpush.msra.mxu0 %v3708_v20  ;;  %3878 = vmatpush.msrb.mxu3 %v3860_v12  ;;  %v3851_v29 = vld [vmem:[%s7682_s7 + $0x8] sm:$0xff]  ;;  %v3850_v30 = vld [vmem:[%s7682_s7] sm:$0xff]  ;;  %v3904_v28 = vld [vmem:[%s7684_s9 + $0x50] sm:$0xf] }
 0x3bd   : > { %3799 = vmatpush.msra.mxu1 %v3724_v57  ;;  %3820 = vmatpush.msra.mxu2 %v3739_v54  ;;  %v3903_v31 = vld [vmem:[%s7684_s9 + $0x48] sm:$0xff]  ;;  %v3902_v34 = vld [vmem:[%s7684_s9 + $0x40] sm:$0xff]  ;;  %v3901_v35 = vld [vmem:[%s7684_s9 + $0x38] sm:$0xff] }
 0x3be   : > { %3780 = vmatpush.msra.mxu0 %v3707_v42  ;;  %3879 = vmatpush.msrb.mxu3 %v3859_v10  ;;  %v3900_v9 = vld [vmem:[%s7684_s9 + $0x30] sm:$0xff]  ;;  %v3899_v38 = vld [vmem:[%s7684_s9 + $0x28] sm:$0xff]  ;;  %v3898_v39 = vld [vmem:[%s7684_s9 + $0x20] sm:$0xff] }
 0x3bf   : > { %3800 = vmatpush.msra.mxu1 %v3723_v36  ;;  %3821 = vmatpush.msra.mxu2 %v3738_v0  ;;  %v3897_v40 = vld [vmem:[%s7684_s9 + $0x18] sm:$0xff]  ;;  %v5968_v41 = vld [vmem:[%s7681_s6] ss:$0 sm:$0xff]  ;;  %v3896_v37 = vld [vmem:[%s7684_s9 + $0x10] sm:$0xff] }
 0x3c0   : > { %3781 = vmatpush.msra.mxu0 %v3706_v1  ;;  %3880 = vmatpush.msrb.mxu3 %v3858_v18  ;;  %v3895_v51 = vld [vmem:[%s7684_s9 + $0x8] sm:$0xff]  ;;  %v3894_v20 = vld [vmem:[%s7684_s9] sm:$0xff] }
 0x3c1   : > { %3801 = vmatpush.msra.mxu1 %v3722_v4  ;;  %3822 = vmatpush.msra.mxu2 %v3737_v6  ;;  %v3761_v19 = vld.sshfl [vmem:[#allocation1 + $0x10] sm:$0xff pattern:$0x73625140]  ;;  %v3759_v21 = vld.sshfl [vmem:[#allocation1] sm:$0xff pattern:$0x73625140] }
 0x3c2   : > { %3782 = vmatpush.msra.mxu0 %v3705_v32  ;;  %v3762_v23 = vld.sshfl [vmem:[#allocation1 + $0x18] sm:$0xff pattern:$0x73625140]  ;;  %v3760_v22 = vld.sshfl [vmem:[#allocation1 + $0x8] sm:$0xff pattern:$0x73625140]  ;;  %3881 = vmatpush.msrb.mxu3 %v3857_v17 }
 0x3c3   : > { %3802 = vmatpush.msra.mxu1 %v3721_v8  ;;  %3823 = vmatpush.msra.mxu2 %v3736_v11  ;;  %v5969_v54 = vld [vmem:[%s7683_s8] ss:$0 sm:$0xff] }
 0x3c4   : > { %3783 = vmatpush.msra.mxu0 %v3704_v62  ;;  %5563 = vmatmul.msk.f32.vlgmr.msra.gmra.mxu3 %vm3766_vm14, %v3762_v23  ;;  %v5970_v57 = vld [vmem:[%s7685_s10] ss:$0 sm:$0xff] }
 0x3c5   : > { %3803 = vmatpush.msra.mxu1 %v3720_v47  ;;  %3824 = vmatpush.msra.mxu2 %v3735_v13 }
 0x3c6   : > { %3784 = vmatpush.msra.mxu0 %v3703_v14  ;;  %3825 = vmatmul.f32.vlgmr.msra.gmra.mxu2 %v3761_v19 }
 0x3c7   : > { %3804 = vmatpush.msra.mxu1 %v3719_v15  ;;  %3785 = vmatmul.f32.vlgmr.msra.gmra.mxu0 %v3759_v21 }
 0x3c8   : > { %3805 = vmatmul.f32.vlgmr.msra.gmra.mxu1 %v3760_v22  ;;  %3882 = vmatpush.msrb.mxu3 %v3856_v24 }
 0x3c9   : > { %5565 = vmatpush.msk.msrb.mxu0 %vm3101_vm11, %v3904_v28  ;;  %vm3869_vm11 = vcmask 982016  }
 0x3ca   : > { %3883 = vmatpush.msrb.mxu3 %v3855_v25 }
 0x3cb   : > { %3922 = vmatpush.msrb.mxu0 %v3903_v31 }
 0x3cc   : > { %3884 = vmatpush.msrb.mxu3 %v3854_v26 }
 0x3cd   : > { %3923 = vmatpush.msrb.mxu0 %v3902_v34 }
 0x3ce   : > { %3885 = vmatpush.msrb.mxu3 %v3853_v2 }
 0x3cf   : > { %3924 = vmatpush.msrb.mxu0 %v3901_v35 }
 0x3d0   : > { %3886 = vmatpush.msrb.mxu3 %v3852_v27 }
 0x3d1   : > { %3925 = vmatpush.msrb.mxu0 %v3900_v9 }
 0x3d2   : > { %3887 = vmatpush.msrb.mxu3 %v3851_v29 }
 0x3d3   : > { %3926 = vmatpush.msrb.mxu0 %v3899_v38 }
 0x3d4   : > { %3888 = vmatpush.msrb.mxu3 %v3850_v30 }
 0x3d5   : > { %3927 = vmatpush.msrb.mxu0 %v3898_v39 }
 0x3d7   : > { %3928 = vmatpush.msrb.mxu0 %v3897_v40 }
 0x3d9   : > { %3929 = vmatpush.msrb.mxu0 %v3896_v37 }
 0x3db   : > { %3930 = vmatpush.msrb.mxu0 %v3895_v51 }
 0x3dd   : > { %3931 = vmatpush.msrb.mxu0 %v3894_v20 }
 0x444   : > { %v3786_v43 = vpop.f32.mrf.mxu0 }
 0x445   : > { %v3787_v44 = vadd.f32 %v5968_v41, %v3786_v43  ;;  %v3806_v45 = vpop.f32.mrf.mxu1 }
 0x447   : > { %v3807_v46 = vadd.f32 %v3806_v45, %v3787_v44  ;;  %v3846_v49 = vpop.f32.mrf.mxu3 }
 0x449   : > { %v3826_v16 = vpop.f32.mrf.mxu2 }
 0x44a   : > { %v3827_v48 = vadd.f32 %v3826_v16, %v3807_v46 }
 0x44c   : > { %v3847_v50 = vadd.f32 %v3846_v49, %v3827_v48 }
 0x44e   : > { %v3849_v33 = vmax.f32 %v3847_v50, 0.0 }
 0x450   : > { %5564 = vmatmul.msk.f32.vlgmr.msrb.gmra.mxu3 %vm3869_vm11, %v3849_v33 }
 0x4d3   : > { %v3890_v55 = vpop.f32.mrf.mxu3 }
 0x4d4   : > { %v3891_v52 = vadd.f32 %v5969_v54, %v3890_v55 }
 0x4d6   : > { %v3893_v56 = vmax.f32 %v3891_v52, 0.0 }
 0x4d8   : > { %5566 = vmatmul.msk.f32.vlgmr.msrb.gmra.mxu0 %vm3909_vm15, %v3893_v56 }
 0x555   : > { %v3933_v58 = vpop.f32.mrf.mxu0 }
 0x556   : > { %v3934_v59 = vadd.f32 %v5970_v57, %v3933_v58 }
 0x558   : > { %3937 = vst.msk [vmem:[#allocation4] sm:$0x3] %vm3936_vm0, %v3934_v59 }
 0x559 PF: > { %p5948_p7 = scmp.eq.s32.totalorder %s6086_s18, 3  ;;  %s6019_s24 = smov [#allocation4]  }
 0x55a   : > { %s3944_s25 = sshll.u32 %s6019_s24, 4  ;;  %s3946_s28 = sshll.u32 %s7686_s11, 4  ;;  %s3945_s25 = int_to_ptr.vmem [resolvable:$true] %s3944_s25  ;;  %s3947_s28 = int_to_ptr.hbm [resolvable:$true] %s3946_s28 }
 0x55b   : > { %5945 = dma.vmem_to_hbm [thread:$0]  (%p5948_p7), %s3945_s25, 32, %s3947_s28, [#allocation5]  }
 0x55c   : > { %6004 = dma.done.wait (%p5948_p7), [#allocation5], 32  }
 0x55d   : > { %6006 = vsyncadd (%p5948_p7), [#allocation5], 4294967264 }
 0x55e PF: > { %s22_s17 = sadd.s32 1, %s6009_s17  }
 0x55f   : > { %p19_p8 = scmp.ge.s32.totalorder %s22_s17, 6  }
 0x561   :  { %21 = sbr.rel (!%p19_p8) target bundleno = 1 (0x1), region = 132 }
 0x566   :  { %3960 = vsyncpa [#allocation5], 1 }
 0x567   :  { %3962 = vsyncpa [#allocation5 + $0x1], 1 }

</bundles_post_ra>
